<compile_context>
chip_gen: v7x
topology: tpu7x:2x2x1
jax: 0.10.0
libtpu: 0.0.40
codegen_flags: <defaults>
</compile_context>

<pallas_src>
import numpy as np
import jax
import jax.numpy as jnp
from jax.experimental import pallas as pl
from jax.experimental.pallas import tpu as pltpu

FRAMES = 19      # self.frames
NFILT = 80       # n_filters (F)
Z_DIM = 32       # z_dim (small for the demo)
LEAK = 0.1       # LeakyReLU slope (relu=0.1 default)
BN_EPS = 1e-5

F32 = jnp.float32
BF16 = jnp.bfloat16


# ----------------------------- Pallas kernel ------------------------------- #
def _glu(a, ba, g, bg):
    a = a + ba
    g = g + bg
    return a * jax.nn.sigmoid(g)


def encoder_kernel(x_ref, s2_ref, s3_ref, sfc_ref,
                   w1a_ref, b1a_ref, w1g_ref, b1g_ref,
                   w2a_ref, b2a_ref, w2g_ref, b2g_ref,
                   w3a_ref, b3a_ref, w3g_ref, b3g_ref,
                   wfc_ref, bfc_ref, wh_ref, bh_ref,
                   out_ref):
    x = x_ref[0]                                                    # (TB*19, 80) bf16

    # Stage 1: Conv2d(1,64,(1,80)) == full-frequency matmul over all TB*19 rows, GLU.
    a1 = jnp.dot(x, w1a_ref[...], preferred_element_type=F32)
    g1 = jnp.dot(x, w1g_ref[...], preferred_element_type=F32)
    h1 = _glu(a1, b1a_ref[...], g1, b1g_ref[...]).astype(BF16)      # (TB*19, 64)

    # Stage 2: Conv2d(64,128,(3,1),stride=(2,1)) as block-diag row selection +
    # sum of per-tap matmuls (no concatenated im2col).
    a2 = None
    g2 = None
    for kh in range(3):
        col = jnp.dot(s2_ref[kh], h1, preferred_element_type=F32).astype(BF16)
        da = jnp.dot(col, w2a_ref[kh], preferred_element_type=F32)
        dg = jnp.dot(col, w2g_ref[kh], preferred_element_type=F32)
        a2 = da if a2 is None else a2 + da
        g2 = dg if g2 is None else g2 + dg
    h2 = _glu(a2, b2a_ref[...], g2, b2g_ref[...]).astype(BF16)      # (TB*9, 128)

    # Stage 3: Conv2d(128,256,(3,1),stride=(2,1)), same scheme.
    a3 = None
    g3 = None
    for kh in range(3):
        col = jnp.dot(s3_ref[kh], h2, preferred_element_type=F32).astype(BF16)
        da = jnp.dot(col, w3a_ref[kh], preferred_element_type=F32)
        dg = jnp.dot(col, w3g_ref[kh], preferred_element_type=F32)
        a3 = da if a3 is None else a3 + da
        g3 = dg if g3 is None else g3 + dg
    h3 = _glu(a3, b3a_ref[...], g3, b3g_ref[...]).astype(BF16)      # (TB*4, 256)

    # Fc1: gather the 4 height rows per sample (lane-aligned 256-wide chunks) and
    # run a single (TB, 1024) x (1024, 512) matmul against the h-major fc weight.
    fc_in = jnp.concatenate(
        [jnp.dot(sfc_ref[h], h3, preferred_element_type=F32).astype(BF16)
         for h in range(4)], axis=-1)                               # (TB, 1024)
    fc = jnp.dot(fc_in, wfc_ref[...], preferred_element_type=F32) + bfc_ref[...]
    fc = jnp.where(fc > 0, fc, LEAK * fc).astype(BF16)              # LeakyReLU(0.1)

    # Fused (and 128-lane padded) mu/log_var head -> one lane-dense store.
    out = jnp.dot(fc, wh_ref[...], preferred_element_type=F32) + bh_ref[...]
    out_ref[0] = out.astype(out_ref.dtype)                          # (TB, 128)


# ------------------------------ glue / wrapper ------------------------------ #
def _fold_bn(w, b, gamma, beta, mean, var):
    # eval-mode BN folded into the preceding (in, out)-layout linear map.
    s = gamma / jnp.sqrt(var + BN_EPS)
    t = beta - mean * s
    return w * s, b * s + t


def encoder_forward(x, p, z_dim=Z_DIM, tile_b=None):
    B = x.shape[0]
    assert x.shape[1:] == (FRAMES, NFILT)

    if tile_b is None:
        # >= 2 grid steps when possible so both v7x TensorCores get work, while
        # keeping the per-step matmul M dimension reasonably tall.
        tile_b = min(16, max(1, B // 2))
    grid_b = pl.cdiv(B, tile_b)
    b_pad = grid_b * tile_b

    # --- parameter prep (glue): conv weights -> matmul form, BN folded, bf16 ----
    def conv1_mat(w, b, bn):
        wm = w.reshape(64, NFILT).T                                 # (80, 64)
        wf, bf = _fold_bn(wm, b, *bn)
        return wf.astype(BF16), bf.reshape(1, -1).astype(F32)

    def conv_h_mat(w, b, bn):
        # torch weight (cout, cin, 3, 1) -> per-tap stacked (3, cin, cout)
        wm = jnp.transpose(w[:, :, :, 0], (2, 1, 0))
        wf, bf = _fold_bn(wm, b, *bn)
        return wf.astype(BF16), bf.reshape(1, -1).astype(F32)

    w1a, b1a = conv1_mat(p['w1'], p['b1'], p['bn1'])
    w1g, b1g = conv1_mat(p['w1g'], p['b1g'], p['bn1g'])
    w2a, b2a = conv_h_mat(p['w2'], p['b2'], p['bn2'])
    w2g, b2g = conv_h_mat(p['w2g'], p['b2g'], p['bn2g'])
    w3a, b3a = conv_h_mat(p['w3'], p['b3'], p['bn3'])
    w3g, b3g = conv_h_mat(p['w3g'], p['b3g'], p['bn3g'])

    wfc, bfc = _fold_bn(p['wfc'].T, p['bfc'], *p['bnfc'])           # (1024, 512)
    # PyTorch flatten of (B,256,4,1) gives k = c*4 + h; kernel builds h-major rows.
    wfc_hm = (wfc.reshape(256, 4, 512).transpose(1, 0, 2)
              .reshape(1024, 512).astype(BF16))
    bfc = bfc.reshape(1, -1).astype(F32)

    # Fused mu/log_var head, zero-padded to a lane-dense 128-wide output.
    head_n = ((2 * z_dim + 127) // 128) * 128
    wh = jnp.concatenate([p['wmu'].T, p['wlv'].T], axis=1)          # (512, 2z)
    wh = jnp.pad(wh, ((0, 0), (0, head_n - 2 * z_dim))).astype(BF16)
    bh = jnp.concatenate([p['bmu'], p['blv']])
    bh = jnp.pad(bh, (0, head_n - 2 * z_dim)).reshape(1, -1).astype(F32)

    # Block-diagonal 0/1 selection matrices implementing the stride-2 height
    # windows (per tap) and the per-sample height gather for Fc1, on the MXU.
    def block_sel(tb, n_out, n_in, stride, taps):
        r = np.arange(tb * n_out)
        base = (r // n_out) * n_in + stride * (r % n_out)
        c = np.arange(tb * n_in)
        m = np.stack([(c[None, :] == (base + t)[:, None]) for t in range(taps)])
        return jnp.asarray(m, BF16)

    s2 = block_sel(tile_b, 9, FRAMES, 2, 3)                         # (3, TB*9, TB*19)
    s3 = block_sel(tile_b, 4, 9, 2, 3)                              # (3, TB*4, TB*9)
    bb = np.arange(tile_b)
    cc = np.arange(tile_b * 4)
    sfc = jnp.asarray(
        np.stack([(cc[None, :] == (4 * bb[:, None] + h)) for h in range(4)]),
        BF16)                                                       # (4, TB, TB*4)

    # --- input prep: bf16 cast, pad batch, fold batch tile into the row dim ----
    xb = x.astype(BF16)
    if b_pad != B:
        xb = jnp.pad(xb, ((0, b_pad - B), (0, 0), (0, 0)))
    x_tiles = xb.reshape(grid_b, tile_b * FRAMES, NFILT)

    inputs = (x_tiles, s2, s3, sfc,
              w1a, b1a, w1g, b1g,
              w2a, b2a, w2g, b2g,
              w3a, b3a, w3g, b3g,
              wfc_hm, bfc, wh, bh)

    def const_spec(a):
        n = a.ndim
        return pl.BlockSpec(a.shape, lambda i, n=n: (0,) * n)

    in_specs = [pl.BlockSpec((1, tile_b * FRAMES, NFILT), lambda i: (i, 0, 0))] + \
               [const_spec(a) for a in inputs[1:]]

    out_specs = pl.BlockSpec((1, tile_b, head_n), lambda i: (i, 0, 0))
    out_shape = jax.ShapeDtypeStruct((grid_b, tile_b, head_n), F32)

    out = pl.pallas_call(
        encoder_kernel,
        grid=(grid_b,),
        in_specs=in_specs,
        out_specs=out_specs,
        out_shape=out_shape,
        compiler_params=pltpu.CompilerParams(
            dimension_semantics=("parallel",)),
    )(*inputs)

    out = out.reshape(b_pad, head_n)[:B]
    return out[:, :z_dim], out[:, z_dim:2 * z_dim]


# ------------------------- deterministic parameter init --------------------- #
def init_params(key, z_dim=Z_DIM):
    ks = iter(jax.random.split(key, 64))

    def nrm(shape, scale=0.05):
        return scale * jax.random.normal(next(ks), shape, jnp.float32)

    def bn(c):
        return (1.0 + 0.1 * jax.random.normal(next(ks), (c,), jnp.float32),   # gamma
                0.1 * jax.random.normal(next(ks), (c,), jnp.float32),         # beta
                0.1 * jax.random.normal(next(ks), (c,), jnp.float32),         # running_mean
                1.0 + 0.1 * jax.random.uniform(next(ks), (c,), jnp.float32))  # running_var

    return dict(
        w1=nrm((64, 1, 1, NFILT)), b1=nrm((64,)), bn1=bn(64),
        w1g=nrm((64, 1, 1, NFILT)), b1g=nrm((64,)), bn1g=bn(64),
        w2=nrm((128, 64, 3, 1)), b2=nrm((128,)), bn2=bn(128),
        w2g=nrm((128, 64, 3, 1)), b2g=nrm((128,)), bn2g=bn(128),
        w3=nrm((256, 128, 3, 1)), b3=nrm((256,)), bn3=bn(256),
        w3g=nrm((256, 128, 3, 1)), b3g=nrm((256,)), bn3g=bn(256),
        wfc=nrm((512, 1024)), bfc=nrm((512,)), bnfc=bn(512),
        wmu=nrm((z_dim, 512)), bmu=nrm((z_dim,)),
        wlv=nrm((z_dim, 512)), blv=nrm((z_dim,)),
    )


# ----------------------- pure-JAX reference (torch semantics) --------------- #
def encoder_ref(x, p):
    def bn_apply(v, bn, axis=1):
        gamma, beta, mean, var = bn
        shp = [1] * v.ndim
        shp[axis] = -1
        return ((v - mean.reshape(shp)) / jnp.sqrt(var.reshape(shp) + BN_EPS)
                * gamma.reshape(shp) + beta.reshape(shp))

    def conv1(v, w, b, bn):
        o = jnp.einsum('bhf,cf->bch', v, w[:, 0, 0, :]) + b[None, :, None]
        return bn_apply(o, bn)

    def conv_h(v, w, b, bn, hout):
        win = jnp.stack([v[:, :, kh:kh + 2 * (hout - 1) + 1:2] for kh in range(3)],
                        axis=-1)                                    # (B,C,hout,3)
        o = jnp.einsum('bchk,ock->boh', win, w[:, :, :, 0]) + b[None, :, None]
        return bn_apply(o, bn)

    sig = jax.nn.sigmoid
    out = conv1(x, p['w1'], p['b1'], p['bn1']) * sig(conv1(x, p['w1g'], p['b1g'], p['bn1g']))
    out = (conv_h(out, p['w2'], p['b2'], p['bn2'], 9)
           * sig(conv_h(out, p['w2g'], p['b2g'], p['bn2g'], 9)))
    out = (conv_h(out, p['w3'], p['b3'], p['bn3'], 4)
           * sig(conv_h(out, p['w3g'], p['b3g'], p['bn3g'], 4)))     # (B,256,4)
    flat = out.reshape(out.shape[0], 1024)                           # k = c*4 + h
    fc = flat @ p['wfc'].T + p['bfc']
    fc = bn_apply(fc, p['bnfc'], axis=1)
    fc = jnp.where(fc > 0, fc, LEAK * fc)
    return fc @ p['wmu'].T + p['bmu'], fc @ p['wlv'].T + p['blv']


if __name__ == "__main__":
    key = jax.random.PRNGKey(0)
    kx, kp = jax.random.split(key)
    B = 8
    x = jax.random.normal(kx, (B, FRAMES, NFILT), jnp.float32)
    params = init_params(kp)

    mu, log_var = jax.block_until_ready(encoder_forward(x, params))
    mu_ref, lv_ref = encoder_ref(x, params)

    assert mu.shape == (B, Z_DIM) and log_var.shape == (B, Z_DIM)
    # bf16 weights/activations in the kernel -> bf16-level tolerance vs f32 ref.
    np.testing.assert_allclose(np.asarray(mu), np.asarray(mu_ref), atol=3e-2, rtol=3e-2)
    np.testing.assert_allclose(np.asarray(log_var), np.asarray(lv_ref), atol=3e-2, rtol=3e-2)
    print("KERNEL_OK")
</pallas_src>

<mosaic_0001>
module attributes {stable_mosaic.version = 11 : i64} {
  func.func @encoder_kernel(%arg0: i32, %arg1: memref<1x76x80xbf16, #tpu.memory_space<vmem>>, %arg2: memref<3x36x76xbf16, #tpu.memory_space<vmem>>, %arg3: memref<3x16x36xbf16, #tpu.memory_space<vmem>>, %arg4: memref<4x4x16xbf16, #tpu.memory_space<vmem>>, %arg5: memref<80x64xbf16, #tpu.memory_space<vmem>>, %arg6: memref<1x64xf32, #tpu.memory_space<vmem>>, %arg7: memref<80x64xbf16, #tpu.memory_space<vmem>>, %arg8: memref<1x64xf32, #tpu.memory_space<vmem>>, %arg9: memref<3x64x128xbf16, #tpu.memory_space<vmem>>, %arg10: memref<1x128xf32, #tpu.memory_space<vmem>>, %arg11: memref<3x64x128xbf16, #tpu.memory_space<vmem>>, %arg12: memref<1x128xf32, #tpu.memory_space<vmem>>, %arg13: memref<3x128x256xbf16, #tpu.memory_space<vmem>>, %arg14: memref<1x256xf32, #tpu.memory_space<vmem>>, %arg15: memref<3x128x256xbf16, #tpu.memory_space<vmem>>, %arg16: memref<1x256xf32, #tpu.memory_space<vmem>>, %arg17: memref<1024x512xbf16, #tpu.memory_space<vmem>>, %arg18: memref<1x512xf32, #tpu.memory_space<vmem>>, %arg19: memref<512x128xbf16, #tpu.memory_space<vmem>>, %arg20: memref<1x128xf32, #tpu.memory_space<vmem>>, %arg21: memref<1x4x128xf32, #tpu.memory_space<vmem>>) attributes {dimension_semantics = [#tpu.dimension_semantics<parallel>], iteration_bounds = array<i64: 2>, scalar_prefetch = 0 : i64, scratch_operands = 0 : i64, tpu.core_type = #tpu.core_type<tc>, window_params = [{transform_indices = @transform_0, window_bounds = array<i64: 1, 76, 80>}, {pipeline_mode = #tpu.pipeline_mode<synchronous>, transform_indices = @transform_1, window_bounds = array<i64: 3, 36, 76>}, {pipeline_mode = #tpu.pipeline_mode<synchronous>, transform_indices = @transform_2, window_bounds = array<i64: 3, 16, 36>}, {pipeline_mode = #tpu.pipeline_mode<synchronous>, transform_indices = @transform_3, window_bounds = array<i64: 4, 4, 16>}, {pipeline_mode = #tpu.pipeline_mode<synchronous>, transform_indices = @transform_4, window_bounds = array<i64: 80, 64>}, {pipeline_mode = #tpu.pipeline_mode<synchronous>, transform_indices = @transform_5, window_bounds = array<i64: 1, 64>}, {pipeline_mode = #tpu.pipeline_mode<synchronous>, transform_indices = @transform_6, window_bounds = array<i64: 80, 64>}, {pipeline_mode = #tpu.pipeline_mode<synchronous>, transform_indices = @transform_7, window_bounds = array<i64: 1, 64>}, {pipeline_mode = #tpu.pipeline_mode<synchronous>, transform_indices = @transform_8, window_bounds = array<i64: 3, 64, 128>}, {pipeline_mode = #tpu.pipeline_mode<synchronous>, transform_indices = @transform_9, window_bounds = array<i64: 1, 128>}, {pipeline_mode = #tpu.pipeline_mode<synchronous>, transform_indices = @transform_10, window_bounds = array<i64: 3, 64, 128>}, {pipeline_mode = #tpu.pipeline_mode<synchronous>, transform_indices = @transform_11, window_bounds = array<i64: 1, 128>}, {pipeline_mode = #tpu.pipeline_mode<synchronous>, transform_indices = @transform_12, window_bounds = array<i64: 3, 128, 256>}, {pipeline_mode = #tpu.pipeline_mode<synchronous>, transform_indices = @transform_13, window_bounds = array<i64: 1, 256>}, {pipeline_mode = #tpu.pipeline_mode<synchronous>, transform_indices = @transform_14, window_bounds = array<i64: 3, 128, 256>}, {pipeline_mode = #tpu.pipeline_mode<synchronous>, transform_indices = @transform_15, window_bounds = array<i64: 1, 256>}, {pipeline_mode = #tpu.pipeline_mode<synchronous>, transform_indices = @transform_16, window_bounds = array<i64: 1024, 512>}, {pipeline_mode = #tpu.pipeline_mode<synchronous>, transform_indices = @transform_17, window_bounds = array<i64: 1, 512>}, {pipeline_mode = #tpu.pipeline_mode<synchronous>, transform_indices = @transform_18, window_bounds = array<i64: 512, 128>}, {pipeline_mode = #tpu.pipeline_mode<synchronous>, transform_indices = @transform_19, window_bounds = array<i64: 1, 128>}, {transform_indices = @transform_20, window_bounds = array<i64: 1, 4, 128>}]} {
    %c0 = arith.constant 0 : index
    %c0_0 = arith.constant 0 : index
    %c0_1 = arith.constant 0 : index
    %0 = vector.load %arg1[%c0, %c0_0, %c0_1] : memref<1x76x80xbf16, #tpu.memory_space<vmem>>, vector<1x76x80xbf16>
    %1 = vector.shape_cast %0 : vector<1x76x80xbf16> to vector<76x80xbf16>
    %c0_2 = arith.constant 0 : index
    %c0_3 = arith.constant 0 : index
    %2 = vector.load %arg5[%c0_2, %c0_3] : memref<80x64xbf16, #tpu.memory_space<vmem>>, vector<80x64xbf16>
    %cst = arith.constant dense<0.000000e+00> : vector<76x64xf32>
    %3 = tpu.matmul %1, %2, %cst {dimension_numbers = #tpu.dot_dimension_numbers<[1], [0], [0], [1], [0, 0, 1, 1], [], []>} : vector<76x80xbf16>, vector<80x64xbf16>, vector<76x64xf32> -> vector<76x64xf32>
    %c0_4 = arith.constant 0 : index
    %c0_5 = arith.constant 0 : index
    %4 = vector.load %arg7[%c0_4, %c0_5] : memref<80x64xbf16, #tpu.memory_space<vmem>>, vector<80x64xbf16>
    %cst_6 = arith.constant dense<0.000000e+00> : vector<76x64xf32>
    %5 = tpu.matmul %1, %4, %cst_6 {dimension_numbers = #tpu.dot_dimension_numbers<[1], [0], [0], [1], [0, 0, 1, 1], [], []>} : vector<76x80xbf16>, vector<80x64xbf16>, vector<76x64xf32> -> vector<76x64xf32>
    %c0_7 = arith.constant 0 : index
    %c0_8 = arith.constant 0 : index
    %6 = vector.load %arg6[%c0_7, %c0_8] : memref<1x64xf32, #tpu.memory_space<vmem>>, vector<1x64xf32>
    %c0_9 = arith.constant 0 : index
    %c0_10 = arith.constant 0 : index
    %7 = vector.load %arg8[%c0_9, %c0_10] : memref<1x64xf32, #tpu.memory_space<vmem>>, vector<1x64xf32>
    %8 = vector.broadcast %6 : vector<1x64xf32> to vector<76x64xf32>
    %9 = arith.addf %3, %8 : vector<76x64xf32>
    %10 = vector.broadcast %7 : vector<1x64xf32> to vector<76x64xf32>
    %11 = arith.addf %5, %10 : vector<76x64xf32>
    %12 = arith.negf %11 : vector<76x64xf32>
    %13 = math.exp %12 : vector<76x64xf32>
    %cst_11 = arith.constant 1.000000e+00 : f32
    %14 = vector.broadcast %cst_11 : f32 to vector<76x64xf32>
    %15 = arith.addf %14, %13 : vector<76x64xf32>
    %16 = arith.divf %14, %15 : vector<76x64xf32>
    %17 = arith.mulf %9, %16 : vector<76x64xf32>
    %18 = arith.truncf %17 : vector<76x64xf32> to vector<76x64xbf16>
    %c0_12 = arith.constant 0 : index
    %c0_13 = arith.constant 0 : index
    %c0_14 = arith.constant 0 : index
    %19 = vector.load %arg2[%c0_12, %c0_13, %c0_14] : memref<3x36x76xbf16, #tpu.memory_space<vmem>>, vector<1x36x76xbf16>
    %20 = vector.shape_cast %19 : vector<1x36x76xbf16> to vector<36x76xbf16>
    %cst_15 = arith.constant dense<0.000000e+00> : vector<36x64xf32>
    %21 = tpu.matmul %20, %18, %cst_15 {dimension_numbers = #tpu.dot_dimension_numbers<[1], [0], [0], [1], [0, 0, 1, 1], [], []>} : vector<36x76xbf16>, vector<76x64xbf16>, vector<36x64xf32> -> vector<36x64xf32>
    %22 = arith.truncf %21 : vector<36x64xf32> to vector<36x64xbf16>
    %c0_16 = arith.constant 0 : index
    %c0_17 = arith.constant 0 : index
    %c0_18 = arith.constant 0 : index
    %23 = vector.load %arg9[%c0_16, %c0_17, %c0_18] : memref<3x64x128xbf16, #tpu.memory_space<vmem>>, vector<1x64x128xbf16>
    %24 = vector.shape_cast %23 : vector<1x64x128xbf16> to vector<64x128xbf16>
    %cst_19 = arith.constant dense<0.000000e+00> : vector<36x128xf32>
    %25 = tpu.matmul %22, %24, %cst_19 {dimension_numbers = #tpu.dot_dimension_numbers<[1], [0], [0], [1], [0, 0, 1, 1], [], []>} : vector<36x64xbf16>, vector<64x128xbf16>, vector<36x128xf32> -> vector<36x128xf32>
    %c0_20 = arith.constant 0 : index
    %c0_21 = arith.constant 0 : index
    %c0_22 = arith.constant 0 : index
    %26 = vector.load %arg11[%c0_20, %c0_21, %c0_22] : memref<3x64x128xbf16, #tpu.memory_space<vmem>>, vector<1x64x128xbf16>
    %27 = vector.shape_cast %26 : vector<1x64x128xbf16> to vector<64x128xbf16>
    %cst_23 = arith.constant dense<0.000000e+00> : vector<36x128xf32>
    %28 = tpu.matmul %22, %27, %cst_23 {dimension_numbers = #tpu.dot_dimension_numbers<[1], [0], [0], [1], [0, 0, 1, 1], [], []>} : vector<36x64xbf16>, vector<64x128xbf16>, vector<36x128xf32> -> vector<36x128xf32>
    %c1 = arith.constant 1 : index
    %c0_24 = arith.constant 0 : index
    %c0_25 = arith.constant 0 : index
    %29 = vector.load %arg2[%c1, %c0_24, %c0_25] : memref<3x36x76xbf16, #tpu.memory_space<vmem>>, vector<1x36x76xbf16>
    %30 = vector.shape_cast %29 : vector<1x36x76xbf16> to vector<36x76xbf16>
    %cst_26 = arith.constant dense<0.000000e+00> : vector<36x64xf32>
    %31 = tpu.matmul %30, %18, %cst_26 {dimension_numbers = #tpu.dot_dimension_numbers<[1], [0], [0], [1], [0, 0, 1, 1], [], []>} : vector<36x76xbf16>, vector<76x64xbf16>, vector<36x64xf32> -> vector<36x64xf32>
    %32 = arith.truncf %31 : vector<36x64xf32> to vector<36x64xbf16>
    %c1_27 = arith.constant 1 : index
    %c0_28 = arith.constant 0 : index
    %c0_29 = arith.constant 0 : index
    %33 = vector.load %arg9[%c1_27, %c0_28, %c0_29] : memref<3x64x128xbf16, #tpu.memory_space<vmem>>, vector<1x64x128xbf16>
    %34 = vector.shape_cast %33 : vector<1x64x128xbf16> to vector<64x128xbf16>
    %cst_30 = arith.constant dense<0.000000e+00> : vector<36x128xf32>
    %35 = tpu.matmul %32, %34, %cst_30 {dimension_numbers = #tpu.dot_dimension_numbers<[1], [0], [0], [1], [0, 0, 1, 1], [], []>} : vector<36x64xbf16>, vector<64x128xbf16>, vector<36x128xf32> -> vector<36x128xf32>
    %c1_31 = arith.constant 1 : index
    %c0_32 = arith.constant 0 : index
    %c0_33 = arith.constant 0 : index
    %36 = vector.load %arg11[%c1_31, %c0_32, %c0_33] : memref<3x64x128xbf16, #tpu.memory_space<vmem>>, vector<1x64x128xbf16>
    %37 = vector.shape_cast %36 : vector<1x64x128xbf16> to vector<64x128xbf16>
    %cst_34 = arith.constant dense<0.000000e+00> : vector<36x128xf32>
    %38 = tpu.matmul %32, %37, %cst_34 {dimension_numbers = #tpu.dot_dimension_numbers<[1], [0], [0], [1], [0, 0, 1, 1], [], []>} : vector<36x64xbf16>, vector<64x128xbf16>, vector<36x128xf32> -> vector<36x128xf32>
    %39 = arith.addf %25, %35 : vector<36x128xf32>
    %40 = arith.addf %28, %38 : vector<36x128xf32>
    %c2 = arith.constant 2 : index
    %c0_35 = arith.constant 0 : index
    %c0_36 = arith.constant 0 : index
    %41 = vector.load %arg2[%c2, %c0_35, %c0_36] : memref<3x36x76xbf16, #tpu.memory_space<vmem>>, vector<1x36x76xbf16>
    %42 = vector.shape_cast %41 : vector<1x36x76xbf16> to vector<36x76xbf16>
    %cst_37 = arith.constant dense<0.000000e+00> : vector<36x64xf32>
    %43 = tpu.matmul %42, %18, %cst_37 {dimension_numbers = #tpu.dot_dimension_numbers<[1], [0], [0], [1], [0, 0, 1, 1], [], []>} : vector<36x76xbf16>, vector<76x64xbf16>, vector<36x64xf32> -> vector<36x64xf32>
    %44 = arith.truncf %43 : vector<36x64xf32> to vector<36x64xbf16>
    %c2_38 = arith.constant 2 : index
    %c0_39 = arith.constant 0 : index
    %c0_40 = arith.constant 0 : index
    %45 = vector.load %arg9[%c2_38, %c0_39, %c0_40] : memref<3x64x128xbf16, #tpu.memory_space<vmem>>, vector<1x64x128xbf16>
    %46 = vector.shape_cast %45 : vector<1x64x128xbf16> to vector<64x128xbf16>
    %cst_41 = arith.constant dense<0.000000e+00> : vector<36x128xf32>
    %47 = tpu.matmul %44, %46, %cst_41 {dimension_numbers = #tpu.dot_dimension_numbers<[1], [0], [0], [1], [0, 0, 1, 1], [], []>} : vector<36x64xbf16>, vector<64x128xbf16>, vector<36x128xf32> -> vector<36x128xf32>
    %c2_42 = arith.constant 2 : index
    %c0_43 = arith.constant 0 : index
    %c0_44 = arith.constant 0 : index
    %48 = vector.load %arg11[%c2_42, %c0_43, %c0_44] : memref<3x64x128xbf16, #tpu.memory_space<vmem>>, vector<1x64x128xbf16>
    %49 = vector.shape_cast %48 : vector<1x64x128xbf16> to vector<64x128xbf16>
    %cst_45 = arith.constant dense<0.000000e+00> : vector<36x128xf32>
    %50 = tpu.matmul %44, %49, %cst_45 {dimension_numbers = #tpu.dot_dimension_numbers<[1], [0], [0], [1], [0, 0, 1, 1], [], []>} : vector<36x64xbf16>, vector<64x128xbf16>, vector<36x128xf32> -> vector<36x128xf32>
    %51 = arith.addf %39, %47 : vector<36x128xf32>
    %52 = arith.addf %40, %50 : vector<36x128xf32>
    %c0_46 = arith.constant 0 : index
    %c0_47 = arith.constant 0 : index
    %53 = vector.load %arg10[%c0_46, %c0_47] : memref<1x128xf32, #tpu.memory_space<vmem>>, vector<1x128xf32>
    %c0_48 = arith.constant 0 : index
    %c0_49 = arith.constant 0 : index
    %54 = vector.load %arg12[%c0_48, %c0_49] : memref<1x128xf32, #tpu.memory_space<vmem>>, vector<1x128xf32>
    %55 = vector.broadcast %53 : vector<1x128xf32> to vector<36x128xf32>
    %56 = arith.addf %51, %55 : vector<36x128xf32>
    %57 = vector.broadcast %54 : vector<1x128xf32> to vector<36x128xf32>
    %58 = arith.addf %52, %57 : vector<36x128xf32>
    %59 = arith.negf %58 : vector<36x128xf32>
    %60 = math.exp %59 : vector<36x128xf32>
    %cst_50 = arith.constant 1.000000e+00 : f32
    %61 = vector.broadcast %cst_50 : f32 to vector<36x128xf32>
    %62 = arith.addf %61, %60 : vector<36x128xf32>
    %63 = arith.divf %61, %62 : vector<36x128xf32>
    %64 = arith.mulf %56, %63 : vector<36x128xf32>
    %65 = arith.truncf %64 : vector<36x128xf32> to vector<36x128xbf16>
    %c0_51 = arith.constant 0 : index
    %c0_52 = arith.constant 0 : index
    %c0_53 = arith.constant 0 : index
    %66 = vector.load %arg3[%c0_51, %c0_52, %c0_53] : memref<3x16x36xbf16, #tpu.memory_space<vmem>>, vector<1x16x36xbf16>
    %67 = vector.shape_cast %66 : vector<1x16x36xbf16> to vector<16x36xbf16>
    %cst_54 = arith.constant dense<0.000000e+00> : vector<16x128xf32>
    %68 = tpu.matmul %67, %65, %cst_54 {dimension_numbers = #tpu.dot_dimension_numbers<[1], [0], [0], [1], [0, 0, 1, 1], [], []>} : vector<16x36xbf16>, vector<36x128xbf16>, vector<16x128xf32> -> vector<16x128xf32>
    %69 = arith.truncf %68 : vector<16x128xf32> to vector<16x128xbf16>
    %c0_55 = arith.constant 0 : index
    %c0_56 = arith.constant 0 : index
    %c0_57 = arith.constant 0 : index
    %70 = vector.load %arg13[%c0_55, %c0_56, %c0_57] : memref<3x128x256xbf16, #tpu.memory_space<vmem>>, vector<1x128x256xbf16>
    %71 = vector.shape_cast %70 : vector<1x128x256xbf16> to vector<128x256xbf16>
    %cst_58 = arith.constant dense<0.000000e+00> : vector<16x256xf32>
    %72 = tpu.matmul %69, %71, %cst_58 {dimension_numbers = #tpu.dot_dimension_numbers<[1], [0], [0], [1], [0, 0, 1, 1], [], []>} : vector<16x128xbf16>, vector<128x256xbf16>, vector<16x256xf32> -> vector<16x256xf32>
    %c0_59 = arith.constant 0 : index
    %c0_60 = arith.constant 0 : index
    %c0_61 = arith.constant 0 : index
    %73 = vector.load %arg15[%c0_59, %c0_60, %c0_61] : memref<3x128x256xbf16, #tpu.memory_space<vmem>>, vector<1x128x256xbf16>
    %74 = vector.shape_cast %73 : vector<1x128x256xbf16> to vector<128x256xbf16>
    %cst_62 = arith.constant dense<0.000000e+00> : vector<16x256xf32>
    %75 = tpu.matmul %69, %74, %cst_62 {dimension_numbers = #tpu.dot_dimension_numbers<[1], [0], [0], [1], [0, 0, 1, 1], [], []>} : vector<16x128xbf16>, vector<128x256xbf16>, vector<16x256xf32> -> vector<16x256xf32>
    %c1_63 = arith.constant 1 : index
    %c0_64 = arith.constant 0 : index
    %c0_65 = arith.constant 0 : index
    %76 = vector.load %arg3[%c1_63, %c0_64, %c0_65] : memref<3x16x36xbf16, #tpu.memory_space<vmem>>, vector<1x16x36xbf16>
    %77 = vector.shape_cast %76 : vector<1x16x36xbf16> to vector<16x36xbf16>
    %cst_66 = arith.constant dense<0.000000e+00> : vector<16x128xf32>
    %78 = tpu.matmul %77, %65, %cst_66 {dimension_numbers = #tpu.dot_dimension_numbers<[1], [0], [0], [1], [0, 0, 1, 1], [], []>} : vector<16x36xbf16>, vector<36x128xbf16>, vector<16x128xf32> -> vector<16x128xf32>
    %79 = arith.truncf %78 : vector<16x128xf32> to vector<16x128xbf16>
    %c1_67 = arith.constant 1 : index
    %c0_68 = arith.constant 0 : index
    %c0_69 = arith.constant 0 : index
    %80 = vector.load %arg13[%c1_67, %c0_68, %c0_69] : memref<3x128x256xbf16, #tpu.memory_space<vmem>>, vector<1x128x256xbf16>
    %81 = vector.shape_cast %80 : vector<1x128x256xbf16> to vector<128x256xbf16>
    %cst_70 = arith.constant dense<0.000000e+00> : vector<16x256xf32>
    %82 = tpu.matmul %79, %81, %cst_70 {dimension_numbers = #tpu.dot_dimension_numbers<[1], [0], [0], [1], [0, 0, 1, 1], [], []>} : vector<16x128xbf16>, vector<128x256xbf16>, vector<16x256xf32> -> vector<16x256xf32>
    %c1_71 = arith.constant 1 : index
    %c0_72 = arith.constant 0 : index
    %c0_73 = arith.constant 0 : index
    %83 = vector.load %arg15[%c1_71, %c0_72, %c0_73] : memref<3x128x256xbf16, #tpu.memory_space<vmem>>, vector<1x128x256xbf16>
    %84 = vector.shape_cast %83 : vector<1x128x256xbf16> to vector<128x256xbf16>
    %cst_74 = arith.constant dense<0.000000e+00> : vector<16x256xf32>
    %85 = tpu.matmul %79, %84, %cst_74 {dimension_numbers = #tpu.dot_dimension_numbers<[1], [0], [0], [1], [0, 0, 1, 1], [], []>} : vector<16x128xbf16>, vector<128x256xbf16>, vector<16x256xf32> -> vector<16x256xf32>
    %86 = arith.addf %72, %82 : vector<16x256xf32>
    %87 = arith.addf %75, %85 : vector<16x256xf32>
    %c2_75 = arith.constant 2 : index
    %c0_76 = arith.constant 0 : index
    %c0_77 = arith.constant 0 : index
    %88 = vector.load %arg3[%c2_75, %c0_76, %c0_77] : memref<3x16x36xbf16, #tpu.memory_space<vmem>>, vector<1x16x36xbf16>
    %89 = vector.shape_cast %88 : vector<1x16x36xbf16> to vector<16x36xbf16>
    %cst_78 = arith.constant dense<0.000000e+00> : vector<16x128xf32>
    %90 = tpu.matmul %89, %65, %cst_78 {dimension_numbers = #tpu.dot_dimension_numbers<[1], [0], [0], [1], [0, 0, 1, 1], [], []>} : vector<16x36xbf16>, vector<36x128xbf16>, vector<16x128xf32> -> vector<16x128xf32>
    %91 = arith.truncf %90 : vector<16x128xf32> to vector<16x128xbf16>
    %c2_79 = arith.constant 2 : index
    %c0_80 = arith.constant 0 : index
    %c0_81 = arith.constant 0 : index
    %92 = vector.load %arg13[%c2_79, %c0_80, %c0_81] : memref<3x128x256xbf16, #tpu.memory_space<vmem>>, vector<1x128x256xbf16>
    %93 = vector.shape_cast %92 : vector<1x128x256xbf16> to vector<128x256xbf16>
    %cst_82 = arith.constant dense<0.000000e+00> : vector<16x256xf32>
    %94 = tpu.matmul %91, %93, %cst_82 {dimension_numbers = #tpu.dot_dimension_numbers<[1], [0], [0], [1], [0, 0, 1, 1], [], []>} : vector<16x128xbf16>, vector<128x256xbf16>, vector<16x256xf32> -> vector<16x256xf32>
    %c2_83 = arith.constant 2 : index
    %c0_84 = arith.constant 0 : index
    %c0_85 = arith.constant 0 : index
    %95 = vector.load %arg15[%c2_83, %c0_84, %c0_85] : memref<3x128x256xbf16, #tpu.memory_space<vmem>>, vector<1x128x256xbf16>
    %96 = vector.shape_cast %95 : vector<1x128x256xbf16> to vector<128x256xbf16>
    %cst_86 = arith.constant dense<0.000000e+00> : vector<16x256xf32>
    %97 = tpu.matmul %91, %96, %cst_86 {dimension_numbers = #tpu.dot_dimension_numbers<[1], [0], [0], [1], [0, 0, 1, 1], [], []>} : vector<16x128xbf16>, vector<128x256xbf16>, vector<16x256xf32> -> vector<16x256xf32>
    %98 = arith.addf %86, %94 : vector<16x256xf32>
    %99 = arith.addf %87, %97 : vector<16x256xf32>
    %c0_87 = arith.constant 0 : index
    %c0_88 = arith.constant 0 : index
    %100 = vector.load %arg14[%c0_87, %c0_88] : memref<1x256xf32, #tpu.memory_space<vmem>>, vector<1x256xf32>
    %c0_89 = arith.constant 0 : index
    %c0_90 = arith.constant 0 : index
    %101 = vector.load %arg16[%c0_89, %c0_90] : memref<1x256xf32, #tpu.memory_space<vmem>>, vector<1x256xf32>
    %102 = vector.broadcast %100 : vector<1x256xf32> to vector<16x256xf32>
    %103 = arith.addf %98, %102 : vector<16x256xf32>
    %104 = vector.broadcast %101 : vector<1x256xf32> to vector<16x256xf32>
    %105 = arith.addf %99, %104 : vector<16x256xf32>
    %106 = arith.negf %105 : vector<16x256xf32>
    %107 = math.exp %106 : vector<16x256xf32>
    %cst_91 = arith.constant 1.000000e+00 : f32
    %108 = vector.broadcast %cst_91 : f32 to vector<16x256xf32>
    %109 = arith.addf %108, %107 : vector<16x256xf32>
    %110 = arith.divf %108, %109 : vector<16x256xf32>
    %111 = arith.mulf %103, %110 : vector<16x256xf32>
    %112 = arith.truncf %111 : vector<16x256xf32> to vector<16x256xbf16>
    %c0_92 = arith.constant 0 : index
    %c0_93 = arith.constant 0 : index
    %c0_94 = arith.constant 0 : index
    %113 = vector.load %arg4[%c0_92, %c0_93, %c0_94] : memref<4x4x16xbf16, #tpu.memory_space<vmem>>, vector<1x4x16xbf16>
    %114 = vector.shape_cast %113 : vector<1x4x16xbf16> to vector<4x16xbf16>
    %cst_95 = arith.constant dense<0.000000e+00> : vector<4x256xf32>
    %115 = tpu.matmul %114, %112, %cst_95 {dimension_numbers = #tpu.dot_dimension_numbers<[1], [0], [0], [1], [0, 0, 1, 1], [], []>} : vector<4x16xbf16>, vector<16x256xbf16>, vector<4x256xf32> -> vector<4x256xf32>
    %116 = arith.truncf %115 : vector<4x256xf32> to vector<4x256xbf16>
    %c1_96 = arith.constant 1 : index
    %c0_97 = arith.constant 0 : index
    %c0_98 = arith.constant 0 : index
    %117 = vector.load %arg4[%c1_96, %c0_97, %c0_98] : memref<4x4x16xbf16, #tpu.memory_space<vmem>>, vector<1x4x16xbf16>
    %118 = vector.shape_cast %117 : vector<1x4x16xbf16> to vector<4x16xbf16>
    %cst_99 = arith.constant dense<0.000000e+00> : vector<4x256xf32>
    %119 = tpu.matmul %118, %112, %cst_99 {dimension_numbers = #tpu.dot_dimension_numbers<[1], [0], [0], [1], [0, 0, 1, 1], [], []>} : vector<4x16xbf16>, vector<16x256xbf16>, vector<4x256xf32> -> vector<4x256xf32>
    %120 = arith.truncf %119 : vector<4x256xf32> to vector<4x256xbf16>
    %c2_100 = arith.constant 2 : index
    %c0_101 = arith.constant 0 : index
    %c0_102 = arith.constant 0 : index
    %121 = vector.load %arg4[%c2_100, %c0_101, %c0_102] : memref<4x4x16xbf16, #tpu.memory_space<vmem>>, vector<1x4x16xbf16>
    %122 = vector.shape_cast %121 : vector<1x4x16xbf16> to vector<4x16xbf16>
    %cst_103 = arith.constant dense<0.000000e+00> : vector<4x256xf32>
    %123 = tpu.matmul %122, %112, %cst_103 {dimension_numbers = #tpu.dot_dimension_numbers<[1], [0], [0], [1], [0, 0, 1, 1], [], []>} : vector<4x16xbf16>, vector<16x256xbf16>, vector<4x256xf32> -> vector<4x256xf32>
    %124 = arith.truncf %123 : vector<4x256xf32> to vector<4x256xbf16>
    %c3 = arith.constant 3 : index
    %c0_104 = arith.constant 0 : index
    %c0_105 = arith.constant 0 : index
    %125 = vector.load %arg4[%c3, %c0_104, %c0_105] : memref<4x4x16xbf16, #tpu.memory_space<vmem>>, vector<1x4x16xbf16>
    %126 = vector.shape_cast %125 : vector<1x4x16xbf16> to vector<4x16xbf16>
    %cst_106 = arith.constant dense<0.000000e+00> : vector<4x256xf32>
    %127 = tpu.matmul %126, %112, %cst_106 {dimension_numbers = #tpu.dot_dimension_numbers<[1], [0], [0], [1], [0, 0, 1, 1], [], []>} : vector<4x16xbf16>, vector<16x256xbf16>, vector<4x256xf32> -> vector<4x256xf32>
    %128 = arith.truncf %127 : vector<4x256xf32> to vector<4x256xbf16>
    %129 = tpu.concatenate %116, %120, %124, %128 in 1 : vector<4x256xbf16>, vector<4x256xbf16>, vector<4x256xbf16>, vector<4x256xbf16> -> vector<4x1024xbf16>
    %c0_107 = arith.constant 0 : index
    %c0_108 = arith.constant 0 : index
    %130 = vector.load %arg17[%c0_107, %c0_108] : memref<1024x512xbf16, #tpu.memory_space<vmem>>, vector<1024x512xbf16>
    %cst_109 = arith.constant dense<0.000000e+00> : vector<4x512xf32>
    %131 = tpu.matmul %129, %130, %cst_109 {dimension_numbers = #tpu.dot_dimension_numbers<[1], [0], [0], [1], [0, 0, 1, 1], [], []>} : vector<4x1024xbf16>, vector<1024x512xbf16>, vector<4x512xf32> -> vector<4x512xf32>
    %c0_110 = arith.constant 0 : index
    %c0_111 = arith.constant 0 : index
    %132 = vector.load %arg18[%c0_110, %c0_111] : memref<1x512xf32, #tpu.memory_space<vmem>>, vector<1x512xf32>
    %133 = vector.broadcast %132 : vector<1x512xf32> to vector<4x512xf32>
    %134 = arith.addf %131, %133 : vector<4x512xf32>
    %cst_112 = arith.constant 0.000000e+00 : f32
    %135 = vector.broadcast %cst_112 : f32 to vector<4x512xf32>
    %136 = arith.cmpf ogt, %134, %135 : vector<4x512xf32>
    %cst_113 = arith.constant 1.000000e-01 : f32
    %137 = vector.broadcast %cst_113 : f32 to vector<4x512xf32>
    %138 = arith.mulf %137, %134 : vector<4x512xf32>
    %139 = arith.select %136, %134, %138 : vector<4x512xi1>, vector<4x512xf32>
    %140 = arith.truncf %139 : vector<4x512xf32> to vector<4x512xbf16>
    %c0_114 = arith.constant 0 : index
    %c0_115 = arith.constant 0 : index
    %141 = vector.load %arg19[%c0_114, %c0_115] : memref<512x128xbf16, #tpu.memory_space<vmem>>, vector<512x128xbf16>
    %cst_116 = arith.constant dense<0.000000e+00> : vector<4x128xf32>
    %142 = tpu.matmul %140, %141, %cst_116 {dimension_numbers = #tpu.dot_dimension_numbers<[1], [0], [0], [1], [0, 0, 1, 1], [], []>} : vector<4x512xbf16>, vector<512x128xbf16>, vector<4x128xf32> -> vector<4x128xf32>
    %c0_117 = arith.constant 0 : index
    %c0_118 = arith.constant 0 : index
    %143 = vector.load %arg20[%c0_117, %c0_118] : memref<1x128xf32, #tpu.memory_space<vmem>>, vector<1x128xf32>
    %144 = vector.broadcast %143 : vector<1x128xf32> to vector<4x128xf32>
    %145 = arith.addf %142, %144 : vector<4x128xf32>
    %c0_119 = arith.constant 0 : index
    %c0_120 = arith.constant 0 : index
    %c0_121 = arith.constant 0 : index
    %146 = vector.load %arg21[%c0_119, %c0_120, %c0_121] : memref<1x4x128xf32, #tpu.memory_space<vmem>>, vector<1x4x128xf32>
    %147 = vector.shape_cast %146 : vector<1x4x128xf32> to vector<4x128xf32>
    %148 = vector.shape_cast %145 : vector<4x128xf32> to vector<1x4x128xf32>
    tpu.vector_store %arg21[%c0_119, %c0_120, %c0_121], %148 {strides = array<i32>} : memref<1x4x128xf32, #tpu.memory_space<vmem>>, vector<1x4x128xf32>,
    return
  }
  func.func @transform_0(%arg0: i32) -> (i32, i32, i32) {
    %c0_i32 = arith.constant 0 : i32
    %c0_i32_0 = arith.constant 0 : i32
    %c0_i32_1 = arith.constant 0 : i32
    return %arg0, %c0_i32, %c0_i32_0 : i32, i32, i32
  }
  func.func @transform_1(%arg0: i32) -> (i32, i32, i32) {
    %c0_i32 = arith.constant 0 : i32
    %c0_i32_0 = arith.constant 0 : i32
    %c0_i32_1 = arith.constant 0 : i32
    %c0_i32_2 = arith.constant 0 : i32
    return %c0_i32, %c0_i32_0, %c0_i32_1 : i32, i32, i32
  }
  func.func @transform_2(%arg0: i32) -> (i32, i32, i32) {
    %c0_i32 = arith.constant 0 : i32
    %c0_i32_0 = arith.constant 0 : i32
    %c0_i32_1 = arith.constant 0 : i32
    %c0_i32_2 = arith.constant 0 : i32
    return %c0_i32, %c0_i32_0, %c0_i32_1 : i32, i32, i32
  }
  func.func @transform_3(%arg0: i32) -> (i32, i32, i32) {
    %c0_i32 = arith.constant 0 : i32
    %c0_i32_0 = arith.constant 0 : i32
    %c0_i32_1 = arith.constant 0 : i32
    %c0_i32_2 = arith.constant 0 : i32
    return %c0_i32, %c0_i32_0, %c0_i32_1 : i32, i32, i32
  }
  func.func @transform_4(%arg0: i32) -> (i32, i32) {
    %c0_i32 = arith.constant 0 : i32
    %c0_i32_0 = arith.constant 0 : i32
    %c0_i32_1 = arith.constant 0 : i32
    return %c0_i32, %c0_i32_0 : i32, i32
  }
  func.func @transform_5(%arg0: i32) -> (i32, i32) {
    %c0_i32 = arith.constant 0 : i32
    %c0_i32_0 = arith.constant 0 : i32
    %c0_i32_1 = arith.constant 0 : i32
    return %c0_i32, %c0_i32_0 : i32, i32
  }
  func.func @transform_6(%arg0: i32) -> (i32, i32) {
    %c0_i32 = arith.constant 0 : i32
    %c0_i32_0 = arith.constant 0 : i32
    %c0_i32_1 = arith.constant 0 : i32
    return %c0_i32, %c0_i32_0 : i32, i32
  }
  func.func @transform_7(%arg0: i32) -> (i32, i32) {
    %c0_i32 = arith.constant 0 : i32
    %c0_i32_0 = arith.constant 0 : i32
    %c0_i32_1 = arith.constant 0 : i32
    return %c0_i32, %c0_i32_0 : i32, i32
  }
  func.func @transform_8(%arg0: i32) -> (i32, i32, i32) {
    %c0_i32 = arith.constant 0 : i32
    %c0_i32_0 = arith.constant 0 : i32
    %c0_i32_1 = arith.constant 0 : i32
    %c0_i32_2 = arith.constant 0 : i32
    return %c0_i32, %c0_i32_0, %c0_i32_1 : i32, i32, i32
  }
  func.func @transform_9(%arg0: i32) -> (i32, i32) {
    %c0_i32 = arith.constant 0 : i32
    %c0_i32_0 = arith.constant 0 : i32
    %c0_i32_1 = arith.constant 0 : i32
    return %c0_i32, %c0_i32_0 : i32, i32
  }
  func.func @transform_10(%arg0: i32) -> (i32, i32, i32) {
    %c0_i32 = arith.constant 0 : i32
    %c0_i32_0 = arith.constant 0 : i32
    %c0_i32_1 = arith.constant 0 : i32
    %c0_i32_2 = arith.constant 0 : i32
    return %c0_i32, %c0_i32_0, %c0_i32_1 : i32, i32, i32
  }
  func.func @transform_11(%arg0: i32) -> (i32, i32) {
    %c0_i32 = arith.constant 0 : i32
    %c0_i32_0 = arith.constant 0 : i32
    %c0_i32_1 = arith.constant 0 : i32
    return %c0_i32, %c0_i32_0 : i32, i32
  }
  func.func @transform_12(%arg0: i32) -> (i32, i32, i32) {
    %c0_i32 = arith.constant 0 : i32
    %c0_i32_0 = arith.constant 0 : i32
    %c0_i32_1 = arith.constant 0 : i32
    %c0_i32_2 = arith.constant 0 : i32
    return %c0_i32, %c0_i32_0, %c0_i32_1 : i32, i32, i32
  }
  func.func @transform_13(%arg0: i32) -> (i32, i32) {
    %c0_i32 = arith.constant 0 : i32
    %c0_i32_0 = arith.constant 0 : i32
    %c0_i32_1 = arith.constant 0 : i32
    return %c0_i32, %c0_i32_0 : i32, i32
  }
  func.func @transform_14(%arg0: i32) -> (i32, i32, i32) {
    %c0_i32 = arith.constant 0 : i32
    %c0_i32_0 = arith.constant 0 : i32
    %c0_i32_1 = arith.constant 0 : i32
    %c0_i32_2 = arith.constant 0 : i32
    return %c0_i32, %c0_i32_0, %c0_i32_1 : i32, i32, i32
  }
  func.func @transform_15(%arg0: i32) -> (i32, i32) {
    %c0_i32 = arith.constant 0 : i32
    %c0_i32_0 = arith.constant 0 : i32
    %c0_i32_1 = arith.constant 0 : i32
    return %c0_i32, %c0_i32_0 : i32, i32
  }
  func.func @transform_16(%arg0: i32) -> (i32, i32) {
    %c0_i32 = arith.constant 0 : i32
    %c0_i32_0 = arith.constant 0 : i32
    %c0_i32_1 = arith.constant 0 : i32
    return %c0_i32, %c0_i32_0 : i32, i32
  }
  func.func @transform_17(%arg0: i32) -> (i32, i32) {
    %c0_i32 = arith.constant 0 : i32
    %c0_i32_0 = arith.constant 0 : i32
    %c0_i32_1 = arith.constant 0 : i32
    return %c0_i32, %c0_i32_0 : i32, i32
  }
  func.func @transform_18(%arg0: i32) -> (i32, i32) {
    %c0_i32 = arith.constant 0 : i32
    %c0_i32_0 = arith.constant 0 : i32
    %c0_i32_1 = arith.constant 0 : i32
    return %c0_i32, %c0_i32_0 : i32, i32
  }
  func.func @transform_19(%arg0: i32) -> (i32, i32) {
    %c0_i32 = arith.constant 0 : i32
    %c0_i32_0 = arith.constant 0 : i32
    %c0_i32_1 = arith.constant 0 : i32
    return %c0_i32, %c0_i32_0 : i32, i32
  }
  func.func @transform_20(%arg0: i32) -> (i32, i32, i32) {
    %c0_i32 = arith.constant 0 : i32
    %c0_i32_0 = arith.constant 0 : i32
    %c0_i32_1 = arith.constant 0 : i32
    return %arg0, %c0_i32, %c0_i32_0 : i32, i32, i32
  }
}

</mosaic_0001>

<bundles_post_ra>
// kernel: tpu_custom_call.1
= control target key start
LH: loop header
LB: loop body
LE: loop exit
PB: predicated region body
PF: predicated region fallthrough
CT: control target
= control target key end

     0   :  { %s8963_s0 = inlined_call_operand.vmem [shape: bf16[2,76,80], index: 0, kind: input, shape index: {}]   ;;  %s8964_s1 = inlined_call_operand.hbm [shape: bf16[3,36,76], index: 1, kind: input, shape index: {}]   ;;  %s8965_s2 = inlined_call_operand.hbm [shape: bf16[3,16,36], index: 2, kind: input, shape index: {}]   ;;  %s8966_s3 = inlined_call_operand.vmem [shape: bf16[4,4,16], index: 3, kind: input, shape index: {}]   ;;  %s8967_s4 = inlined_call_operand.vmem [shape: bf16[80,64], index: 4, kind: input, shape index: {}]   ;;  %s8968_s5 = inlined_call_operand.hbm [shape: f32[1,64], index: 5, kind: input, shape index: {}]   ;;  %s8969_s6 = inlined_call_operand.vmem [shape: bf16[80,64], index: 6, kind: input, shape index: {}]   ;;  %s8970_s7 = inlined_call_operand.hbm [shape: f32[1,64], index: 7, kind: input, shape index: {}]   ;;  %s8971_s8 = inlined_call_operand.vmem [shape: bf16[3,64,128], index: 8, kind: input, shape index: {}]   ;;  %s8972_s9 = inlined_call_operand.hbm [shape: f32[1,128], index: 9, kind: input, shape index: {}]   ;;  %s8973_s10 = inlined_call_operand.hbm [shape: bf16[3,64,128], index: 10, kind: input, shape index: {}]   ;;  %s8974_s11 = inlined_call_operand.hbm [shape: f32[1,128], index: 11, kind: input, shape index: {}]   ;;  %s8975_s12 = inlined_call_operand.hbm [shape: bf16[3,128,256], index: 12, kind: input, shape index: {}]   ;;  %s8976_s13 = inlined_call_operand.vmem [shape: f32[1,256], index: 13, kind: input, shape index: {}]   ;;  %s8977_s14 = inlined_call_operand.hbm [shape: bf16[3,128,256], index: 14, kind: input, shape index: {}]   ;;  %s8978_s15 = inlined_call_operand.vmem [shape: f32[1,256], index: 15, kind: input, shape index: {}]   ;;  %s8979_s16 = inlined_call_operand.hbm [shape: bf16[1024,512], index: 16, kind: input, shape index: {}]   ;;  %s8980_s17 = inlined_call_operand.vmem [shape: f32[1,512], index: 17, kind: input, shape index: {}]   ;;  %s8981_s18 = inlined_call_operand.vmem [shape: bf16[512,128], index: 18, kind: input, shape index: {}]   ;;  %s8982_s19 = inlined_call_operand.vmem [shape: f32[1,128], index: 19, kind: input, shape index: {}]   ;;  %s8983_s20 = inlined_call_operand.hbm [shape: f32[2,4,128], index: 20, kind: output, shape index: {}]  }
   0x1   :  { %9004 = sst [smem:[#allocation35_spill]] %s8963_s0 }
   0x2   :  { %9005 = sst [smem:[#allocation36_spill]] %s8964_s1 }
   0x3   :  { %9006 = sst [smem:[#allocation37_spill]] %s8965_s2 }
   0x4   :  { %9007 = sst [smem:[#allocation38_spill]] %s8966_s3 }
   0x5   :  { %9008 = sst [smem:[#allocation39_spill]] %s8967_s4 }
   0x6   :  { %9009 = sst [smem:[#allocation40_spill]] %s8970_s7 }
   0x7   :  { %9010 = sst [smem:[#allocation41_spill]] %s8973_s10 }
   0x8   :  { %9011 = sst [smem:[#allocation42_spill]] %s8980_s17 }
   0x9   :  { %9012 = sst [smem:[#allocation43_spill]] %s8981_s18 }
   0xa   :  { %9013 = sst [smem:[#allocation44_spill]] %s8982_s19 }
   0xb   :  { %9014 = sst [smem:[#allocation45_spill]] %s8983_s20 }
   0xc   :  { %25 = vsyncpa [#allocation3], 0 }
   0xd   :  { %26 = vsyncpa [#allocation6], 0 }
   0xe   :  { %27 = vsyncpa [#allocation9], 0 }
   0xf   :  { %28 = vsyncpa [#allocation12], 0 }
  0x10   :  { %29 = vsyncpa [#allocation15], 0 }
  0x11   :  { %30 = vsyncpa [#allocation18], 0 }
  0x12   :  { %31 = vsyncpa [#allocation4], 0 }
  0x13   :  { %33 = vsyncpa [#allocation4 + $0x1], 0  ;;  %s8054_s1 = smov 0   ;;  %s8056_s22 = smov 0  }
  0x14   :  { %s8058_s23 = smov 0   ;;  %s8060_s24 = smov 0  }
  0x15 LB: > { %9015 = sst [smem:[#allocation27_spill]] %s7915_s1  ;;  %s8075_s2 = sadd.s32 4294967295, %s7927_s24   ;;  %s7927_s24 = sphi %s8060_s24, %s9064_s24   ;;  %s7923_s23 = sphi %s8058_s23, %s9067_s23   ;;  %s7919_s22 = sphi %s8056_s22, %s9066_s22   ;;  %s7915_s1 = sphi %s8054_s1, %s9065_s1  }
  0x16   : > { %9016 = sst [smem:[#allocation28_spill]] %s7919_s22  ;;  %s5710_s25 = sadd.s32 4294967294, %s7927_s24  }
  0x17   : > { %9017 = sst [smem:[#allocation29_spill]] %s7923_s23  ;;  %s8079_s3 = sadd.s32 1, %s7927_s24  }
  0x18   : > { %9018 = sst [smem:[#allocation30_spill]] %s7927_s24  ;;  %s471_s26 = sadd.s32 1, %s7923_s23 }
  0x19   : > { %9019 = sst [smem:[#allocation31_spill]] %s8079_s3  ;;  %s468_s27 = ssub.s32 %s7927_s24, %s8079_s3 }
  0x1a   : > { %p481_p0 = scmp.ne.s32.totalorder %s7923_s23, %s7919_s22  ;;  %p469_p1 = scmp.eq.s32.totalorder %s468_s27, 0 }
  0x1b   : > { %p482_p2 = scmp.eq.s32.totalorder %s8075_s2, 1  ;;  %p487_p3 = scmp.ne.s32.totalorder %s7919_s22, %s7915_s1 }
  0x1c   : > { %p488_p4 = scmp.eq.s32.totalorder %s5710_s25, 1  ;;  %p5711_p7 = scmp.ge.s32.totalorder %s7927_s24, 1 }
  0x1d   : > { %s8090_s28 = scalar_select %p469_p1, %s7923_s23, %s471_s26  }
  0x1e   : > { %p8092_p5 = por %p482_p2, %p481_p0  ;;  %p8096_p6 = por %p488_p4, %p487_p3 }
  0x1f   : > { %9020 = sst [smem:[#allocation32_spill]] %s8090_s28  ;;  %p495_p8 = scmp.lt.s32.totalorder %s7927_s24, 3 }
  0x20   : > { %s9021_s4 = scalar_select %p8092_p5, 1, 0 }
  0x21   : > { %s9023_s29 = scalar_select %p8096_p6, 1, 0 }
  0x22   : > { %9022 = sst [smem:[#allocation33_spill]] %s9021_s4  ;;  %p8997_p9 = scmp.eq.s32.totalorder %s8075_s2, 0 }
  0x23   : > { %9024 = sst [smem:[#allocation34_spill]] %s9023_s29  ;;  %p8103_p10 = pnand %p5711_p7, %p495_p8 }
  0x24   : > { %s7929_s0 = smov [#allocation5]   ;;  %s7930_s26 = smov [#allocation8]  }
  0x25   : > { %s9025_s30 = scalar_select %p8103_p10, 1, 0 }
  0x26   : > { %p6767_p11 = pneg %p8103_p10  ;;  %s520_s21 = sshll.u32 %s7929_s0, 4  ;;  %s8109_s21 = int_to_ptr.vmem [resolvable:$true] %s520_s21 }
  0x27   : > { %s554_s27 = sshll.u32 %s7930_s26, 4  ;;  %s7931_s28 = smov [#allocation11]   ;;  %s8117_s27 = int_to_ptr.vmem [resolvable:$true] %s554_s27 }
  0x28   : > { %p8113_p12 = pnand %p8997_p9, %p6767_p11  ;;  %s8119_s23 = sshll.u32 %s7931_s28, 4  ;;  %s579_s23 = int_to_ptr.vmem [resolvable:$true] %s8119_s23 }
  0x29   : > { %s9027_s1 = sld [smem:[#allocation37_spill]] }
  0x2a   : > { %p8129_p0 = pneg %p8113_p12 }
  0x2f   : > { %s9028_s20 = smov %s9027_s1  ;;  %s7561_s24 = scalar_lea.hbm %s9027_s1, 384 }
  0x30   : > { %p7562_p13 = scmp.ne.s32.totalorder %s9028_s20, %s7561_s24  ;;  %p7568_p3 = scmp.lt.u32.totalorder %s7561_s24, %s9028_s20 }
  0x32   : > { %p7564_p1 = pnand %p8129_p0, %p7562_p13 }
  0x34   : > { %p7565_p2 = pneg %p7564_p1 }
  0x36   : > { %p7570_p4 = pnand %p7568_p3, %p7565_p2 }
  0x38   : > { %7573 = shalt.err (!%p7570_p4)
}
  0x39   : > { %s7574_s1 = scalar_lea.vmem %s8109_s21, 384  ;;  %p7582_p9 = scmp.lt.s32.totalorder %s8109_s21, %s8109_s21 }
  0x3a   : > { %p7575_p7 = scmp.ne.s32.totalorder %s8109_s21, %s7574_s1  ;;  %p7583_p6 = scmp.lt.s32.totalorder %s7574_s1, %s7574_s1 }
  0x3c   : > { %p7577_p8 = pnand %p7575_p7, %p8129_p0  ;;  %p7584_p13 = por %p7583_p6, %p7582_p9 }
  0x3e   : > { %p7578_p11 = pneg %p7577_p8 }
  0x40   : > { %p7585_p1 = pnand %p7584_p13, %p7578_p11 }
  0x42   : > { %7588 = shalt.err (!%p7585_p1)
}
  0x43   : > { %s9002_s3 = smov 64   ;;  %s9003_s24 = smov 4  }
  0x44   : > { %6773 = dma.hbm_to_vmem [thread:$0]  (!%p8113_p12), %s9028_s20, 384, %s8109_s21, [#allocation6], %s9002_s3, %s9002_s3, %s9003_s24  }
  0x45   : > { %s9030_s7 = sld [smem:[#allocation40_spill]] }
  0x4b   : > { %s7589_s28 = scalar_lea.hbm %s9030_s7, 16 }
  0x4c   : > { %p7590_p6 = scmp.ne.s32.totalorder %s9030_s7, %s7589_s28  ;;  %p7596_p3 = scmp.lt.u32.totalorder %s7589_s28, %s9030_s7 }
  0x4e   : > { %p7592_p9 = pnand %p7590_p6, %p8129_p0 }
  0x50   : > { %p7593_p2 = pneg %p7592_p9 }
  0x52   : > { %p7598_p4 = pnand %p7596_p3, %p7593_p2 }
  0x54   : > { %7601 = shalt.err (!%p7598_p4)
}
  0x55   : > { %s7602_s21 = scalar_lea.vmem %s8117_s27, 16  ;;  %s7609_s22 = scalar_lea.vmem %s8117_s27, 32 }
  0x56   : > { %p7603_p7 = scmp.ne.s32.totalorder %s8117_s27, %s7602_s21  ;;  %p7610_p13 = scmp.lt.s32.totalorder %s8117_s27, %s8117_s27 }
  0x57   : > { %p7611_p1 = scmp.lt.s32.totalorder %s7609_s22, %s7602_s21 }
  0x58   : > { %p7605_p8 = pnand %p7603_p7, %p8129_p0 }
  0x59   : > { %p7612_p6 = por %p7611_p1, %p7610_p13 }
  0x5a   : > { %p7606_p11 = pneg %p7605_p8 }
  0x5c   : > { %p7613_p9 = pnand %p7612_p6, %p7606_p11 }
  0x5e   : > { %7616 = shalt.err (!%p7613_p9)
}
  0x5f   : > { %6779 = dma.hbm_to_vmem [thread:$0]  (!%p8113_p12), %s9030_s7, 16, %s8117_s27, [#allocation9]  }
  0x60   : > { %s9031_s10 = sld [smem:[#allocation41_spill]] }
  0x66   : > { %s7617_s0 = scalar_lea.hbm %s9031_s10, 1536 }
  0x67   : > { %p7618_p2 = scmp.ne.s32.totalorder %s9031_s10, %s7617_s0  ;;  %p7624_p7 = scmp.lt.u32.totalorder %s7617_s0, %s9031_s10 }
  0x69   : > { %p7620_p3 = pnand %p7618_p2, %p8129_p0 }
  0x6b   : > { %p7621_p4 = pneg %p7620_p3 }
  0x6d   : > { %p7626_p8 = pnand %p7624_p7, %p7621_p4 }
  0x6f   : > { %7629 = shalt.err (!%p7626_p8)
}
  0x70   : > { %s7630_s22 = scalar_lea.vmem %s579_s23, 1536  ;;  %p7638_p6 = scmp.lt.s32.totalorder %s579_s23, %s579_s23 }
  0x71   : > { %p7631_p11 = scmp.ne.s32.totalorder %s579_s23, %s7630_s22  ;;  %p7639_p9 = scmp.lt.s32.totalorder %s7630_s22, %s7630_s22 }
  0x73   : > { %p7633_p13 = pnand %p7631_p11, %p8129_p0  ;;  %p7640_p5 = por %p7639_p9, %p7638_p6 }
  0x75   : > { %p7634_p1 = pneg %p7633_p13 }
  0x77   : > { %p7641_p10 = pnand %p7640_p5, %p7634_p1 }
  0x79   : > { %7644 = shalt.err (!%p7641_p10)
}
  0x7a   : > { %6785 = dma.hbm_to_vmem [thread:$0]  (!%p8113_p12), %s9031_s10, 1536, %s579_s23, [#allocation12], %s9002_s3, %s9002_s3, %s9003_s24  }
  0x7b   : > { %s7934_s18 = smov [#allocation14]   ;;  %s7645_s26 = scalar_lea.hbm %s8975_s12, 6144 }
  0x7c   : > { %s602_s4 = sshll.u32 %s7934_s18, 4  ;;  %p7646_p5 = scmp.ne.s32.totalorder %s8975_s12, %s7645_s26  ;;  %s603_s4 = int_to_ptr.vmem [resolvable:$true] %s602_s4 }
  0x7d   : > { %p7652_p3 = scmp.lt.u32.totalorder %s7645_s26, %s8975_s12 }
  0x7e   : > { %p7648_p10 = pnand %p7646_p5, %p8129_p0 }
  0x80   : > { %p7649_p2 = pneg %p7648_p10 }
  0x82   : > { %p7654_p4 = pnand %p7652_p3, %p7649_p2 }
  0x84   : > { %7657 = shalt.err (!%p7654_p4)
}
  0x85   : > { %s7658_s23 = scalar_lea.vmem %s603_s4, 6144  ;;  %p7666_p13 = scmp.lt.s32.totalorder %s603_s4, %s603_s4 }
  0x86   : > { %p7659_p7 = scmp.ne.s32.totalorder %s603_s4, %s7658_s23  ;;  %p7667_p1 = scmp.lt.s32.totalorder %s7658_s23, %s7658_s23 }
  0x88   : > { %p7661_p8 = pnand %p7659_p7, %p8129_p0  ;;  %p7668_p6 = por %p7667_p1, %p7666_p13 }
  0x8a   : > { %p7662_p11 = pneg %p7661_p8 }
  0x8c   : > { %p7669_p9 = pnand %p7668_p6, %p7662_p11 }
  0x8e   : > { %7672 = shalt.err (!%p7669_p9)
}
  0x8f   : > { %s7935_s27 = smov 128   ;;  %s7936_s17 = smov 8  }
  0x90   : > { %6791 = dma.hbm_to_vmem [thread:$0]  (!%p8113_p12), %s8975_s12, 6144, %s603_s4, [#allocation15], %s7935_s27, %s7935_s27, %s7936_s17  }
  0x91   : > { %s7937_s0 = smov [#allocation2]   ;;  %s7938_s28 = smov [#allocation7]  }
  0x92   : > { %s507_s26 = sshll.u32 %s7937_s0, 4  ;;  %s540_s1 = sshll.u32 %s7938_s28, 4  ;;  %s508_s26 = int_to_ptr.vmem [resolvable:$true] %s507_s26  ;;  %s8220_s1 = int_to_ptr.vmem [resolvable:$true] %s540_s1 }
  0x93   : > { %s9032_s23 = sld [smem:[#allocation36_spill]] }
  0x99   : > { %s9033_s3 = smov %s9032_s23  ;;  %s7673_s24 = scalar_lea.hbm %s9032_s23, 960 }
  0x9a   : > { %p7674_p5 = scmp.ne.s32.totalorder %s9033_s3, %s7673_s24  ;;  %p7680_p3 = scmp.lt.u32.totalorder %s7673_s24, %s9033_s3 }
  0x9c   : > { %p7676_p10 = pnand %p7674_p5, %p8129_p0 }
  0x9e   : > { %p7677_p2 = pneg %p7676_p10 }
  0xa0   : > { %p7682_p4 = pnand %p7680_p3, %p7677_p2 }
  0xa2   : > { %7685 = shalt.err (!%p7682_p4)
}
  0xa3   : > { %s7686_s29 = scalar_lea.vmem %s508_s26, 960  ;;  %p7694_p13 = scmp.lt.s32.totalorder %s508_s26, %s508_s26 }
  0xa4   : > { %p7687_p7 = scmp.ne.s32.totalorder %s508_s26, %s7686_s29  ;;  %p7695_p1 = scmp.lt.s32.totalorder %s7686_s29, %s7686_s29 }
  0xa6   : > { %p7689_p8 = pnand %p7687_p7, %p8129_p0  ;;  %p7696_p6 = por %p7695_p1, %p7694_p13 }
  0xa8   : > { %p7690_p11 = pneg %p7689_p8 }
  0xaa   : > { %p7697_p9 = pnand %p7696_p6, %p7690_p11 }
  0xac   : > { %7700 = shalt.err (!%p7697_p9)
}
  0xad   : > { %s9034_s7 = smov 4   ;;  %s9035_s10 = smov 64  }
  0xae   : > { %6770 = dma.hbm_to_vmem [thread:$0]  (!%p8113_p12), %s9033_s3, 960, %s508_s26, [#allocation3], %s9035_s10, %s9035_s10, %s9034_s7  }
  0xaf   : > { %s7701_s22 = scalar_lea.hbm %s8968_s5, 16 }
  0xb0   : > { %p7702_p5 = scmp.ne.s32.totalorder %s8968_s5, %s7701_s22  ;;  %p7708_p3 = scmp.lt.u32.totalorder %s7701_s22, %s8968_s5 }
  0xb2   : > { %p7704_p10 = pnand %p7702_p5, %p8129_p0 }
  0xb4   : > { %p7705_p2 = pneg %p7704_p10 }
  0xb6   : > { %p7710_p4 = pnand %p7708_p3, %p7705_p2 }
  0xb8   : > { %7713 = shalt.err (!%p7710_p4)
}
  0xb9   : > { %s7714_s26 = scalar_lea.vmem %s8220_s1, 16  ;;  %s7721_s7 = scalar_lea.vmem %s8220_s1, 32 }
  0xba   : > { %p7715_p7 = scmp.ne.s32.totalorder %s8220_s1, %s7714_s26  ;;  %p7722_p13 = scmp.lt.s32.totalorder %s8220_s1, %s8220_s1 }
  0xbb   : > { %p7723_p1 = scmp.lt.s32.totalorder %s7721_s7, %s7714_s26 }
  0xbc   : > { %p7717_p8 = pnand %p7715_p7, %p8129_p0 }
  0xbd   : > { %p7724_p6 = por %p7723_p1, %p7722_p13 }
  0xbe   : > { %p7718_p11 = pneg %p7717_p8 }
  0xc0   : > { %p7725_p9 = pnand %p7724_p6, %p7718_p11 }
  0xc2   : > { %7728 = shalt.err (!%p7725_p9)
}
  0xc3   : > { %6776 = dma.hbm_to_vmem [thread:$0]  (!%p8113_p12), %s8968_s5, 16, %s8220_s1, [#allocation6]  }
  0xc4   : > { %s7939_s24 = smov [#allocation10]   ;;  %s7940_s21 = smov [#allocation13]  }
  0xc5   : > { %s568_s28 = sshll.u32 %s7939_s24, 4  ;;  %s592_s22 = sshll.u32 %s7940_s21, 4  ;;  %s569_s28 = int_to_ptr.vmem [resolvable:$true] %s568_s28  ;;  %s8267_s22 = int_to_ptr.vmem [resolvable:$true] %s592_s22 }
  0xc6   : > { %s7729_s4 = scalar_lea.hbm %s8972_s9, 16 }
  0xc7   : > { %p7730_p5 = scmp.ne.s32.totalorder %s8972_s9, %s7729_s4  ;;  %p7736_p3 = scmp.lt.u32.totalorder %s7729_s4, %s8972_s9 }
  0xc9   : > { %p7732_p10 = pnand %p7730_p5, %p8129_p0 }
  0xcb   : > { %p7733_p2 = pneg %p7732_p10 }
  0xcd   : > { %p7738_p4 = pnand %p7736_p3, %p7733_p2 }
  0xcf   : > { %7741 = shalt.err (!%p7738_p4)
}
  0xd0   : > { %s7742_s10 = scalar_lea.vmem %s569_s28, 16  ;;  %s7749_s0 = scalar_lea.vmem %s569_s28, 32 }
  0xd1   : > { %p7743_p7 = scmp.ne.s32.totalorder %s569_s28, %s7742_s10  ;;  %p7750_p13 = scmp.lt.s32.totalorder %s569_s28, %s569_s28 }
  0xd2   : > { %p7751_p1 = scmp.lt.s32.totalorder %s7749_s0, %s7742_s10 }
  0xd3   : > { %p7745_p8 = pnand %p7743_p7, %p8129_p0 }
  0xd4   : > { %p7752_p6 = por %p7751_p1, %p7750_p13 }
  0xd5   : > { %p7746_p11 = pneg %p7745_p8 }
  0xd7   : > { %p7753_p9 = pnand %p7752_p6, %p7746_p11 }
  0xd9   : > { %7756 = shalt.err (!%p7753_p9)
}
  0xda   : > { %6782 = dma.hbm_to_vmem [thread:$0]  (!%p8113_p12), %s8972_s9, 16, %s569_s28, [#allocation9]  }
  0xdb   : > { %s7757_s4 = scalar_lea.hbm %s8974_s11, 16 }
  0xdc   : > { %p7758_p5 = scmp.ne.s32.totalorder %s8974_s11, %s7757_s4  ;;  %p7764_p3 = scmp.lt.u32.totalorder %s7757_s4, %s8974_s11 }
  0xde   : > { %p7760_p10 = pnand %p7758_p5, %p8129_p0 }
  0xe0   : > { %p7761_p2 = pneg %p7760_p10 }
  0xe2   : > { %p7766_p4 = pnand %p7764_p3, %p7761_p2 }
  0xe4   : > { %7769 = shalt.err (!%p7766_p4)
}
  0xe5   : > { %s7770_s28 = scalar_lea.vmem %s8267_s22, 16  ;;  %s7777_s10 = scalar_lea.vmem %s8267_s22, 32 }
  0xe6   : > { %p7771_p7 = scmp.ne.s32.totalorder %s8267_s22, %s7770_s28  ;;  %p7778_p13 = scmp.lt.s32.totalorder %s8267_s22, %s8267_s22 }
  0xe7   : > { %p7779_p1 = scmp.lt.s32.totalorder %s7777_s10, %s7770_s28 }
  0xe8   : > { %p7773_p8 = pnand %p7771_p7, %p8129_p0 }
  0xe9   : > { %p7780_p6 = por %p7779_p1, %p7778_p13 }
  0xea   : > { %p7774_p11 = pneg %p7773_p8 }
  0xec   : > { %p7781_p9 = pnand %p7780_p6, %p7774_p11 }
  0xee   : > { %7784 = shalt.err (!%p7781_p9)
}
  0xef   : > { %6788 = dma.hbm_to_vmem [thread:$0]  (!%p8113_p12), %s8974_s11, 16, %s8267_s22, [#allocation12]  }
  0xf0   : > { %s7941_s21 = smov [#allocation16]   ;;  %s7942_s18 = smov [#allocation17]  }
  0xf1   : > { %s618_s23 = sshll.u32 %s7941_s21, 4  ;;  %s634_s4 = sshll.u32 %s7942_s18, 4  ;;  %s619_s23 = int_to_ptr.vmem [resolvable:$true] %s618_s23  ;;  %s8311_s4 = int_to_ptr.vmem [resolvable:$true] %s634_s4 }
  0xf2   : > { %s7785_s7 = scalar_lea.hbm %s8977_s14, 6144 }
  0xf3   : > { %p7786_p5 = scmp.ne.s32.totalorder %s8977_s14, %s7785_s7  ;;  %p7792_p3 = scmp.lt.u32.totalorder %s7785_s7, %s8977_s14 }
  0xf5   : > { %p7788_p10 = pnand %p7786_p5, %p8129_p0 }
  0xf7   : > { %p7789_p2 = pneg %p7788_p10 }
  0xf9   : > { %p7794_p4 = pnand %p7792_p3, %p7789_p2 }
  0xfb   : > { %7797 = shalt.err (!%p7794_p4)
}
  0xfc   : > { %s7798_s0 = scalar_lea.vmem %s619_s23, 6144  ;;  %p7806_p13 = scmp.lt.s32.totalorder %s619_s23, %s619_s23 }
  0xfd   : > { %p7799_p7 = scmp.ne.s32.totalorder %s619_s23, %s7798_s0  ;;  %p7807_p1 = scmp.lt.s32.totalorder %s7798_s0, %s7798_s0 }
  0xff   : > { %p7801_p8 = pnand %p7799_p7, %p8129_p0  ;;  %p7808_p6 = por %p7807_p1, %p7806_p13 }
 0x101   : > { %p7802_p11 = pneg %p7801_p8 }
 0x103   : > { %p7809_p9 = pnand %p7808_p6, %p7802_p11 }
 0x105   : > { %7812 = shalt.err (!%p7809_p9)
}
 0x106   : > { %6794 = dma.hbm_to_vmem [thread:$0]  (!%p8113_p12), %s8977_s14, 6144, %s619_s23, [#allocation15], %s7935_s27, %s7935_s27, %s7936_s17  }
 0x107   : > { %s7813_s26 = scalar_lea.hbm %s8979_s16, 32768 }
 0x108   : > { %p7814_p5 = scmp.ne.s32.totalorder %s8979_s16, %s7813_s26  ;;  %p7820_p3 = scmp.lt.u32.totalorder %s7813_s26, %s8979_s16 }
 0x10a   : > { %p7816_p10 = pnand %p7814_p5, %p8129_p0 }
 0x10c   : > { %p7817_p2 = pneg %p7816_p10 }
 0x10e   : > { %p7822_p4 = pnand %p7820_p3, %p7817_p2 }
 0x110   : > { %7825 = shalt.err (!%p7822_p4)
}
 0x111   : > { %s7826_s27 = scalar_lea.vmem %s8311_s4, 32768  ;;  %p7834_p13 = scmp.lt.s32.totalorder %s8311_s4, %s8311_s4 }
 0x112   : > { %p7827_p7 = scmp.ne.s32.totalorder %s8311_s4, %s7826_s27  ;;  %p7835_p1 = scmp.lt.s32.totalorder %s7826_s27, %s7826_s27 }
 0x114   : > { %p7829_p8 = pnand %p7827_p7, %p8129_p0  ;;  %p7836_p6 = por %p7835_p1, %p7834_p13 }
 0x116   : > { %p7830_p11 = pneg %p7829_p8 }
 0x118   : > { %p7837_p9 = pnand %p7836_p6, %p7830_p11 }
 0x11a   : > { %7840 = shalt.err (!%p7837_p9)
}
 0x11b   : > { %s7943_s17 = smov 256   ;;  %s7944_s23 = smov 16  }
 0x11c   : > { %6797 = dma.hbm_to_vmem [thread:$0]  (!%p8113_p12), %s8979_s16, 32768, %s8311_s4, [#allocation18], %s7943_s17, %s7943_s17, %s7944_s23  }
 0x11d   : > { %p9036_p5 = scmp.ne.s32.totalorder %s9025_s30, 0 }
 0x11e   : > { %p9037_p0 = scmp.eq.s32.totalorder (!%p9036_p5), %s8075_s2, 0 }
 0x11f   : > { %667 = sbr.rel (%p9036_p5) target bundleno = 2961 (0xb91), region = 100 }
 0x126   : > { %7886 = dma.done.wait (%p9037_p0), [#allocation3], 960   ;;  %p9038_p10 = pmov %p9037_p0 }
 0x127   : > { %p9039_p2 = pmov %p9037_p0 }
 0x128   : > { %7888 = vsyncadd (%p9038_p10), [#allocation3], 4294966336 }
 0x129   : > { %7890 = dma.done.wait (%p9039_p2), [#allocation6], 400   ;;  %p9040_p3 = pmov %p9037_p0 }
 0x12a   : > { %p9041_p4 = pmov %p9037_p0 }
 0x12b   : > { %7892 = vsyncadd (%p9040_p3), [#allocation6], 4294966896 }
 0x12c   : > { %7894 = dma.done.wait (%p9041_p4), [#allocation9], 32   ;;  %p9042_p12 = pmov %p9037_p0 }
 0x12d   : > { %p9043_p7 = pmov %p9037_p0 }
 0x12e   : > { %7896 = vsyncadd (%p9042_p12), [#allocation9], 4294967264 }
 0x12f   : > { %7898 = dma.done.wait (%p9043_p7), [#allocation12], 1552   ;;  %p9044_p8 = pmov %p9037_p0 }
 0x130   : > { %p9045_p11 = pmov %p9037_p0 }
 0x131   : > { %7900 = vsyncadd (%p9044_p8), [#allocation12], 4294965744 }
 0x132   : > { %7902 = dma.done.wait (%p9045_p11), [#allocation15], 12288   ;;  %p9046_p13 = pmov %p9037_p0 }
 0x133   : > { %p9047_p1 = pmov %p9037_p0 }
 0x134   : > { %7904 = vsyncadd (%p9046_p13), [#allocation15], 4294955008 }
 0x135   : > { %7906 = dma.done.wait (%p9047_p1), [#allocation18], 32768   ;;  %p9048_p6 = pmov %p9037_p0 }
 0x136   : > { %p761_p9 = scmp.lt.s32.totalorder %s8075_s2, 1  ;;  %v7945_v0 = vmov 0.0   ;;  %vm7946_vm0 = vmmov 0   ;;  %v6874_v1 = vld [vmem:[%s8969_s6] sm:$0xff]   ;;  %v6875_v2 = vld [vmem:[%s8969_s6 + $0x8] sm:$0xff]   ;;  %s9049_s26 = sld [smem:[#allocation35_spill]] }
 0x137   : > { %7908 = vsyncadd (%p9048_p6), [#allocation18], 4294934528  ;;  %6434 = vmatprep.subr.bf16.mxu1 %v7945_v0  ;;  %6444 = vmatprep.mubr.msk.bf16.mxu1 %vm7946_vm0, %v7945_v0  ;;  %v6876_v3 = vld [vmem:[%s8969_s6 + $0x10] sm:$0xff]   ;;  %s9050_s17 = sld [smem:[#allocation39_spill]]  ;;  %v6877_v6 = vld [vmem:[%s8969_s6 + $0x18] sm:$0xff]   ;;  %vm860_vm1 = vcmask 654336  }
 0x138   : > { %6404 = vmatprep.subr.bf16.mxu0 %v7945_v0  ;;  %6414 = vmatprep.mubr.msk.bf16.mxu0 %vm7946_vm0, %v7945_v0  ;;  %s762_s19 = scalar_select %p761_p9, %s8075_s2, 1  ;;  %v6878_v8 = vld [vmem:[%s8969_s6 + $0x20] sm:$0xff]   ;;  %v8471_v16 = vld [vmem:[#allocation8] ss:$0 sm:$0xff]  ;;  %v8481_v53 = vld [vmem:[#allocation7] ss:$0 sm:$0xff] }
 0x139   : > { %6435 = vmatpush3.bf16.msra.mxu1 %v6874_v1  ;;  %vm1161_vm2 = vcmask 1045504   ;;  %vm1151_vm3 = vcmask 621568   ;;  %vm1360_vm4 = vcmask 523264   ;;  %vm2041_vm5 = vcmask 1041408   ;;  %s9051_s21 = sld [smem:[#allocation38_spill]]  ;;  %s9052_s23 = sld [smem:[#allocation43_spill]] }
 0x13a   : > { %s6724_s4 = smul.u32 40, %s762_s19  ;;  %6436 = vmatprep.subr.bf16.mxu1 %v7945_v0  ;;  %vm2037_vm6 = vcmask 293888   ;;  %vm3102_vm7 = vcmask 130048   ;;  %s9055_s24 = sld [smem:[#allocation28_spill]] }
 0x13b   : > { %s9056_s1 = sld [smem:[#allocation44_spill]]  ;;  %s6259_s10 = sshll.u32 %s8075_s2, 6 }
 0x13c   : > { %s8401_s7 = scalar_lea.vmem %s9049_s26, %s6724_s4  ;;  %s9054_s4 = sld [smem:[#allocation42_spill]] }
 0x13d   : > { %6437 = vmatpush3.bf16.msra.mxu1 %v6875_v2  ;;  %v6880_v4 = vld [vmem:[%s9050_s17] sm:$0xff]   ;;  %v6881_v5 = vld [vmem:[%s9050_s17 + $0x8] sm:$0xff]   ;;  %v6883_v7 = vld [vmem:[%s9050_s17 + $0x10] sm:$0xff]   ;;  %s9057_s28 = sld [smem:[#allocation33_spill]]  ;;  %s9058_s30 = sld [smem:[#allocation45_spill]] }
 0x13e   : > { %6438 = vmatprep.subr.bf16.mxu1 %v7945_v0  ;;  %6405 = vmatpush3.bf16.msra.mxu0 %v6880_v4  ;;  %v6879_v9 = vld [vmem:[%s8401_s7] sm:$0xff]   ;;  %v6884_v10 = vld [vmem:[%s9050_s17 + $0x18] sm:$0xff]   ;;  %v6882_v12 = vld [vmem:[%s8401_s7 + $0x8] sm:$0xff]   ;;  %s7948_s2 = smov [#allocation19]  }
 0x13f   : > { %6406 = vmatprep.subr.bf16.mxu0 %v7945_v0  ;;  %v6886_v11 = vld [vmem:[%s9050_s17 + $0x20] sm:$0xff]   ;;  %v6885_v13 = vld [vmem:[%s8401_s7 + $0x10] sm:$0xff]   ;;  %v6887_v14 = vld [vmem:[%s8401_s7 + $0x18] sm:$0xff]   ;;  %s9053_s0 = smov %s9052_s23 }
 0x140   : > { %v6888_v15 = vld [vmem:[%s8401_s7 + $0x20] sm:$0x3f]   ;;  %s758_s18 = sand.u32 1, %s9055_s24  }
 0x141   : > { %6439 = vmatpush3.bf16.msra.mxu1 %v6876_v3  ;;  %s5734_s29 = sshll.u32 %s758_s18, 2 }
 0x142   : > { %6440 = vmatprep.subr.bf16.mxu1 %v7945_v0  ;;  %6407 = vmatpush3.bf16.msra.mxu0 %v6881_v5  ;;  %s760_s27 = scalar_lea.vmem [#allocation19], %s5734_s29  ;;  %s7845_s29 = sshll.u32 %s7948_s2, 4  ;;  %s7846_s29 = int_to_ptr.vmem [resolvable:$false] %s7845_s29 }
 0x143   : > { %6408 = vmatprep.subr.bf16.mxu0 %v7945_v0  ;;  %s8921_s25 = scalar_lea.hbm %s9058_s30, %s6259_s10  ;;  %p9059_p0 = scmp.ne.s32.totalorder %s9057_s28, 0 }
 0x144   : > { %s7847_s26 = scalar_lea.vmem %s7846_s29, 128 }
 0x145   : > { %6441 = vmatpush3.bf16.msra.mxu1 %v6877_v6 }
 0x146   : > { %6442 = vmatprep.subr.bf16.mxu1 %v7945_v0  ;;  %6409 = vmatpush3.bf16.msra.mxu0 %v6883_v7 }
 0x147   : > { %6410 = vmatprep.subr.bf16.mxu0 %v7945_v0 }
 0x149   : > { %6443 = vmatpush3.bf16.msra.mxu1 %v6878_v8 }
 0x14a   : > { %6486 = vmatprep.subr.bf16.mxu1 %v7945_v0  ;;  %6411 = vmatpush3.bf16.msra.mxu0 %v6884_v10 }
 0x14b   : > { %6412 = vmatprep.subr.bf16.mxu0 %v7945_v0 }
 0x14c   : > { %6445 = vmatmul.mubr.msk.bf16.vlgmr.msra.gmra.mrb[0].mxu1 %vm860_vm1, %v6879_v9 }
 0x14d   : > { %6448 = vmatprep.mubr.msk.bf16.mxu1 %vm7946_vm0, %v7945_v0 }
 0x14e   : > { %6413 = vmatpush3.bf16.msra.mxu0 %v6886_v11 }
 0x14f   : > { %6464 = vmatprep.subr.bf16.mxu0 %v7945_v0 }
 0x151   : > { %6415 = vmatmul.mubr.msk.bf16.vlgmr.msra.gmra.mrb[0].mxu0 %vm860_vm1, %v6879_v9 }
 0x152   : > { %6418 = vmatprep.mubr.msk.bf16.mxu0 %vm7946_vm0, %v7945_v0 }
 0x154   : > { %6449 = vmatmul.mubr.msk.bf16.gmra.mrb[4].mxu1 %vm860_vm1, %v6882_v12 }
 0x155   : > { %6452 = vmatprep.mubr.msk.bf16.mxu1 %vm7946_vm0, %v7945_v0 }
 0x159   : > { %6419 = vmatmul.mubr.msk.bf16.gmra.mrb[4].mxu0 %vm860_vm1, %v6882_v12 }
 0x15a   : > { %6422 = vmatprep.mubr.msk.bf16.mxu0 %vm7946_vm0, %v7945_v0 }
 0x15c   : > { %6453 = vmatmul.mubr.msk.bf16.gmra.mrb[8].mxu1 %vm860_vm1, %v6885_v13 }
 0x15d   : > { %6456 = vmatprep.mubr.msk.bf16.mxu1 %vm7946_vm0, %v7945_v0 }
 0x161   : > { %6423 = vmatmul.mubr.msk.bf16.gmra.mrb[8].mxu0 %vm860_vm1, %v6885_v13 }
 0x162   : > { %6426 = vmatprep.mubr.msk.bf16.mxu0 %vm7946_vm0, %v7945_v0 }
 0x164   : > { %6457 = vmatmul.mubr.msk.bf16.gmra.mrb[12].mxu1 %vm860_vm1, %v6887_v14 }
 0x165   : > { %6460 = vmatprep.mubr.msk.bf16.mxu1 %vm7946_vm0, %v7945_v0 }
 0x169   : > { %6427 = vmatmul.mubr.msk.bf16.gmra.mrb[12].mxu0 %vm860_vm1, %v6887_v14 }
 0x16a   : > { %6430 = vmatprep.mubr.msk.bf16.mxu0 %vm7946_vm0, %v7945_v0 }
 0x16c   : > { %6461 = vmatmul.mubr.msk.bf16.gmra.mrb[16].mxu1 %vm860_vm1, %v6888_v15 }
 0x16d   : > { %6496 = vmatprep.mubr.msk.bf16.mxu1 %vm7946_vm0, %v7945_v0 }
 0x171   : > { %6431 = vmatmul.mubr.msk.bf16.gmra.mrb[16].mxu0 %vm860_vm1, %v6888_v15 }
 0x172   : > { %6474 = vmatprep.mubr.msk.bf16.mxu0 %vm7946_vm0, %v7945_v0 }
 0x21f   : > { %v1019_v17 = vpop.f32.mrb[0].mxu1 }
 0x220   : > { %v1020_v18 = vadd.f32 %v8471_v16, %v1019_v17  ;;  %v6446_v19 = vpop.f32.mrb[1].mxu1 }
 0x221   : > { %v1022_v20 = vpop.f32.mrb[2].mxu1 }
 0x222   : > { %v5763_v21 = vmul.f32 -1.442695, %v1020_v18  ;;  %v1023_v22 = vadd.f32 %v8471_v16, %v1022_v20  ;;  %v6447_v23 = vpop.f32.mrb[3].mxu1 }
 0x224   : > { %7485 = vpow2.f32 %v5763_v21  ;;  %v5764_v24 = vmul.f32 -1.442695, %v1023_v22  ;;  %v910_v25 = vpop.f32.mrb[0].mxu0 }
 0x225   : > { %v6416_v26 = vpop.f32.mrb[1].mxu0  ;;  %v911_v61 = vadd.f32 %v8481_v53, %v910_v25 }
 0x226   : > { %7487 = vpow2.f32 %v5764_v24  ;;  %v913_v28 = vpop.f32.mrb[2].mxu0 }
 0x227   : > { %v1027_v27 = vpop.f32.mrb[4].mxu1  ;;  %v6417_v31 = vpop.f32.mrb[3].mxu0  ;;  %v914_v9 = vadd.f32 %v8481_v53, %v913_v28 }
 0x228   : > { %v1028_v29 = vadd.f32 %v8471_v16, %v1027_v27  ;;  %v6450_v30 = vpop.f32.mrb[5].mxu1 }
 0x229   : > { %v1030_v32 = vpop.f32.mrb[6].mxu1 }
 0x22a   : > { %v5765_v33 = vmul.f32 -1.442695, %v1028_v29  ;;  %v1031_v34 = vadd.f32 %v8471_v16, %v1030_v32  ;;  %v6451_v35 = vpop.f32.mrb[7].mxu1 }
 0x22c   : > { %7489 = vpow2.f32 %v5765_v33  ;;  %v5766_v36 = vmul.f32 -1.442695, %v1031_v34  ;;  %v918_v37 = vpop.f32.mrb[4].mxu0 }
 0x22d   : > { %v6420_v39 = vpop.f32.mrb[5].mxu0  ;;  %v919_v22 = vadd.f32 %v8481_v53, %v918_v37 }
 0x22e   : > { %v7486_v38 = vpop.eup %7485  ;;  %7491 = vpow2.f32 %v5766_v36  ;;  %v8477_v42 = vpop.f32.mrb[6].mxu0 }
 0x22f   : > { %v1088_v40 = vadd.f32 1.0, %v7486_v38  ;;  %v1035_v41 = vpop.f32.mrb[8].mxu1  ;;  %v6421_v46 = vpop.f32.mrb[7].mxu0  ;;  %v922_v33 = vadd.f32 %v8481_v53, %v8477_v42 }
 0x230   : > { %v7488_v43 = vpop.eup %7487  ;;  %v1036_v44 = vadd.f32 %v8471_v16, %v1035_v41  ;;  %v6454_v45 = vpop.f32.mrb[9].mxu1 }
 0x231   : > { %7493 = vrcp.f32 %v1088_v40  ;;  %v1089_v47 = vadd.f32 1.0, %v7488_v43  ;;  %v1038_v48 = vpop.f32.mrb[10].mxu1 }
 0x232   : > { %v5767_v49 = vmul.f32 -1.442695, %v1036_v44  ;;  %v1039_v50 = vadd.f32 %v8471_v16, %v1038_v48  ;;  %v6455_v51 = vpop.f32.mrb[11].mxu1 }
 0x233   : > { %7495 = vrcp.f32 %v1089_v47 }
 0x234   : > { %7497 = vpow2.f32 %v5767_v49  ;;  %v5768_v52 = vmul.f32 -1.442695, %v1039_v50  ;;  %v8483_v54 = vpop.f32.mrb[8].mxu0 }
 0x235   : > { %v6424_v56 = vpop.f32.mrb[9].mxu0  ;;  %v927_v44 = vadd.f32 %v8481_v53, %v8483_v54 }
 0x236   : > { %v7490_v55 = vpop.eup %7489  ;;  %7499 = vpow2.f32 %v5768_v52  ;;  %v8485_v59 = vpop.f32.mrb[10].mxu0 }
 0x237   : > { %v1090_v57 = vadd.f32 1.0, %v7490_v55  ;;  %v1043_v58 = vpop.f32.mrb[12].mxu1  ;;  %v6425_v1 = vpop.f32.mrb[11].mxu0  ;;  %v930_v48 = vadd.f32 %v8481_v53, %v8485_v59 }
 0x238   : > { %v7492_v60 = vpop.eup %7491  ;;  %v1044_v62 = vadd.f32 %v8471_v16, %v1043_v58  ;;  %v6458_v63 = vpop.f32.mrb[13].mxu1 }
 0x239   : > { %7501 = vrcp.f32 %v1090_v57  ;;  %v1091_v2 = vadd.f32 1.0, %v7492_v60  ;;  %v1046_v3 = vpop.f32.mrb[14].mxu1 }
 0x23a   : > { %v5769_v4 = vmul.f32 -1.442695, %v1044_v62  ;;  %v1047_v5 = vadd.f32 %v8471_v16, %v1046_v3  ;;  %v6459_v6 = vpop.f32.mrb[15].mxu1 }
 0x23b   : > { %v7494_v7 = vpop.eup %7493  ;;  %7503 = vrcp.f32 %v1091_v2 }
 0x23c   : > { %v1118_v8 = vmul.f32 %v7494_v7, %v911_v61  ;;  %7505 = vpow2.f32 %v5769_v4  ;;  %v5770_v10 = vmul.f32 -1.442695, %v1047_v5  ;;  %v934_v12 = vpop.f32.mrb[12].mxu0 }
 0x23d   : > { %v7496_v11 = vpop.eup %7495  ;;  %v6428_v15 = vpop.f32.mrb[13].mxu0  ;;  %v935_v56 = vadd.f32 %v8481_v53, %v934_v12  ;;  %v6897_v12 = vld [vmem:[%s8971_s8 + $0x28] sm:$0xff]  }
 0x23e   : > { %v7498_v13 = vpop.eup %7497  ;;  %v1119_v14 = vmul.f32 %v7496_v11, %v914_v9  ;;  %7507 = vpow2.f32 %v5770_v10  ;;  %v937_v19 = vpop.f32.mrb[14].mxu0  ;;  %v6889_v9 = vld [vmem:[#allocation2 + $0x14] sm:$0xff]   ;;  %v6892_v10 = vld [vmem:[#allocation2] sm:$0xff]   ;;  %v6893_v15 = vld [vmem:[#allocation2 + $0x8] sm:$0xff]  }
 0x23f   : > { %v1092_v17 = vadd.f32 1.0, %v7498_v13  ;;  %v1051_v18 = vpop.f32.mrb[16].mxu1  ;;  %v6429_v25 = vpop.f32.mrb[15].mxu0  ;;  %v938_v60 = vadd.f32 %v8481_v53, %v937_v19  ;;  %v6895_v11 = vld [vmem:[%s8971_s8 + $0x20] sm:$0xff]  }
 0x240   : > { %v7500_v20 = vpop.eup %7499  ;;  %v8491_v21 = vpack.c.bf16 %v1119_v14, %v1118_v8  ;;  %v1052_v23 = vadd.f32 %v8471_v16, %v1051_v18  ;;  %v6462_v24 = vpop.f32.mrb[17].mxu1  ;;  %v6898_v13 = vld [vmem:[#allocation11 + $0x28] sm:$0xff]   ;;  %v6900_v18 = vld [vmem:[#allocation11 + $0x30] sm:$0xff]  }
 0x241   : > { %7509 = vrcp.f32 %v1092_v17  ;;  %v1093_v26 = vadd.f32 1.0, %v7500_v20  ;;  %v1054_v27 = vpop.f32.mrb[18].mxu1  ;;  %v6890_v14 = vld [vmem:[#allocation2 + $0x1c] sm:$0xff]   ;;  %v6899_v17 = vld [vmem:[%s8971_s8 + $0x30] sm:$0xff]  }
 0x242   : > { %v5771_v28 = vmul.f32 -1.442695, %v1052_v23  ;;  %v1055_v29 = vadd.f32 %v8471_v16, %v1054_v27  ;;  %v6463_v30 = vpop.f32.mrb[19].mxu1  ;;  %6465 = vmatpush3.bf16.msra.mxu0 %v8491_v21  ;;  %6487 = vmatpush3.bf16.msra.mxu1 %v8491_v21  ;;  %v6891_v19 = vld [vmem:[#allocation2 + $0x24] ss:$0 sps:$4 sm:$0x33]  }
 0x243   : > { %v7502_v31 = vpop.eup %7501  ;;  %7511 = vrcp.f32 %v1093_v26  ;;  %6466 = vmatprep.subr.bf16.mxu0 %v7945_v0  ;;  %6488 = vmatprep.subr.bf16.mxu1 %v7945_v0  ;;  %v6894_v20 = vld [vmem:[#allocation2 + $0x10] ss:$0 sps:$4 sm:$0x33]   ;;  %v6902_v23 = vld [vmem:[#allocation11 + $0x38] sm:$0xff]  }
 0x244   : > { %v1120_v32 = vmul.f32 %v7502_v31, %v919_v22  ;;  %7513 = vpow2.f32 %v5771_v28  ;;  %v5772_v34 = vmul.f32 -1.442695, %v1055_v29  ;;  %v942_v36 = vpop.f32.mrb[16].mxu0  ;;  %v6901_v22 = vld [vmem:[%s8971_s8 + $0x38] sm:$0xff]   ;;  %v6903_v29 = vld [vmem:[%s8971_s8] sm:$0xff]  }
 0x245   : > { %v7504_v35 = vpop.eup %7503  ;;  %v6432_v38 = vpop.f32.mrb[17].mxu0  ;;  %v943_v1 = vadd.f32 %v8481_v53, %v942_v36  ;;  %v6905_v36 = vld [vmem:[%s8971_s8 + $0x8] sm:$0xff]  }
 0x246   : > { %v7506_v16 = vpop.eup %7505  ;;  %v1121_v37 = vmul.f32 %v7504_v35, %v922_v33  ;;  %7515 = vpow2.f32 %v5772_v34  ;;  %v945_v40 = vpop.f32.mrb[18].mxu0  ;;  %v6904_v33 = vld [vmem:[#allocation11] sm:$0xff]  }
 0x247   : > { %v1094_v39 = vadd.f32 1.0, %v7506_v16  ;;  %v6433_v45 = vpop.f32.mrb[19].mxu0  ;;  %v946_v4 = vadd.f32 %v8481_v53, %v945_v40  ;;  %v6896_v53 = vld [vmem:[#allocation11 + $0x20] sm:$0xff]   ;;  %v6906_v16 = vld [vmem:[#allocation11 + $0x8] sm:$0xff]  }
 0x248   : > { %v7508_v41 = vpop.eup %7507  ;;  %v8502_v43 = vpack.c.bf16 %v1121_v37, %v1120_v32 }
 0x249   : > { %7517 = vrcp.f32 %v1094_v39  ;;  %v1095_v46 = vadd.f32 1.0, %v7508_v41 }
 0x24a   : > { %6467 = vmatpush3.bf16.msra.mxu0 %v8502_v43  ;;  %6489 = vmatpush3.bf16.msra.mxu1 %v8502_v43 }
 0x24b   : > { %v7510_v42 = vpop.eup %7509  ;;  %7519 = vrcp.f32 %v1095_v46  ;;  %6468 = vmatprep.subr.bf16.mxu0 %v7945_v0  ;;  %6490 = vmatprep.subr.bf16.mxu1 %v7945_v0 }
 0x24c   : > { %v1122_v47 = vmul.f32 %v7510_v42, %v927_v44  ;;  %v6907_v42 = vld [vmem:[%s8971_s8 + $0x10] sm:$0xff]  }
 0x24d   : > { %v7512_v49 = vpop.eup %7511 }
 0x24e   : > { %v7514_v50 = vpop.eup %7513  ;;  %v1123_v51 = vmul.f32 %v7512_v49, %v930_v48 }
 0x24f   : > { %v1096_v52 = vadd.f32 1.0, %v7514_v50  ;;  %v6909_v50 = vld [vmem:[%s8971_s8 + $0x18] sm:$0xff]  }
 0x250   : > { %v7516_v54 = vpop.eup %7515  ;;  %v8512_v55 = vpack.c.bf16 %v1123_v51, %v1122_v47  ;;  %v6908_v47 = vld [vmem:[#allocation11 + $0x10] sm:$0xff]   ;;  %v6910_v51 = vld [vmem:[#allocation11 + $0x18] sm:$0xff]  }
 0x251   : > { %7521 = vrcp.f32 %v1096_v52  ;;  %v1097_v57 = vadd.f32 1.0, %v7516_v54 }
 0x252   : > { %6469 = vmatpush3.bf16.msra.mxu0 %v8512_v55  ;;  %6491 = vmatpush3.bf16.msra.mxu1 %v8512_v55 }
 0x253   : > { %v7518_v58 = vpop.eup %7517  ;;  %7523 = vrcp.f32 %v1097_v57  ;;  %6470 = vmatprep.subr.bf16.mxu0 %v7945_v0  ;;  %6492 = vmatprep.subr.bf16.mxu1 %v7945_v0 }
 0x254   : > { %v1124_v59 = vmul.f32 %v7518_v58, %v935_v56 }
 0x255   : > { %v7520_v61 = vpop.eup %7519 }
 0x256   : > { %v1125_v62 = vmul.f32 %v7520_v61, %v938_v60 }
 0x258   : > { %v8520_v63 = vpack.c.bf16 %v1125_v62, %v1124_v59 }
 0x25a   : > { %6471 = vmatpush3.bf16.msra.mxu0 %v8520_v63  ;;  %6493 = vmatpush3.bf16.msra.mxu1 %v8520_v63 }
 0x25b   : > { %v7522_v2 = vpop.eup %7521  ;;  %6472 = vmatprep.subr.bf16.mxu0 %v7945_v0  ;;  %6494 = vmatprep.subr.bf16.mxu1 %v7945_v0 }
 0x25c   : > { %v1126_v3 = vmul.f32 %v7522_v2, %v943_v1  ;;  %v6914_v1 = vld [vmem:[#allocation11 + $0x40] sm:$0xff]  }
 0x25d   : > { %v7524_v5 = vpop.eup %7523  ;;  %v6915_v2 = vld [vmem:[%s8971_s8 + $0x40] sm:$0xff]  }
 0x25e   : > { %v1127_v6 = vmul.f32 %v7524_v5, %v946_v4  ;;  %v6917_v4 = vld [vmem:[%s8971_s8 + $0x48] sm:$0xff]   ;;  %v6918_v5 = vld [vmem:[%s8971_s8 + $0x50] sm:$0xff]  }
 0x260   : > { %v1132_v7 = vpack.c.bf16 %v1127_v6, %v1126_v3  ;;  %v6916_v3 = vld [vmem:[#allocation11 + $0x48] sm:$0xff]   ;;  %v6919_v6 = vld [vmem:[#allocation11 + $0x50] sm:$0xff]  }
 0x262   : > { %v8528_v8 = vsel %vm1161_vm2, %v1132_v7, 0  ;;  %v6920_v7 = vld [vmem:[%s8971_s8 + $0x58] sm:$0xff]  }
 0x263   : > { %6473 = vmatpush3.bf16.msra.mxu0 %v8528_v8  ;;  %6495 = vmatpush3.bf16.msra.mxu1 %v8528_v8 }
 0x264   : > { %6508 = vmatprep.subr.bf16.mxu0 %v7945_v0  ;;  %6528 = vmatprep.subr.bf16.mxu1 %v7945_v0 }
 0x266   : > { %6497 = vmatmul.mubr.msk.bf16.vlgmr.msra.gmra.mrb[20].mxu1 %vm1151_vm3, %v6889_v9  ;;  %6475 = vmatmul.mubr.msk.bf16.vlgmr.msra.gmra.mrb[20].mxu0 %vm1151_vm3, %v6892_v10 }
 0x267   : > { %6500 = vmatprep.mubr.msk.bf16.mxu1 %vm7946_vm0, %v7945_v0  ;;  %6478 = vmatprep.mubr.msk.bf16.mxu0 %vm7946_vm0, %v7945_v0 }
 0x268   : > { %6509 = vmatpush3.bf16.msra.mxu0 %v6895_v11  ;;  %6529 = vmatpush3.bf16.msra.mxu1 %v6896_v53 }
 0x269   : > { %6510 = vmatprep.subr.bf16.mxu0 %v7945_v0  ;;  %6530 = vmatprep.subr.bf16.mxu1 %v7945_v0 }
 0x26c   : > { %6511 = vmatpush3.bf16.msra.mxu0 %v6897_v12  ;;  %6531 = vmatpush3.bf16.msra.mxu1 %v6898_v13 }
 0x26d   : > { %6512 = vmatprep.subr.bf16.mxu0 %v7945_v0  ;;  %6532 = vmatprep.subr.bf16.mxu1 %v7945_v0 }
 0x26e   : > { %6501 = vmatmul.mubr.msk.bf16.gmra.mrb[24].mxu1 %vm1151_vm3, %v6890_v14  ;;  %6479 = vmatmul.mubr.msk.bf16.gmra.mrb[24].mxu0 %vm1151_vm3, %v6893_v15 }
 0x26f   : > { %6504 = vmatprep.mubr.msk.bf16.mxu1 %vm7946_vm0, %v7945_v0  ;;  %6482 = vmatprep.mubr.msk.bf16.mxu0 %vm7946_vm0, %v7945_v0 }
 0x270   : > { %6513 = vmatpush3.bf16.msra.mxu0 %v6899_v17  ;;  %6533 = vmatpush3.bf16.msra.mxu1 %v6900_v18 }
 0x271   : > { %6514 = vmatprep.subr.bf16.mxu0 %v7945_v0  ;;  %6534 = vmatprep.subr.bf16.mxu1 %v7945_v0 }
 0x274   : > { %6515 = vmatpush3.bf16.msra.mxu0 %v6901_v22  ;;  %6535 = vmatpush3.bf16.msra.mxu1 %v6902_v23 }
 0x275   : > { %6548 = vmatprep.subr.bf16.mxu0 %v7945_v0  ;;  %6568 = vmatprep.subr.bf16.mxu1 %v7945_v0 }
 0x276   : > { %6505 = vmatmul.mubr.msk.bf16.gmra.mrb[28].mxu1 %vm1151_vm3, %v6891_v19  ;;  %6483 = vmatmul.mubr.msk.bf16.gmra.mrb[28].mxu0 %vm1151_vm3, %v6894_v20 }
 0x277   : > { %6516 = vmatprep.mubr.msk.bf16.mxu0 %vm7946_vm0, %v7945_v0  ;;  %6536 = vmatprep.mubr.msk.bf16.mxu1 %vm7946_vm0, %v7945_v0 }
 0x339   : > { %v1302_v24 = vpop.f32.mrb[20].mxu1  ;;  %v1199_v25 = vpop.f32.mrb[20].mxu0 }
 0x33a   : > { %v6498_v26 = vpop.f32.mrb[21].mxu1  ;;  %v6476_v27 = vpop.f32.mrb[21].mxu0 }
 0x33b   : > { %v1305_v28 = vpop.f32.mrb[22].mxu1  ;;  %v1202_v30 = vpop.f32.mrb[22].mxu0 }
 0x33c   : > { %v1324_v31 = vpack.c.bf16 %v1305_v28, %v1302_v24  ;;  %v6499_v32 = vpop.f32.mrb[23].mxu1  ;;  %v1221_v34 = vpack.c.bf16 %v1202_v30, %v1199_v25  ;;  %v6477_v35 = vpop.f32.mrb[23].mxu0 }
 0x33e   : > { %6517 = vmatmul.mubr.msk.bf16.vlgmr.msra.gmra.mrb[32].mxu0 %vm1360_vm4, %v1324_v31  ;;  %6537 = vmatmul.mubr.msk.bf16.vlgmr.msra.gmra.mrb[32].mxu1 %vm1360_vm4, %v1324_v31 }
 0x33f   : > { %6549 = vmatpush3.bf16.msra.mxu0 %v6903_v29  ;;  %6520 = vmatprep.mubr.msk.bf16.mxu0 %vm7946_vm0, %v7945_v0 }
 0x340   : > { %6540 = vmatprep.mubr.msk.bf16.mxu1 %vm7946_vm0, %v7945_v0  ;;  %6569 = vmatpush3.bf16.msra.mxu1 %v6904_v33 }
 0x341   : > { %v1310_v37 = vpop.f32.mrb[24].mxu1  ;;  %6550 = vmatprep.subr.bf16.mxu0 %v7945_v0  ;;  %6570 = vmatprep.subr.bf16.mxu1 %v7945_v0  ;;  %v1207_v38 = vpop.f32.mrb[24].mxu0 }
 0x342   : > { %v6502_v39 = vpop.f32.mrb[25].mxu1  ;;  %v6480_v40 = vpop.f32.mrb[25].mxu0 }
 0x343   : > { %v1313_v41 = vpop.f32.mrb[26].mxu1  ;;  %6551 = vmatpush3.bf16.msra.mxu0 %v6905_v36  ;;  %v1210_v44 = vpop.f32.mrb[26].mxu0 }
 0x344   : > { %v1325_v45 = vpack.c.bf16 %v1313_v41, %v1310_v37  ;;  %v6503_v46 = vpop.f32.mrb[27].mxu1  ;;  %6571 = vmatpush3.bf16.msra.mxu1 %v6906_v16  ;;  %6552 = vmatprep.subr.bf16.mxu0 %v7945_v0  ;;  %v1222_v48 = vpack.c.bf16 %v1210_v44, %v1207_v38  ;;  %v6481_v49 = vpop.f32.mrb[27].mxu0 }
 0x345   : > { %6572 = vmatprep.subr.bf16.mxu1 %v7945_v0 }
 0x346   : > { %6521 = vmatmul.mubr.msk.bf16.gmra.mrb[36].mxu0 %vm1360_vm4, %v1325_v45  ;;  %6541 = vmatmul.mubr.msk.bf16.gmra.mrb[36].mxu1 %vm1360_vm4, %v1325_v45 }
 0x347   : > { %6524 = vmatprep.mubr.msk.bf16.mxu0 %vm7946_vm0, %v7945_v0  ;;  %6544 = vmatprep.mubr.msk.bf16.mxu1 %vm7946_vm0, %v7945_v0 }
 0x348   : > { %6553 = vmatpush3.bf16.msra.mxu0 %v6907_v42  ;;  %6573 = vmatpush3.bf16.msra.mxu1 %v6908_v47 }
 0x349   : > { %v1318_v52 = vpop.f32.mrb[28].mxu1  ;;  %6554 = vmatprep.subr.bf16.mxu0 %v7945_v0  ;;  %6574 = vmatprep.subr.bf16.mxu1 %v7945_v0  ;;  %v1215_v54 = vpop.f32.mrb[28].mxu0 }
 0x34a   : > { %v1326_v56 = vpack.c.bf16 %v1318_v52, %v1318_v52  ;;  %v6506_v57 = vpop.f32.mrb[29].mxu1  ;;  %v6484_v58 = vpop.f32.mrb[29].mxu0 }
 0x34b   : > { %v1321_v59 = vpop.f32.mrb[30].mxu1  ;;  %v1218_v60 = vpop.f32.mrb[30].mxu0 }
 0x34c   : > { %v6507_v61 = vpop.f32.mrb[31].mxu1  ;;  %6555 = vmatpush3.bf16.msra.mxu0 %v6909_v50  ;;  %6575 = vmatpush3.bf16.msra.mxu1 %v6910_v51  ;;  %v6485_v62 = vpop.f32.mrb[31].mxu0 }
 0x34d   : > { %6588 = vmatprep.subr.bf16.mxu0 %v7945_v0  ;;  %6610 = vmatprep.subr.bf16.mxu1 %v7945_v0 }
 0x34e   : > { %6525 = vmatmul.mubr.msk.bf16.gmra.mrb[40].mxu0 %vm1360_vm4, %v1326_v56  ;;  %6545 = vmatmul.mubr.msk.bf16.gmra.mrb[40].mxu1 %vm1360_vm4, %v1326_v56 }
 0x34f   : > { %6556 = vmatprep.mubr.msk.bf16.mxu0 %vm7946_vm0, %v7945_v0  ;;  %6576 = vmatprep.mubr.msk.bf16.mxu1 %vm7946_vm0, %v7945_v0 }
 0x356   : > { %6557 = vmatmul.mubr.msk.bf16.vlgmr.msra.gmra.mrb[44].mxu0 %vm1360_vm4, %v1221_v34  ;;  %6577 = vmatmul.mubr.msk.bf16.vlgmr.msra.gmra.mrb[44].mxu1 %vm1360_vm4, %v1221_v34 }
 0x357   : > { %6589 = vmatpush3.bf16.msra.mxu0 %v8491_v21  ;;  %6560 = vmatprep.mubr.msk.bf16.mxu0 %vm7946_vm0, %v7945_v0  ;;  %v1223_v21 = vpack.c.bf16 %v1215_v54, %v1215_v54 }
 0x358   : > { %6590 = vmatprep.subr.bf16.mxu0 %v7945_v0  ;;  %6580 = vmatprep.mubr.msk.bf16.mxu1 %vm7946_vm0, %v7945_v0 }
 0x359   : > { %6611 = vmatpush3.bf16.msra.mxu1 %v6915_v2 }
 0x35a   : > { %6612 = vmatprep.subr.bf16.mxu1 %v7945_v0 }
 0x35b   : > { %6591 = vmatpush3.bf16.msra.mxu0 %v8502_v43  ;;  %v6911_v43 = vld [vmem:[#allocation2 + $0x28] sm:$0xff]  }
 0x35c   : > { %6592 = vmatprep.subr.bf16.mxu0 %v7945_v0 }
 0x35d   : > { %6613 = vmatpush3.bf16.msra.mxu1 %v6917_v4 }
 0x35e   : > { %6561 = vmatmul.mubr.msk.bf16.gmra.mrb[48].mxu0 %vm1360_vm4, %v1222_v48  ;;  %6581 = vmatmul.mubr.msk.bf16.gmra.mrb[48].mxu1 %vm1360_vm4, %v1222_v48 }
 0x35f   : > { %6593 = vmatpush3.bf16.msra.mxu0 %v8512_v55  ;;  %6564 = vmatprep.mubr.msk.bf16.mxu0 %vm7946_vm0, %v7945_v0  ;;  %v6912_v55 = vld [vmem:[#allocation2 + $0x30] sm:$0xff]  }
 0x360   : > { %6594 = vmatprep.subr.bf16.mxu0 %v7945_v0  ;;  %6584 = vmatprep.mubr.msk.bf16.mxu1 %vm7946_vm0, %v7945_v0 }
 0x361   : > { %6614 = vmatprep.subr.bf16.mxu1 %v7945_v0 }
 0x362   : > { %6615 = vmatpush3.bf16.msra.mxu1 %v6918_v5 }
 0x363   : > { %6595 = vmatpush3.bf16.msra.mxu0 %v8520_v63  ;;  %v6913_v63 = vld [vmem:[#allocation2 + $0x38] ss:$0 sps:$4 sm:$0x33]   ;;  %6616 = vmatprep.subr.bf16.mxu1 %v7945_v0 }
 0x364   : > { %6596 = vmatprep.subr.bf16.mxu0 %v7945_v0 }
 0x366   : > { %6565 = vmatmul.mubr.msk.bf16.gmra.mrb[52].mxu0 %vm1360_vm4, %v1223_v21  ;;  %6585 = vmatmul.mubr.msk.bf16.gmra.mrb[52].mxu1 %vm1360_vm4, %v1223_v21 }
 0x367   : > { %6597 = vmatpush3.bf16.msra.mxu0 %v8528_v8  ;;  %6598 = vmatprep.mubr.msk.bf16.mxu0 %vm7946_vm0, %v7945_v0  ;;  %v6921_v8 = vld [vmem:[#allocation11 + $0x58] sm:$0xff]  }
 0x368   : > { %6630 = vmatprep.subr.bf16.mxu0 %v7945_v0  ;;  %6618 = vmatprep.mubr.msk.bf16.mxu1 %vm7946_vm0, %v7945_v0 }
 0x369   : > { %6617 = vmatpush3.bf16.msra.mxu1 %v6920_v7 }
 0x36a   : > { %6650 = vmatprep.subr.bf16.mxu1 %v7945_v0 }
 0x36e   : > { %6599 = vmatmul.mubr.msk.bf16.vlgmr.msra.gmra.mrb[56].mxu0 %vm1151_vm3, %v6911_v43 }
 0x36f   : > { %6602 = vmatprep.mubr.msk.bf16.mxu0 %vm7946_vm0, %v7945_v0  ;;  %6631 = vmatpush3.bf16.msra.mxu0 %v6914_v1 }
 0x370   : > { %6632 = vmatprep.subr.bf16.mxu0 %v7945_v0 }
 0x373   : > { %6633 = vmatpush3.bf16.msra.mxu0 %v6916_v3 }
 0x374   : > { %6634 = vmatprep.subr.bf16.mxu0 %v7945_v0 }
 0x376   : > { %6603 = vmatmul.mubr.msk.bf16.gmra.mrb[60].mxu0 %vm1151_vm3, %v6912_v55 }
 0x377   : > { %6606 = vmatprep.mubr.msk.bf16.mxu0 %vm7946_vm0, %v7945_v0  ;;  %6635 = vmatpush3.bf16.msra.mxu0 %v6919_v6 }
 0x378   : > { %6636 = vmatprep.subr.bf16.mxu0 %v7945_v0 }
 0x37b   : > { %6637 = vmatpush3.bf16.msra.mxu0 %v6921_v8 }
 0x37e   : > { %6607 = vmatmul.mubr.msk.bf16.gmra.mrb[64].mxu0 %vm1151_vm3, %v6913_v63 }
 0x37f   : > { %6638 = vmatprep.mubr.msk.bf16.mxu0 %vm7946_vm0, %v7945_v0 }
 0x411   : > { %v1404_v9 = vpop.f32.mrb[32].mxu0  ;;  %v1493_v10 = vpop.f32.mrb[32].mxu1 }
 0x412   : > { %v6518_v11 = vpop.f32.mrb[33].mxu0  ;;  %v6538_v53 = vpop.f32.mrb[33].mxu1 }
 0x413   : > { %v1407_v12 = vpop.f32.mrb[34].mxu0  ;;  %v1496_v13 = vpop.f32.mrb[34].mxu1 }
 0x414   : > { %v6519_v14 = vpop.f32.mrb[35].mxu0  ;;  %v6539_v15 = vpop.f32.mrb[35].mxu1 }
 0x419   : > { %v1412_v17 = vpop.f32.mrb[36].mxu0  ;;  %v1501_v18 = vpop.f32.mrb[36].mxu1 }
 0x41a   : > { %v6522_v19 = vpop.f32.mrb[37].mxu0  ;;  %v6542_v20 = vpop.f32.mrb[37].mxu1 }
 0x41b   : > { %v1415_v22 = vpop.f32.mrb[38].mxu0  ;;  %v1504_v23 = vpop.f32.mrb[38].mxu1  ;;  %v6924_v19 = vld [vmem:[#allocation14 + $0x80] ss:$8 sps:$4 sm:$0xff]   ;;  %v6926_v20 = vld [vmem:[#allocation14 + $0x84] ss:$8 sps:$4 sm:$0xff]  }
 0x41c   : > { %v6523_v24 = vpop.f32.mrb[39].mxu0  ;;  %v6543_v25 = vpop.f32.mrb[39].mxu1  ;;  %2269 = vmatprep.subr.bf16.mxu0 %v6926_v20 }
 0x41d   : > { %v6938_v24 = vld [vmem:[#allocation14 + $0xa4] ss:$8 sps:$4 sm:$0xff]   ;;  %v6936_v25 = vld [vmem:[#allocation14 + $0xa0] ss:$8 sps:$4 sm:$0xff]  }
 0x421   : > { %v1420_v26 = vpop.f32.mrb[40].mxu0  ;;  %v1509_v27 = vpop.f32.mrb[40].mxu1 }
 0x422   : > { %v6526_v28 = vpop.f32.mrb[41].mxu0  ;;  %v6546_v29 = vpop.f32.mrb[41].mxu1 }
 0x423   : > { %v1423_v30 = vpop.f32.mrb[42].mxu0  ;;  %v1512_v31 = vpop.f32.mrb[42].mxu1 }
 0x424   : > { %v6527_v32 = vpop.f32.mrb[43].mxu0  ;;  %v6547_v33 = vpop.f32.mrb[43].mxu1  ;;  %v5850_v30 = vld [vmem:[#allocation13] ss:$0 sm:$0xff] }
 0x429   : > { %v1582_v34 = vpop.f32.mrb[44].mxu0  ;;  %v1662_v35 = vpop.f32.mrb[44].mxu1 }
 0x42a   : > { %v8666_v36 = vadd.f32 %v1582_v34, %v1404_v9  ;;  %v8668_v16 = vadd.f32 %v1662_v35, %v1493_v10  ;;  %v6558_v37 = vpop.f32.mrb[45].mxu0  ;;  %v6578_v38 = vpop.f32.mrb[45].mxu1 }
 0x42b   : > { %v1585_v39 = vpop.f32.mrb[46].mxu0  ;;  %v1665_v40 = vpop.f32.mrb[46].mxu1 }
 0x42c   : > { %v8670_v41 = vadd.f32 %v1585_v39, %v1407_v12  ;;  %v8672_v44 = vadd.f32 %v1665_v40, %v1496_v13  ;;  %v6559_v45 = vpop.f32.mrb[47].mxu0  ;;  %v6579_v46 = vpop.f32.mrb[47].mxu1 }
 0x431   : > { %v1590_v42 = vpop.f32.mrb[48].mxu0  ;;  %v1670_v47 = vpop.f32.mrb[48].mxu1 }
 0x432   : > { %v8674_v48 = vadd.f32 %v1590_v42, %v1412_v17  ;;  %v8676_v49 = vadd.f32 %v1670_v47, %v1501_v18  ;;  %v6562_v50 = vpop.f32.mrb[49].mxu0  ;;  %v6582_v51 = vpop.f32.mrb[49].mxu1 }
 0x433   : > { %v1593_v52 = vpop.f32.mrb[50].mxu0  ;;  %v1673_v54 = vpop.f32.mrb[50].mxu1 }
 0x434   : > { %v8678_v56 = vadd.f32 %v1593_v52, %v1415_v22  ;;  %v8680_v57 = vadd.f32 %v1673_v54, %v1504_v23  ;;  %v6563_v58 = vpop.f32.mrb[51].mxu0  ;;  %v6583_v59 = vpop.f32.mrb[51].mxu1  ;;  %v6932_v22 = vld [vmem:[#allocation14 + $0x94] ss:$8 sps:$4 sm:$0xff]   ;;  %v6930_v23 = vld [vmem:[#allocation14 + $0x90] ss:$8 sps:$4 sm:$0xff]  }
 0x439   : > { %v1598_v60 = vpop.f32.mrb[52].mxu0  ;;  %v1678_v61 = vpop.f32.mrb[52].mxu1 }
 0x43a   : > { %v8682_v62 = vadd.f32 %v1598_v60, %v1420_v26  ;;  %v8684_v21 = vadd.f32 %v1678_v61, %v1509_v27  ;;  %v6566_v43 = vpop.f32.mrb[53].mxu0  ;;  %v6586_v55 = vpop.f32.mrb[53].mxu1  ;;  %v6944_v26 = vld [vmem:[#allocation14 + $0xb4] ss:$8 sps:$4 sm:$0xff]   ;;  %v6942_v27 = vld [vmem:[#allocation14 + $0xb0] ss:$8 sps:$4 sm:$0xff]  }
 0x43b   : > { %v1601_v63 = vpop.f32.mrb[54].mxu0  ;;  %v1681_v1 = vpop.f32.mrb[54].mxu1 }
 0x43c   : > { %v6567_v2 = vpop.f32.mrb[55].mxu0  ;;  %v6587_v3 = vpop.f32.mrb[55].mxu1 }
 0x441   : > { %v1746_v4 = vpop.f32.mrb[56].mxu0 }
 0x442   : > { %v6600_v5 = vpop.f32.mrb[57].mxu0 }
 0x443   : > { %v1749_v6 = vpop.f32.mrb[58].mxu0 }
 0x444   : > { %v1768_v7 = vpack.c.bf16 %v1749_v6, %v1746_v4  ;;  %v6601_v8 = vpop.f32.mrb[59].mxu0 }
 0x446   : > { %6619 = vmatmul.mubr.msk.bf16.vlgmr.msra.gmra.mrb[56].mxu1 %vm1360_vm4, %v1768_v7  ;;  %6639 = vmatmul.mubr.msk.bf16.vlgmr.msra.gmra.mrb[68].mxu0 %vm1360_vm4, %v1768_v7 }
 0x447   : > { %6622 = vmatprep.mubr.msk.bf16.mxu1 %vm7946_vm0, %v7945_v0  ;;  %6642 = vmatprep.mubr.msk.bf16.mxu0 %vm7946_vm0, %v7945_v0 }
 0x448   : > { %2270 = vmatpush1.bf16.msra.mxu0 %v6924_v19 }
 0x449   : > { %v1754_v9 = vpop.f32.mrb[60].mxu0  ;;  %2271 = vmatprep.subr.bf16.mxu0 %v6932_v22 }
 0x44a   : > { %v6604_v10 = vpop.f32.mrb[61].mxu0 }
 0x44b   : > { %v1757_v11 = vpop.f32.mrb[62].mxu0 }
 0x44c   : > { %v1769_v53 = vpack.c.bf16 %v1757_v11, %v1754_v9  ;;  %v6605_v12 = vpop.f32.mrb[63].mxu0  ;;  %2272 = vmatpush1.bf16.msra.mxu0 %v6930_v23 }
 0x44d   : > { %2273 = vmatprep.subr.bf16.mxu0 %v6938_v24 }
 0x44e   : > { %6623 = vmatmul.mubr.msk.bf16.gmra.mrb[60].mxu1 %vm1360_vm4, %v1769_v53  ;;  %6643 = vmatmul.mubr.msk.bf16.gmra.mrb[72].mxu0 %vm1360_vm4, %v1769_v53 }
 0x44f   : > { %6626 = vmatprep.mubr.msk.bf16.mxu1 %vm7946_vm0, %v7945_v0  ;;  %6646 = vmatprep.mubr.msk.bf16.mxu0 %vm7946_vm0, %v7945_v0 }
 0x450   : > { %2274 = vmatpush1.bf16.msra.mxu0 %v6936_v25 }
 0x451   : > { %v1762_v13 = vpop.f32.mrb[64].mxu0  ;;  %2275 = vmatprep.subr.bf16.mxu0 %v6944_v26 }
 0x452   : > { %v1770_v14 = vpack.c.bf16 %v1762_v13, %v1762_v13  ;;  %v6608_v15 = vpop.f32.mrb[65].mxu0 }
 0x453   : > { %v1765_v17 = vpop.f32.mrb[66].mxu0  ;;  %v5849_v15 = vld [vmem:[#allocation10] ss:$0 sm:$0xff] }
 0x454   : > { %v6609_v18 = vpop.f32.mrb[67].mxu0  ;;  %2276 = vmatpush1.bf16.msra.mxu0 %v6942_v27 }
 0x456   : > { %6627 = vmatmul.mubr.msk.bf16.gmra.mrb[64].mxu1 %vm1360_vm4, %v1770_v14  ;;  %6647 = vmatmul.mubr.msk.bf16.gmra.mrb[76].mxu0 %vm1360_vm4, %v1770_v14 }
 0x457   : > { %6656 = vmatprep.mubr.msk.bf16.mxu1 %vm7946_vm0, %v7945_v0 }
 0x519   : > { %v1847_v28 = vpop.f32.mrb[56].mxu1  ;;  %v1936_v29 = vpop.f32.mrb[68].mxu0 }
 0x51a   : > { %v1958_v31 = vadd.f32 %v1847_v28, %v8666_v36  ;;  %v1963_v32 = vadd.f32 %v1936_v29, %v8668_v16  ;;  %v6620_v33 = vpop.f32.mrb[57].mxu1  ;;  %v6640_v34 = vpop.f32.mrb[69].mxu0 }
 0x51b   : > { %v1850_v35 = vpop.f32.mrb[58].mxu1  ;;  %v1939_v37 = vpop.f32.mrb[70].mxu0 }
 0x51c   : > { %v1987_v38 = vadd.f32 %v5850_v30, %v1963_v32  ;;  %v1959_v39 = vadd.f32 %v1850_v35, %v8670_v41  ;;  %v1964_v40 = vadd.f32 %v1939_v37, %v8672_v44  ;;  %v6621_v45 = vpop.f32.mrb[59].mxu1  ;;  %v6641_v46 = vpop.f32.mrb[71].mxu0  ;;  %v1976_v18 = vadd.f32 %v5849_v15, %v1958_v31 }
 0x51d   : > { %v6922_v45 = vld [vmem:[#allocation5] sm:$0xff]  }
 0x51e   : > { %v5851_v42 = vmul.f32 -1.442695, %v1987_v38  ;;  %v1988_v47 = vadd.f32 %v5850_v30, %v1964_v40  ;;  %v1977_v20 = vadd.f32 %v5849_v15, %v1959_v39  ;;  %v6929_v46 = vld [vmem:[#allocation16 + $0x84] ss:$8 sps:$4 sm:$0xff]  }
 0x520   : > { %7525 = vpow2.f32 %v5851_v42  ;;  %v5852_v50 = vmul.f32 -1.442695, %v1988_v47  ;;  %v6923_v42 = vld [vmem:[#allocation5 + $0x8] sm:$0xff]  }
 0x521   : > { %v1855_v51 = vpop.f32.mrb[60].mxu1  ;;  %v1944_v52 = vpop.f32.mrb[72].mxu0  ;;  %v6927_v47 = vld [vmem:[#allocation16 + $0x80] ss:$8 sps:$4 sm:$0xff]  }
 0x522   : > { %7527 = vpow2.f32 %v5852_v50  ;;  %v1960_v36 = vadd.f32 %v1855_v51, %v8674_v48  ;;  %v1965_v16 = vadd.f32 %v1944_v52, %v8676_v49  ;;  %v6624_v54 = vpop.f32.mrb[61].mxu1  ;;  %v6644_v58 = vpop.f32.mrb[73].mxu0  ;;  %v6935_v50 = vld [vmem:[#allocation16 + $0x94] ss:$8 sps:$4 sm:$0xff]   ;;  %v6933_v51 = vld [vmem:[#allocation16 + $0x90] ss:$8 sps:$4 sm:$0xff]  }
 0x523   : > { %v1858_v59 = vpop.f32.mrb[62].mxu1  ;;  %v1947_v60 = vpop.f32.mrb[74].mxu0  ;;  %v6941_v52 = vld [vmem:[#allocation16 + $0xa4] ss:$8 sps:$4 sm:$0xff]   ;;  %v6945_v54 = vld [vmem:[#allocation16 + $0xb0] ss:$8 sps:$4 sm:$0xff]  }
 0x524   : > { %v1989_v41 = vadd.f32 %v5850_v30, %v1965_v16  ;;  %v1961_v44 = vadd.f32 %v1858_v59, %v8678_v56  ;;  %v1966_v61 = vadd.f32 %v1947_v60, %v8680_v57  ;;  %v6625_v43 = vpop.f32.mrb[63].mxu1  ;;  %v6645_v55 = vpop.f32.mrb[75].mxu0  ;;  %v1978_v28 = vadd.f32 %v5849_v15, %v1960_v36  ;;  %v6939_v36 = vld [vmem:[#allocation16 + $0xa0] ss:$8 sps:$4 sm:$0xff]   ;;  %v6947_v16 = vld [vmem:[#allocation16 + $0xb4] ss:$8 sps:$4 sm:$0xff]  }
 0x525   : > { %v6950_v58 = vld [vmem:[#allocation14 + $0xc4] ss:$8 sps:$4 sm:$0xff]   ;;  %v6948_v60 = vld [vmem:[#allocation14 + $0xc0] ss:$8 sps:$4 sm:$0xff]   ;;  %v6957_v43 = vld [vmem:[#allocation16 + $0xd0] ss:$8 sps:$4 sm:$0xff]  }
 0x526   : > { %v5853_v63 = vmul.f32 -1.442695, %v1989_v41  ;;  %v1990_v1 = vadd.f32 %v5850_v30, %v1966_v61  ;;  %v6953_v59 = vld [vmem:[#allocation16 + $0xc4] ss:$8 sps:$4 sm:$0xff]   ;;  %v6951_v41 = vld [vmem:[#allocation16 + $0xc0] ss:$8 sps:$4 sm:$0xff]   ;;  %2277 = vmatprep.subr.bf16.mxu0 %v6950_v58 }
 0x527   : > { %2278 = vmatpush1.bf16.msra.mxu0 %v6948_v60  ;;  %v6956_v61 = vld [vmem:[#allocation14 + $0xd4] ss:$8 sps:$4 sm:$0xff]   ;;  %v7024_v58 = vld [vmem:[#allocation16 + $0x100] ss:$8 sps:$4 sm:$0xff]   ;;  %v7030_v60 = vld [vmem:[#allocation16 + $0x110] ss:$8 sps:$4 sm:$0xff]  }
 0x528   : > { %7529 = vpow2.f32 %v5853_v63  ;;  %v5854_v2 = vmul.f32 -1.442695, %v1990_v1  ;;  %v6959_v55 = vld [vmem:[#allocation16 + $0xd4] ss:$8 sps:$4 sm:$0xff]   ;;  %v6962_v63 = vld [vmem:[#allocation14 + $0xe4] ss:$8 sps:$4 sm:$0xff]   ;;  %2279 = vmatprep.subr.bf16.mxu0 %v6956_v61 }
 0x529   : > { %v1863_v3 = vpop.f32.mrb[64].mxu1  ;;  %v1952_v4 = vpop.f32.mrb[76].mxu0  ;;  %v6965_v1 = vld [vmem:[#allocation16 + $0xe4] ss:$8 sps:$4 sm:$0xff]   ;;  %v7036_v61 = vld [vmem:[#allocation16 + $0x120] ss:$8 sps:$4 sm:$0xff]  }
 0x52a   : > { %v7526_v48 = vpop.eup %7525  ;;  %7531 = vpow2.f32 %v5854_v2  ;;  %v1962_v49 = vadd.f32 %v1863_v3, %v8682_v62  ;;  %v1967_v5 = vadd.f32 %v1952_v4, %v8684_v21  ;;  %v6628_v6 = vpop.f32.mrb[65].mxu1  ;;  %v6960_v2 = vld [vmem:[#allocation14 + $0xe0] ss:$8 sps:$4 sm:$0xff]   ;;  %v6968_v4 = vld [vmem:[#allocation14 + $0xf4] ss:$8 sps:$4 sm:$0xff]  }
 0x52b   : > { %v6648_v7 = vpop.f32.mrb[77].mxu0  ;;  %v2007_v8 = vadd.f32 1.0, %v7526_v48  ;;  %v1866_v56 = vpop.f32.mrb[66].mxu1  ;;  %v6963_v3 = vld [vmem:[#allocation16 + $0xe0] ss:$8 sps:$4 sm:$0xff]  }
 0x52c   : > { %v1955_v9 = vpop.f32.mrb[78].mxu0  ;;  %v7528_v57 = vpop.eup %7527  ;;  %v1991_v10 = vadd.f32 %v5850_v30, %v1967_v5  ;;  %v1979_v30 = vadd.f32 %v5849_v15, %v1961_v44  ;;  %v1980_v35 = vadd.f32 %v5849_v15, %v1962_v49  ;;  %v6954_v44 = vld [vmem:[#allocation14 + $0xd0] ss:$8 sps:$4 sm:$0xff]   ;;  %v6971_v48 = vld [vmem:[#allocation16 + $0xf4] ss:$8 sps:$4 sm:$0xff]   ;;  %v7947_v7 = vmov 0  }
 0x52d   : > { %v6629_v11 = vpop.f32.mrb[67].mxu1  ;;  %v6649_v53 = vpop.f32.mrb[79].mxu0  ;;  %7533 = vrcp.f32 %v2007_v8  ;;  %v2008_v12 = vadd.f32 1.0, %v7528_v57  ;;  %2280 = vmatpush1.bf16.msra.mxu0 %v6954_v44  ;;  %v6966_v49 = vld [vmem:[#allocation14 + $0xf0] ss:$8 sps:$4 sm:$0xff]   ;;  %2301 = vmatprep.mubr.bf16.mxu0 %v7947_v7 }
 0x52e   : > { %v5855_v13 = vmul.f32 -1.442695, %v1991_v10  ;;  %2281 = vmatprep.subr.bf16.mxu0 %v6962_v63  ;;  %v6969_v5 = vld [vmem:[#allocation16 + $0xf0] ss:$8 sps:$4 sm:$0xff]   ;;  %v6974_v6 = vld [vmem:[#allocation14 + $0x4] ss:$8 sps:$4 sm:$0xff]  }
 0x52f   : > { %7535 = vrcp.f32 %v2008_v12  ;;  %v6977_v8 = vld [vmem:[#allocation16 + $0x4] ss:$8 sps:$4 sm:$0xff]   ;;  %v6975_v15 = vld [vmem:[#allocation16] ss:$8 sps:$4 sm:$0xff]   ;;  %v7029_v63 = vld [vmem:[#allocation14 + $0x114] ss:$8 sps:$4 sm:$0xff]  }
 0x530   : > { %7537 = vpow2.f32 %v5855_v13  ;;  %v7023_v44 = vld [vmem:[#allocation14 + $0x104] ss:$8 sps:$4 sm:$0xff]  }
 0x531   : > { %2282 = vmatpush1.bf16.msra.mxu0 %v6960_v2  ;;  %v7050_v2 = vld [vmem:[#allocation16 + $0x144] ss:$8 sps:$4 sm:$0xff]  }
 0x532   : > { %v7530_v14 = vpop.eup %7529  ;;  %2283 = vmatprep.subr.bf16.mxu0 %v6968_v4  ;;  %v7056_v4 = vld [vmem:[#allocation16 + $0x154] ss:$8 sps:$4 sm:$0xff]  }
 0x533   : > { %v2009_v17 = vadd.f32 1.0, %v7530_v14  ;;  %v6972_v14 = vld [vmem:[#allocation14] ss:$8 sps:$4 sm:$0xff]  }
 0x534   : > { %v7532_v62 = vpop.eup %7531 }
 0x535   : > { %7539 = vrcp.f32 %v2009_v17  ;;  %v2010_v21 = vadd.f32 1.0, %v7532_v62  ;;  %2284 = vmatpush1.bf16.msra.mxu0 %v6966_v49  ;;  %v7054_v49 = vld [vmem:[#allocation16 + $0x150] ss:$8 sps:$4 sm:$0xff]  }
 0x536   : > { %2532 = vmatprep.subr.bf16.mxu0 %v6974_v6  ;;  %v7039_v6 = vld [vmem:[#allocation14 + $0x130] ss:$8 sps:$4 sm:$0xff]  }
 0x537   : > { %v7534_v19 = vpop.eup %7533  ;;  %7541 = vrcp.f32 %v2010_v21  ;;  %v6980_v21 = vld [vmem:[#allocation14 + $0x14] ss:$8 sps:$4 sm:$0xff]  }
 0x538   : > { %v2022_v22 = vmul.f32 %v7534_v19, %v1976_v18  ;;  %v6983_v18 = vld [vmem:[#allocation16 + $0x14] ss:$8 sps:$4 sm:$0xff]   ;;  %v6978_v19 = vld [vmem:[#allocation14 + $0x10] ss:$8 sps:$4 sm:$0xff]  }
 0x539   : > { %v7536_v23 = vpop.eup %7535 }
 0x53a   : > { %v7538_v24 = vpop.eup %7537  ;;  %v2023_v25 = vmul.f32 %v7536_v23, %v1977_v20  ;;  %v6981_v20 = vld [vmem:[#allocation16 + $0x10] ss:$8 sps:$4 sm:$0xff]   ;;  %v6989_v23 = vld [vmem:[#allocation16 + $0x24] ss:$8 sps:$4 sm:$0xff]  }
 0x53b   : > { %v2011_v26 = vadd.f32 1.0, %v7538_v24  ;;  %v6984_v24 = vld [vmem:[#allocation14 + $0x20] ss:$8 sps:$4 sm:$0xff]  }
 0x53c   : > { %v8712_v27 = vpack.c.bf16 %v2023_v25, %v2022_v22  ;;  %v6986_v22 = vld [vmem:[#allocation14 + $0x24] ss:$8 sps:$4 sm:$0xff]   ;;  %v6987_v25 = vld [vmem:[#allocation16 + $0x20] ss:$8 sps:$4 sm:$0xff]  }
 0x53d   : > { %7543 = vrcp.f32 %v2011_v26  ;;  %v6992_v26 = vld [vmem:[#allocation14 + $0x34] ss:$8 sps:$4 sm:$0xff]  }
 0x53e   : > { %6651 = vmatpush3.bf16.msra.mxu1 %v8712_v27 }
 0x53f   : > { %v7540_v29 = vpop.eup %7539  ;;  %6652 = vmatprep.subr.bf16.mxu1 %v7945_v0 }
 0x540   : > { %v2024_v32 = vmul.f32 %v7540_v29, %v1978_v28  ;;  %v6995_v28 = vld [vmem:[#allocation16 + $0x34] ss:$8 sps:$4 sm:$0xff]   ;;  %v6990_v29 = vld [vmem:[#allocation14 + $0x30] ss:$8 sps:$4 sm:$0xff]  }
 0x541   : > { %v7542_v31 = vpop.eup %7541 }
 0x542   : > { %v2025_v33 = vmul.f32 %v7542_v31, %v1979_v30  ;;  %v6993_v30 = vld [vmem:[#allocation16 + $0x30] ss:$8 sps:$4 sm:$0xff]   ;;  %v7001_v31 = vld [vmem:[#allocation16 + $0x44] ss:$8 sps:$4 sm:$0xff]  }
 0x544   : > { %v8716_v34 = vpack.c.bf16 %v2025_v33, %v2024_v32  ;;  %v6998_v32 = vld [vmem:[#allocation14 + $0x44] ss:$8 sps:$4 sm:$0xff]   ;;  %v6996_v33 = vld [vmem:[#allocation14 + $0x40] ss:$8 sps:$4 sm:$0xff]  }
 0x546   : > { %6653 = vmatpush3.bf16.msra.mxu1 %v8716_v34 }
 0x547   : > { %v7544_v37 = vpop.eup %7543  ;;  %6654 = vmatprep.subr.bf16.mxu1 %v7945_v0 }
 0x548   : > { %v2026_v38 = vmul.f32 %v7544_v37, %v1980_v35  ;;  %v6999_v35 = vld [vmem:[#allocation16 + $0x40] ss:$8 sps:$4 sm:$0xff]   ;;  %v7004_v37 = vld [vmem:[#allocation14 + $0x54] ss:$8 sps:$4 sm:$0xff]  }
 0x54a   : > { %v2029_v39 = vpack.c.bf16 %v2026_v38, %v2026_v38  ;;  %v7007_v38 = vld [vmem:[#allocation16 + $0x54] ss:$8 sps:$4 sm:$0xff]  }
 0x54c   : > { %v8720_v40 = vsel %vm2041_vm5, %v2029_v39, 0  ;;  %v7002_v39 = vld [vmem:[#allocation14 + $0x50] ss:$8 sps:$4 sm:$0xff]  }
 0x54d   : > { %6655 = vmatpush3.bf16.msra.mxu1 %v8720_v40 }
 0x54e   : > { %6660 = vmatprep.subr.bf16.mxu1 %v7945_v0 }
 0x550   : > { %6657 = vmatmul.mubr.msk.bf16.vlgmr.msra.gmra.mrb[68].mxu1 %vm2037_vm6, %v6922_v45  ;;  %v7005_v45 = vld [vmem:[#allocation16 + $0x50] ss:$8 sps:$4 sm:$0xff]  }
 0x551   : > { %6661 = vmatpush3.bf16.msra.mxu1 %v8712_v27  ;;  %6666 = vmatprep.mubr.msk.bf16.mxu1 %vm7946_vm0, %v7945_v0 }
 0x552   : > { %6662 = vmatprep.subr.bf16.mxu1 %v7945_v0 }
 0x555   : > { %6663 = vmatpush3.bf16.msra.mxu1 %v8716_v34 }
 0x556   : > { %6664 = vmatprep.subr.bf16.mxu1 %v7945_v0 }
 0x559   : > { %6665 = vmatpush3.bf16.msra.mxu1 %v8720_v40 }
 0x55a   : > { %2409 = vmatprep.subr.bf16.mxu1 %v6929_v46  ;;  %v7010_v46 = vld [vmem:[#allocation14 + $0x64] ss:$8 sps:$4 sm:$0xff]  }
 0x55c   : > { %6667 = vmatmul.mubr.msk.bf16.vlgmr.msra.gmra.mrb[72].mxu1 %vm2037_vm6, %v6923_v42  ;;  %v7013_v42 = vld [vmem:[#allocation16 + $0x64] ss:$8 sps:$4 sm:$0xff]  }
 0x55d   : > { %2410 = vmatpush1.bf16.msra.mxu1 %v6927_v47  ;;  %2441 = vmatprep.mubr.bf16.mxu1 %v7947_v7  ;;  %v7008_v47 = vld [vmem:[#allocation14 + $0x60] ss:$8 sps:$4 sm:$0xff]  }
 0x55e   : > { %2411 = vmatprep.subr.bf16.mxu1 %v6935_v50  ;;  %v7011_v50 = vld [vmem:[#allocation16 + $0x60] ss:$8 sps:$4 sm:$0xff]  }
 0x561   : > { %2412 = vmatpush1.bf16.msra.mxu1 %v6933_v51  ;;  %v7016_v51 = vld [vmem:[#allocation14 + $0x74] ss:$8 sps:$4 sm:$0xff]  }
 0x562   : > { %2413 = vmatprep.subr.bf16.mxu1 %v6941_v52  ;;  %v7019_v52 = vld [vmem:[#allocation16 + $0x74] ss:$8 sps:$4 sm:$0xff]  }
 0x565   : > { %2414 = vmatpush1.bf16.msra.mxu1 %v6939_v36  ;;  %v7014_v36 = vld [vmem:[#allocation14 + $0x70] ss:$8 sps:$4 sm:$0xff]  }
 0x566   : > { %2415 = vmatprep.subr.bf16.mxu1 %v6947_v16  ;;  %v7017_v16 = vld [vmem:[#allocation16 + $0x70] ss:$8 sps:$4 sm:$0xff]  }
 0x569   : > { %2416 = vmatpush1.bf16.msra.mxu1 %v6945_v54  ;;  %v7026_v54 = vld [vmem:[#allocation16 + $0x104] ss:$8 sps:$4 sm:$0xff]  }
 0x56a   : > { %2417 = vmatprep.subr.bf16.mxu1 %v6953_v59  ;;  %v7032_v59 = vld [vmem:[#allocation16 + $0x114] ss:$8 sps:$4 sm:$0xff]  }
 0x56d   : > { %2418 = vmatpush1.bf16.msra.mxu1 %v6951_v41  ;;  %v7038_v41 = vld [vmem:[#allocation16 + $0x124] ss:$8 sps:$4 sm:$0xff]  }
 0x56e   : > { %2419 = vmatprep.subr.bf16.mxu1 %v6959_v55  ;;  %v7021_v55 = vld [vmem:[#allocation14 + $0x100] ss:$8 sps:$4 sm:$0xff]  }
 0x571   : > { %2420 = vmatpush1.bf16.msra.mxu1 %v6957_v43  ;;  %v7020_v43 = vld [vmem:[#allocation5 + $0x10] sm:$0xff]  }
 0x572   : > { %2421 = vmatprep.subr.bf16.mxu1 %v6965_v1  ;;  %v7042_v1 = vld [vmem:[#allocation16 + $0x130] ss:$8 sps:$4 sm:$0xff]  }
 0x575   : > { %2422 = vmatpush1.bf16.msra.mxu1 %v6963_v3  ;;  %v7048_v3 = vld [vmem:[#allocation16 + $0x140] ss:$8 sps:$4 sm:$0xff]  }
 0x576   : > { %2423 = vmatprep.subr.bf16.mxu1 %v6971_v48  ;;  %v7041_v48 = vld [vmem:[#allocation14 + $0x134] ss:$8 sps:$4 sm:$0xff]  }
 0x579   : > { %2424 = vmatpush1.bf16.msra.mxu1 %v6969_v5  ;;  %v7062_v5 = vld [vmem:[#allocation16 + $0x164] ss:$8 sps:$4 sm:$0xff]  }
 0x57a   : > { %2655 = vmatprep.subr.bf16.mxu1 %v6977_v8  ;;  %v7047_v8 = vld [vmem:[#allocation14 + $0x144] ss:$8 sps:$4 sm:$0xff]  }
 0x623   : > { %v2079_v56 = vpop.f32.mrb[68].mxu1 }
 0x624   : > { %v6658_v9 = vpop.f32.mrb[69].mxu1 }
 0x625   : > { %v2082_v57 = vpop.f32.mrb[70].mxu1  ;;  %v7045_v9 = vld [vmem:[#allocation14 + $0x140] ss:$8 sps:$4 sm:$0xff]  }
 0x626   : > { %v8735_v10 = vpack.c.bf16 %v2082_v57, %v2079_v56  ;;  %v6659_v11 = vpop.f32.mrb[71].mxu1  ;;  %v7060_v56 = vld [vmem:[#allocation16 + $0x160] ss:$8 sps:$4 sm:$0xff]   ;;  %v7053_v57 = vld [vmem:[#allocation14 + $0x154] ss:$8 sps:$4 sm:$0xff]  }
 0x627   : > { %v7059_v11 = vld [vmem:[#allocation14 + $0x164] ss:$8 sps:$4 sm:$0xff]  }
 0x62f   : > { %v2164_v53 = vpop.f32.mrb[72].mxu1 }
 0x630   : > { %v6668_v12 = vpop.f32.mrb[73].mxu1 }
 0x631   : > { %v2167_v13 = vpop.f32.mrb[74].mxu1  ;;  %v7065_v12 = vld [vmem:[#allocation14 + $0x174] ss:$8 sps:$4 sm:$0xff]  }
 0x632   : > { %v2171_v17 = vpack.c.bf16 %v2167_v13, %v2164_v53  ;;  %v6669_v62 = vpop.f32.mrb[75].mxu1  ;;  %v7057_v53 = vld [vmem:[#allocation14 + $0x160] ss:$8 sps:$4 sm:$0xff]   ;;  %v7068_v13 = vld [vmem:[#allocation16 + $0x174] ss:$8 sps:$4 sm:$0xff]  }
 0x634   : > { %2302 = vmatmul.mubr.bf16.vlgmr.msra.gmra.mrb[80].mxu0 %v2171_v17  ;;  %2442 = vmatmul.mubr.bf16.vlgmr.msra.gmra.mrb[76].mxu1 %v2171_v17 }
 0x635   : > { %2533 = vmatpush1.bf16.msra.mxu0 %v6972_v14  ;;  %2656 = vmatpush1.bf16.msra.mxu1 %v6975_v15  ;;  %v7063_v14 = vld [vmem:[#allocation14 + $0x170] ss:$8 sps:$4 sm:$0xff]  }
 0x636   : > { %2534 = vmatprep.subr.bf16.mxu0 %v6980_v21  ;;  %2657 = vmatprep.subr.bf16.mxu1 %v6983_v18  ;;  %v7066_v15 = vld [vmem:[#allocation16 + $0x170] ss:$8 sps:$4 sm:$0xff]  }
 0x637   : > { %2564 = vmatprep.mubr.bf16.mxu0 %v7947_v7  ;;  %2687 = vmatprep.mubr.bf16.mxu1 %v7947_v7 }
 0x639   : > { %2535 = vmatpush1.bf16.msra.mxu0 %v6978_v19  ;;  %2658 = vmatpush1.bf16.msra.mxu1 %v6981_v20  ;;  %v3042_v20 = vlaneseq }
 0x63a   : > { %2536 = vmatprep.subr.bf16.mxu0 %v6986_v22  ;;  %2659 = vmatprep.subr.bf16.mxu1 %v6989_v23 }
 0x63b   : > { %v8754_v22 = vshrl.u32 %v3042_v20, 7  ;;  %v7089_v20 = vld [vmem:[#allocation17 + $0x64] ss:$16 sps:$4 sm:$0xff]  }
 0x63d   : > { %2537 = vmatpush1.bf16.msra.mxu0 %v6984_v24  ;;  %2660 = vmatpush1.bf16.msra.mxu1 %v6987_v25  ;;  %v8757_v23 = vsub.s32 0, %v8754_v22  ;;  %v3040_v24 = vld [vmem:[%s8978_s15] sm:$0x3]  ;;  %v8763_v25 = vsub.s32 1, %v8754_v22 }
 0x63e   : > { %2538 = vmatprep.subr.bf16.mxu0 %v6992_v26  ;;  %2661 = vmatprep.subr.bf16.mxu1 %v6995_v28 }
 0x63f   : > { %v3060_v26 = vrot.slane %v3040_v24, %v8757_v23  ;;  %v3064_v28 = vrot.slane %v3040_v24, %v8763_v25  ;;  %v7092_v24 = vld [vmem:[#allocation17 + $0x6c] ss:$16 sps:$4 sm:$0xff]  }
 0x641   : > { %2539 = vmatpush1.bf16.msra.mxu0 %v6990_v29  ;;  %2662 = vmatpush1.bf16.msra.mxu1 %v6993_v30 }
 0x642   : > { %2540 = vmatprep.subr.bf16.mxu0 %v6998_v32  ;;  %2663 = vmatprep.subr.bf16.mxu1 %v7001_v31 }
 0x645   : > { %2541 = vmatpush1.bf16.msra.mxu0 %v6996_v33  ;;  %2664 = vmatpush1.bf16.msra.mxu1 %v6999_v35 }
 0x646   : > { %2542 = vmatprep.subr.bf16.mxu0 %v7004_v37  ;;  %2665 = vmatprep.subr.bf16.mxu1 %v7007_v38 }
 0x649   : > { %2543 = vmatpush1.bf16.msra.mxu0 %v7002_v39  ;;  %2666 = vmatpush1.bf16.msra.mxu1 %v7005_v45 }
 0x64a   : > { %2544 = vmatprep.subr.bf16.mxu0 %v7010_v46  ;;  %2667 = vmatprep.subr.bf16.mxu1 %v7013_v42 }
 0x64d   : > { %2545 = vmatpush1.bf16.msra.mxu0 %v7008_v47  ;;  %2668 = vmatpush1.bf16.msra.mxu1 %v7011_v50 }
 0x64e   : > { %2546 = vmatprep.subr.bf16.mxu0 %v7016_v51  ;;  %2669 = vmatprep.subr.bf16.mxu1 %v7019_v52 }
 0x651   : > { %2547 = vmatpush1.bf16.msra.mxu0 %v7014_v36  ;;  %2670 = vmatpush1.bf16.msra.mxu1 %v7017_v16 }
 0x652   : > { %6670 = vmatprep.subr.bf16.mxu0 %v7945_v0  ;;  %2988 = vmatprep.subr.bf16.mxu1 %v7026_v54 }
 0x654   : > { %2565 = vmatmul.mubr.bf16.vlgmr.msra.gmra.mrb[80].mxu0 %v8735_v10  ;;  %2688 = vmatmul.mubr.bf16.vlgmr.msra.gmra.mrb[76].mxu1 %v8735_v10  ;;  %v7051_v10 = vld [vmem:[#allocation14 + $0x150] ss:$8 sps:$4 sm:$0xff]  }
 0x655   : > { %6671 = vmatpush3.bf16.msra.mxu0 %v8712_v27  ;;  %6676 = vmatprep.mubr.msk.bf16.mxu0 %vm7946_vm0, %v7945_v0  ;;  %v7044_v27 = vld [vmem:[#allocation16 + $0x134] ss:$8 sps:$4 sm:$0xff]  }
 0x656   : > { %6672 = vmatprep.subr.bf16.mxu0 %v7945_v0  ;;  %2989 = vmatpush1.bf16.msra.mxu1 %v7024_v58 }
 0x657   : > { %2990 = vmatprep.subr.bf16.mxu1 %v7032_v59  ;;  %3020 = vmatprep.mubr.bf16.mxu1 %v7947_v7 }
 0x659   : > { %6673 = vmatpush3.bf16.msra.mxu0 %v8716_v34  ;;  %v7027_v34 = vld [vmem:[#allocation14 + $0x110] ss:$8 sps:$4 sm:$0xff]  }
 0x65a   : > { %6674 = vmatprep.subr.bf16.mxu0 %v7945_v0  ;;  %2991 = vmatpush1.bf16.msra.mxu1 %v7030_v60  ;;  %v7035_v0 = vld [vmem:[#allocation14 + $0x124] ss:$8 sps:$4 sm:$0xff]  }
 0x65b   : > { %2992 = vmatprep.subr.bf16.mxu1 %v7038_v41 }
 0x65d   : > { %6675 = vmatpush3.bf16.msra.mxu0 %v8720_v40  ;;  %v7033_v40 = vld [vmem:[#allocation14 + $0x120] ss:$8 sps:$4 sm:$0xff]  }
 0x65e   : > { %2848 = vmatprep.subr.bf16.mxu0 %v7023_v44  ;;  %2993 = vmatpush1.bf16.msra.mxu1 %v7036_v61  ;;  %v3039_v61 = vld [vmem:[%s8976_s13] sm:$0x3] }
 0x65f   : > { %2994 = vmatprep.subr.bf16.mxu1 %v7044_v27  ;;  %v3045_v27 = vrot.slane %v3039_v61, %v8757_v23 }
 0x660   : > { %6677 = vmatmul.mubr.msk.bf16.vlgmr.msra.gmra.mrb[84].mxu0 %vm2037_vm6, %v7020_v43  ;;  %v3049_v43 = vrot.slane %v3039_v61, %v8763_v25  ;;  %v7131_v61 = vld [vmem:[#allocation17 + $0x144] ss:$16 sps:$4 sm:$0xff]  }
 0x661   : > { %2849 = vmatpush1.bf16.msra.mxu0 %v7021_v55  ;;  %2880 = vmatprep.mubr.bf16.mxu0 %v7947_v7 }
 0x662   : > { %2850 = vmatprep.subr.bf16.mxu0 %v7029_v63  ;;  %2995 = vmatpush1.bf16.msra.mxu1 %v7042_v1 }
 0x663   : > { %2996 = vmatprep.subr.bf16.mxu1 %v7050_v2 }
 0x665   : > { %2851 = vmatpush1.bf16.msra.mxu0 %v7027_v34 }
 0x666   : > { %2852 = vmatprep.subr.bf16.mxu0 %v7035_v0  ;;  %2997 = vmatpush1.bf16.msra.mxu1 %v7048_v3 }
 0x667   : > { %2998 = vmatprep.subr.bf16.mxu1 %v7056_v4 }
 0x669   : > { %2853 = vmatpush1.bf16.msra.mxu0 %v7033_v40 }
 0x66a   : > { %2854 = vmatprep.subr.bf16.mxu0 %v7041_v48  ;;  %2999 = vmatpush1.bf16.msra.mxu1 %v7054_v49 }
 0x66b   : > { %3000 = vmatprep.subr.bf16.mxu1 %v7062_v5 }
 0x66d   : > { %2855 = vmatpush1.bf16.msra.mxu0 %v7039_v6 }
 0x66e   : > { %2856 = vmatprep.subr.bf16.mxu0 %v7047_v8  ;;  %3001 = vmatpush1.bf16.msra.mxu1 %v7060_v56  ;;  %v3101_v56 = vld [vmem:[%s9051_s21] sm:$0x3] }
 0x66f   : > { %3002 = vmatprep.subr.bf16.mxu1 %v7068_v13  ;;  %v5967_v13 = vld [vmem:[%s9051_s21 + $0x6] sm:$0x3] }
 0x671   : > { %2857 = vmatpush1.bf16.msra.mxu0 %v7045_v9  ;;  %v5963_v9 = vld [vmem:[%s9051_s21 + $0x2] sm:$0x3] }
 0x672   : > { %2858 = vmatprep.subr.bf16.mxu0 %v7053_v57  ;;  %3003 = vmatpush1.bf16.msra.mxu1 %v7066_v15  ;;  %v7071_v57 = vld [vmem:[#allocation17 + $0x4] ss:$16 sps:$4 sm:$0xff]   ;;  %v7080_v15 = vld [vmem:[#allocation17 + $0x2c] ss:$16 sps:$4 sm:$0xff]  }
 0x675   : > { %2859 = vmatpush1.bf16.msra.mxu0 %v7051_v10  ;;  %v7074_v10 = vld [vmem:[#allocation17 + $0xc] ss:$16 sps:$4 sm:$0xff]  }
 0x676   : > { %2860 = vmatprep.subr.bf16.mxu0 %v7059_v11  ;;  %v5965_v11 = vld [vmem:[%s9051_s21 + $0x4] sm:$0x3] }
 0x679   : > { %2861 = vmatpush1.bf16.msra.mxu0 %v7057_v53  ;;  %v7069_v53 = vld [vmem:[#allocation17] ss:$16 sps:$4 sm:$0xff]  }
 0x67a   : > { %2862 = vmatprep.subr.bf16.mxu0 %v7065_v12  ;;  %v7072_v12 = vld [vmem:[#allocation17 + $0x8] ss:$16 sps:$4 sm:$0xff]  }
 0x67d   : > { %2863 = vmatpush1.bf16.msra.mxu0 %v7063_v14  ;;  %v7077_v14 = vld [vmem:[#allocation17 + $0x24] ss:$16 sps:$4 sm:$0xff]  }
 0x733   : > { %v2743_v17 = vpop.f32.mrb[84].mxu0 }
 0x734   : > { %v6678_v62 = vpop.f32.mrb[85].mxu0 }
 0x735   : > { %v2746_v21 = vpop.f32.mrb[86].mxu0  ;;  %v7083_v62 = vld [vmem:[#allocation17 + $0x44] ss:$16 sps:$4 sm:$0xff]  }
 0x736   : > { %v2750_v18 = vpack.c.bf16 %v2746_v21, %v2743_v17  ;;  %v6679_v19 = vpop.f32.mrb[87].mxu0  ;;  %v7078_v17 = vld [vmem:[#allocation17 + $0x28] ss:$16 sps:$4 sm:$0xff]   ;;  %v7086_v21 = vld [vmem:[#allocation17 + $0x4c] ss:$16 sps:$4 sm:$0xff]  }
 0x737   : > { %v7084_v19 = vld [vmem:[#allocation17 + $0x48] ss:$16 sps:$4 sm:$0xff]  }
 0x738   : > { %2881 = vmatmul.mubr.bf16.vlgmr.msra.gmra.mrb[80].mxu0 %v2750_v18  ;;  %3021 = vmatmul.mubr.bf16.vlgmr.msra.gmra.mrb[76].mxu1 %v2750_v18  ;;  %v7081_v18 = vld [vmem:[#allocation17 + $0x40] ss:$16 sps:$4 sm:$0xff]  }
 0x739   : > { %3138 = vmatprep.mubr.bf16.mxu0 %v7947_v7  ;;  %3186 = vmatprep.mubr.bf16.mxu1 %v7947_v7 }
 0x80b   : > { %v2882_v29 = vpop.f32.mrb[80].mxu0  ;;  %v3022_v30 = vpop.f32.mrb[76].mxu1 }
 0x80c   : > { %v3067_v32 = vadd.f32 %v3060_v26, %v3022_v30  ;;  %v2884_v31 = vpop.f32.mrb[81].mxu0  ;;  %v3024_v33 = vpop.f32.mrb[77].mxu1  ;;  %v3052_v55 = vadd.f32 %v3045_v27, %v2882_v29  ;;  %v7095_v29 = vld [vmem:[#allocation17 + $0x84] ss:$16 sps:$4 sm:$0xff]   ;;  %v7098_v30 = vld [vmem:[#allocation17 + $0x8c] ss:$16 sps:$4 sm:$0xff]  }
 0x80d   : > { %v3068_v35 = vadd.f32 %v3064_v28, %v3024_v33  ;;  %v2886_v37 = vpop.f32.mrb[82].mxu0  ;;  %v3026_v38 = vpop.f32.mrb[78].mxu1  ;;  %v3053_v1 = vadd.f32 %v3049_v43, %v2884_v31  ;;  %v7096_v31 = vld [vmem:[#allocation17 + $0x88] ss:$16 sps:$4 sm:$0xff]   ;;  %v7101_v33 = vld [vmem:[#allocation17 + $0xa4] ss:$16 sps:$4 sm:$0xff]  }
 0x80e   : > { %v5958_v39 = vmul.f32 -1.442695, %v3067_v32  ;;  %v3069_v45 = vadd.f32 %v3060_v26, %v3026_v38  ;;  %v2888_v46 = vpop.f32.mrb[83].mxu0  ;;  %v3028_v42 = vpop.f32.mrb[79].mxu1  ;;  %v3054_v34 = vadd.f32 %v3045_v27, %v2886_v37  ;;  %v7087_v26 = vld [vmem:[#allocation17 + $0x60] ss:$16 sps:$4 sm:$0xff]  }
 0x80f   : > { %v5959_v47 = vmul.f32 -1.442695, %v3068_v35  ;;  %v3070_v50 = vadd.f32 %v3064_v28, %v3028_v42  ;;  %v3055_v4 = vadd.f32 %v3049_v43, %v2888_v46  ;;  %v7090_v28 = vld [vmem:[#allocation17 + $0x68] ss:$16 sps:$4 sm:$0xff]   ;;  %v7093_v32 = vld [vmem:[#allocation17 + $0x80] ss:$16 sps:$4 sm:$0xff]  }
 0x810   : > { %7545 = vpow2.f32 %v5958_v39  ;;  %v5960_v51 = vmul.f32 -1.442695, %v3069_v45  ;;  %v7104_v35 = vld [vmem:[#allocation17 + $0xac] ss:$16 sps:$4 sm:$0xff]   ;;  %v7099_v37 = vld [vmem:[#allocation17 + $0xa0] ss:$16 sps:$4 sm:$0xff]  }
 0x811   : > { %7547 = vpow2.f32 %v5959_v47  ;;  %v5961_v52 = vmul.f32 -1.442695, %v3070_v50  ;;  %v7102_v38 = vld [vmem:[#allocation17 + $0xa8] ss:$16 sps:$4 sm:$0xff]   ;;  %v7107_v39 = vld [vmem:[#allocation17 + $0xc4] ss:$16 sps:$4 sm:$0xff]  }
 0x812   : > { %7549 = vpow2.f32 %v5960_v51  ;;  %v7110_v45 = vld [vmem:[#allocation17 + $0xcc] ss:$16 sps:$4 sm:$0xff]   ;;  %v7105_v46 = vld [vmem:[#allocation17 + $0xc0] ss:$16 sps:$4 sm:$0xff]   ;;  %v7108_v42 = vld [vmem:[#allocation17 + $0xc8] ss:$16 sps:$4 sm:$0xff]  }
 0x813   : > { %7551 = vpow2.f32 %v5961_v52  ;;  %v7113_v47 = vld [vmem:[#allocation17 + $0xe4] ss:$16 sps:$4 sm:$0xff]   ;;  %v7116_v50 = vld [vmem:[#allocation17 + $0xec] ss:$16 sps:$4 sm:$0xff]   ;;  %v7111_v51 = vld [vmem:[#allocation17 + $0xe0] ss:$16 sps:$4 sm:$0xff]  }
 0x814   : > { %v7114_v52 = vld [vmem:[#allocation17 + $0xe8] ss:$16 sps:$4 sm:$0xff]   ;;  %v7134_v27 = vld [vmem:[#allocation17 + $0x14c] ss:$16 sps:$4 sm:$0xff]   ;;  %v7129_v43 = vld [vmem:[#allocation17 + $0x140] ss:$16 sps:$4 sm:$0xff]  }
 0x81a   : > { %v7546_v36 = vpop.eup %7545 }
 0x81b   : > { %v7548_v16 = vpop.eup %7547  ;;  %v3083_v54 = vadd.f32 1.0, %v7546_v36  ;;  %v7119_v36 = vld [vmem:[#allocation17 + $0x104] ss:$16 sps:$4 sm:$0xff]  }
 0x81c   : > { %v7550_v58 = vpop.eup %7549  ;;  %v3084_v59 = vadd.f32 1.0, %v7548_v16  ;;  %v7122_v16 = vld [vmem:[#allocation17 + $0x10c] ss:$16 sps:$4 sm:$0xff]  }
 0x81d   : > { %v7552_v60 = vpop.eup %7551  ;;  %7553 = vrcp.f32 %v3083_v54  ;;  %v3085_v41 = vadd.f32 1.0, %v7550_v58  ;;  %v7117_v54 = vld [vmem:[#allocation17 + $0x100] ss:$16 sps:$4 sm:$0xff]   ;;  %v7120_v58 = vld [vmem:[#allocation17 + $0x108] ss:$16 sps:$4 sm:$0xff]  }
 0x81e   : > { %7555 = vrcp.f32 %v3084_v59  ;;  %v3086_v44 = vadd.f32 1.0, %v7552_v60  ;;  %v7125_v59 = vld [vmem:[#allocation17 + $0x124] ss:$16 sps:$4 sm:$0xff]   ;;  %v7128_v60 = vld [vmem:[#allocation17 + $0x12c] ss:$16 sps:$4 sm:$0xff]  }
 0x81f   : > { %7557 = vrcp.f32 %v3085_v41  ;;  %v7123_v41 = vld [vmem:[#allocation17 + $0x120] ss:$16 sps:$4 sm:$0xff]  }
 0x820   : > { %7559 = vrcp.f32 %v3086_v44  ;;  %v7126_v44 = vld [vmem:[#allocation17 + $0x128] ss:$16 sps:$4 sm:$0xff]  }
 0x827   : > { %v7554_v63 = vpop.eup %7553 }
 0x828   : > { %v7556_v2 = vpop.eup %7555  ;;  %v3095_v0 = vmul.f32 %v7554_v63, %v3052_v55  ;;  %v7132_v55 = vld [vmem:[#allocation17 + $0x148] ss:$16 sps:$4 sm:$0xff]   ;;  %v7137_v63 = vld [vmem:[#allocation17 + $0x164] ss:$16 sps:$4 sm:$0xff]  }
 0x829   : > { %v7558_v3 = vpop.eup %7557  ;;  %v3096_v40 = vmul.f32 %v7556_v2, %v3053_v1  ;;  %v7140_v1 = vld [vmem:[#allocation17 + $0x16c] ss:$16 sps:$4 sm:$0xff]   ;;  %v7135_v2 = vld [vmem:[#allocation17 + $0x160] ss:$16 sps:$4 sm:$0xff]  }
 0x82a   : > { %v7560_v48 = vpop.eup %7559  ;;  %v3097_v49 = vmul.f32 %v7558_v3, %v3054_v34  ;;  %v7138_v34 = vld [vmem:[#allocation17 + $0x168] ss:$16 sps:$4 sm:$0xff]   ;;  %v7146_v3 = vld [vmem:[#allocation17 + $0x18c] ss:$16 sps:$4 sm:$0xff]  }
 0x82b   : > { %v3098_v5 = vmul.f32 %v7560_v48, %v3055_v4  ;;  %v7141_v4 = vld [vmem:[#allocation17 + $0x180] ss:$16 sps:$4 sm:$0xff]   ;;  %v7149_v48 = vld [vmem:[#allocation17 + $0x1a4] ss:$16 sps:$4 sm:$0xff]  }
 0x82c   : > { %v3099_v6 = vpack.c.bf16 %v3097_v49, %v3095_v0  ;;  %v7143_v0 = vld [vmem:[#allocation17 + $0x184] ss:$16 sps:$4 sm:$0xff]   ;;  %v7152_v49 = vld [vmem:[#allocation17 + $0x1ac] ss:$16 sps:$4 sm:$0xff]  }
 0x82d   : > { %v3100_v8 = vpack.c.bf16 %v3098_v5, %v3096_v40  ;;  %v7144_v40 = vld [vmem:[#allocation17 + $0x188] ss:$16 sps:$4 sm:$0xff]   ;;  %v7147_v5 = vld [vmem:[#allocation17 + $0x1a0] ss:$16 sps:$4 sm:$0xff]  }
 0x82f   : > { %3106 = vmatprep.subr.bf16.mxu0 %v3100_v8  ;;  %3154 = vmatprep.subr.bf16.mxu1 %v3100_v8 }
 0x830   : > { %3107 = vmatpush1.bf16.msra.mxu0 %v3099_v6  ;;  %3155 = vmatpush1.bf16.msra.mxu1 %v3099_v6 }
 0x831   : > { %3202 = vmatprep.subr.bf16.mxu0 %v3100_v8  ;;  %3250 = vmatprep.subr.bf16.mxu1 %v3100_v8  ;;  %v7155_v8 = vld [vmem:[#allocation17 + $0x1c4] ss:$16 sps:$4 sm:$0xff]  }
 0x833   : > { %5962 = vmatmul.mubr.msk.bf16.vlgmr.msra.gmra.mrb[88].mxu0 %vm3102_vm7, %v3101_v56  ;;  %5964 = vmatmul.mubr.msk.bf16.vlgmr.msra.gmra.mrb[80].mxu1 %vm3102_vm7, %v5963_v9  ;;  %v7158_v56 = vld [vmem:[#allocation17 + $0x1cc] ss:$16 sps:$4 sm:$0xff]   ;;  %v7153_v9 = vld [vmem:[#allocation17 + $0x1c0] ss:$16 sps:$4 sm:$0xff]  }
 0x834   : > { %3203 = vmatpush1.bf16.msra.mxu0 %v3099_v6  ;;  %3251 = vmatpush1.bf16.msra.mxu1 %v3099_v6  ;;  %v7150_v6 = vld [vmem:[#allocation17 + $0x1a8] ss:$16 sps:$4 sm:$0xff]  }
 0x835   : > { %3234 = vmatprep.mubr.bf16.mxu0 %v7947_v7  ;;  %3282 = vmatprep.mubr.bf16.mxu1 %v7947_v7  ;;  %v7075_v7 = vld [vmem:[#allocation17 + $0x20] ss:$16 sps:$4 sm:$0xff]  }
 0x836   : > { %4851 = vmatprep.subr.bf16.mxu0 %v7071_v57  ;;  %5015 = vmatprep.subr.bf16.mxu1 %v7074_v10  ;;  %v7156_v57 = vld [vmem:[#allocation17 + $0x1c8] ss:$16 sps:$4 sm:$0xff]   ;;  %v7161_v10 = vld [vmem:[#allocation17 + $0x1e4] ss:$16 sps:$4 sm:$0xff]  }
 0x83b   : > { %5966 = vmatmul.mubr.msk.bf16.vlgmr.msra.gmra.mrb[92].mxu0 %vm3102_vm7, %v5965_v11  ;;  %5968 = vmatmul.mubr.msk.bf16.vlgmr.msra.gmra.mrb[84].mxu1 %vm3102_vm7, %v5967_v13  ;;  %v7164_v11 = vld [vmem:[#allocation17 + $0x1ec] ss:$16 sps:$4 sm:$0xff]   ;;  %v7167_v13 = vld [vmem:[#allocation17 + $0x204] ss:$16 sps:$4 sm:$0xff]  }
 0x83c   : > { %4852 = vmatpush1.bf16.msra.mxu0 %v7069_v53  ;;  %5016 = vmatpush1.bf16.msra.mxu1 %v7072_v12  ;;  %v7159_v53 = vld [vmem:[#allocation17 + $0x1e0] ss:$16 sps:$4 sm:$0xff]   ;;  %v7162_v12 = vld [vmem:[#allocation17 + $0x1e8] ss:$16 sps:$4 sm:$0xff]  }
 0x83d   : > { %4853 = vmatprep.subr.bf16.mxu0 %v7077_v14  ;;  %5017 = vmatprep.subr.bf16.mxu1 %v7080_v15  ;;  %v7170_v14 = vld [vmem:[#allocation17 + $0x20c] ss:$16 sps:$4 sm:$0xff]  }
 0x840   : > { %4854 = vmatpush1.bf16.msra.mxu0 %v7075_v7  ;;  %5018 = vmatpush1.bf16.msra.mxu1 %v7078_v17 }
 0x841   : > { %4855 = vmatprep.subr.bf16.mxu0 %v7083_v62  ;;  %5019 = vmatprep.subr.bf16.mxu1 %v7086_v21 }
 0x844   : > { %4856 = vmatpush1.bf16.msra.mxu0 %v7081_v18  ;;  %5020 = vmatpush1.bf16.msra.mxu1 %v7084_v19  ;;  %v7165_v19 = vld [vmem:[#allocation17 + $0x200] ss:$16 sps:$4 sm:$0xff]  }
 0x845   : > { %4857 = vmatprep.subr.bf16.mxu0 %v7089_v20  ;;  %5021 = vmatprep.subr.bf16.mxu1 %v7092_v24  ;;  %v7168_v20 = vld [vmem:[#allocation17 + $0x208] ss:$16 sps:$4 sm:$0xff]  }
 0x848   : > { %4858 = vmatpush1.bf16.msra.mxu0 %v7087_v26  ;;  %5022 = vmatpush1.bf16.msra.mxu1 %v7090_v28 }
 0x849   : > { %4859 = vmatprep.subr.bf16.mxu0 %v7095_v29  ;;  %5023 = vmatprep.subr.bf16.mxu1 %v7098_v30  ;;  %v7173_v29 = vld [vmem:[#allocation17 + $0x224] ss:$16 sps:$4 sm:$0xff]   ;;  %v7176_v30 = vld [vmem:[#allocation17 + $0x22c] ss:$16 sps:$4 sm:$0xff]  }
 0x84c   : > { %4860 = vmatpush1.bf16.msra.mxu0 %v7093_v32  ;;  %5024 = vmatpush1.bf16.msra.mxu1 %v7096_v31 }
 0x84d   : > { %4861 = vmatprep.subr.bf16.mxu0 %v7101_v33  ;;  %5025 = vmatprep.subr.bf16.mxu1 %v7104_v35  ;;  %v7171_v33 = vld [vmem:[#allocation17 + $0x220] ss:$16 sps:$4 sm:$0xff]   ;;  %v7174_v35 = vld [vmem:[#allocation17 + $0x228] ss:$16 sps:$4 sm:$0xff]  }
 0x850   : > { %4862 = vmatpush1.bf16.msra.mxu0 %v7099_v37  ;;  %5026 = vmatpush1.bf16.msra.mxu1 %v7102_v38  ;;  %v7179_v37 = vld [vmem:[#allocation17 + $0x244] ss:$16 sps:$4 sm:$0xff]   ;;  %v7182_v38 = vld [vmem:[#allocation17 + $0x24c] ss:$16 sps:$4 sm:$0xff]  }
 0x851   : > { %4863 = vmatprep.subr.bf16.mxu0 %v7107_v39  ;;  %5027 = vmatprep.subr.bf16.mxu1 %v7110_v45 }
 0x854   : > { %4864 = vmatpush1.bf16.msra.mxu0 %v7105_v46  ;;  %5028 = vmatpush1.bf16.msra.mxu1 %v7108_v42  ;;  %v7177_v46 = vld [vmem:[#allocation17 + $0x240] ss:$16 sps:$4 sm:$0xff]   ;;  %v7180_v42 = vld [vmem:[#allocation17 + $0x248] ss:$16 sps:$4 sm:$0xff]  }
 0x855   : > { %4865 = vmatprep.subr.bf16.mxu0 %v7113_v47  ;;  %5029 = vmatprep.subr.bf16.mxu1 %v7116_v50  ;;  %v7185_v50 = vld [vmem:[#allocation17 + $0x264] ss:$16 sps:$4 sm:$0xff]  }
 0x858   : > { %4866 = vmatpush1.bf16.msra.mxu0 %v7111_v51  ;;  %5030 = vmatpush1.bf16.msra.mxu1 %v7114_v52  ;;  %v7188_v51 = vld [vmem:[#allocation17 + $0x26c] ss:$16 sps:$4 sm:$0xff]  }
 0x859   : > { %4867 = vmatprep.subr.bf16.mxu0 %v7119_v36  ;;  %5031 = vmatprep.subr.bf16.mxu1 %v7122_v16  ;;  %v7183_v36 = vld [vmem:[#allocation17 + $0x260] ss:$16 sps:$4 sm:$0xff]   ;;  %v7186_v16 = vld [vmem:[#allocation17 + $0x268] ss:$16 sps:$4 sm:$0xff]  }
 0x85c   : > { %4868 = vmatpush1.bf16.msra.mxu0 %v7117_v54  ;;  %5032 = vmatpush1.bf16.msra.mxu1 %v7120_v58  ;;  %v7191_v54 = vld [vmem:[#allocation17 + $0x284] ss:$16 sps:$4 sm:$0xff]   ;;  %v7194_v58 = vld [vmem:[#allocation17 + $0x28c] ss:$16 sps:$4 sm:$0xff]  }
 0x85d   : > { %4869 = vmatprep.subr.bf16.mxu0 %v7125_v59  ;;  %5033 = vmatprep.subr.bf16.mxu1 %v7128_v60  ;;  %v7189_v59 = vld [vmem:[#allocation17 + $0x280] ss:$16 sps:$4 sm:$0xff]   ;;  %v7192_v60 = vld [vmem:[#allocation17 + $0x288] ss:$16 sps:$4 sm:$0xff]  }
 0x860   : > { %4870 = vmatpush1.bf16.msra.mxu0 %v7123_v41  ;;  %5034 = vmatpush1.bf16.msra.mxu1 %v7126_v44  ;;  %v7197_v41 = vld [vmem:[#allocation17 + $0x2a4] ss:$16 sps:$4 sm:$0xff]   ;;  %v7200_v44 = vld [vmem:[#allocation17 + $0x2ac] ss:$16 sps:$4 sm:$0xff]  }
 0x861   : > { %4871 = vmatprep.subr.bf16.mxu0 %v7131_v61  ;;  %5035 = vmatprep.subr.bf16.mxu1 %v7134_v27  ;;  %v7195_v61 = vld [vmem:[#allocation17 + $0x2a0] ss:$16 sps:$4 sm:$0xff]   ;;  %v7198_v27 = vld [vmem:[#allocation17 + $0x2a8] ss:$16 sps:$4 sm:$0xff]  }
 0x864   : > { %4872 = vmatpush1.bf16.msra.mxu0 %v7129_v43  ;;  %5036 = vmatpush1.bf16.msra.mxu1 %v7132_v55  ;;  %v7203_v43 = vld [vmem:[#allocation17 + $0x2c4] ss:$16 sps:$4 sm:$0xff]   ;;  %v7206_v55 = vld [vmem:[#allocation17 + $0x2cc] ss:$16 sps:$4 sm:$0xff]  }
 0x865   : > { %4873 = vmatprep.subr.bf16.mxu0 %v7137_v63  ;;  %5037 = vmatprep.subr.bf16.mxu1 %v7140_v1 }
 0x868   : > { %4874 = vmatpush1.bf16.msra.mxu0 %v7135_v2  ;;  %5038 = vmatpush1.bf16.msra.mxu1 %v7138_v34  ;;  %v7201_v2 = vld [vmem:[#allocation17 + $0x2c0] ss:$16 sps:$4 sm:$0xff]   ;;  %v7204_v34 = vld [vmem:[#allocation17 + $0x2c8] ss:$16 sps:$4 sm:$0xff]  }
 0x869   : > { %4875 = vmatprep.subr.bf16.mxu0 %v7143_v0  ;;  %5039 = vmatprep.subr.bf16.mxu1 %v7146_v3  ;;  %v7209_v3 = vld [vmem:[#allocation17 + $0x2e4] ss:$16 sps:$4 sm:$0xff]  }
 0x86c   : > { %4876 = vmatpush1.bf16.msra.mxu0 %v7141_v4  ;;  %5040 = vmatpush1.bf16.msra.mxu1 %v7144_v40  ;;  %v7212_v4 = vld [vmem:[#allocation17 + $0x2ec] ss:$16 sps:$4 sm:$0xff]  }
 0x86d   : > { %4877 = vmatprep.subr.bf16.mxu0 %v7149_v48  ;;  %5041 = vmatprep.subr.bf16.mxu1 %v7152_v49  ;;  %v7207_v48 = vld [vmem:[#allocation17 + $0x2e0] ss:$16 sps:$4 sm:$0xff]   ;;  %v7210_v49 = vld [vmem:[#allocation17 + $0x2e8] ss:$16 sps:$4 sm:$0xff]  }
 0x870   : > { %4878 = vmatpush1.bf16.msra.mxu0 %v7147_v5  ;;  %5042 = vmatpush1.bf16.msra.mxu1 %v7150_v6  ;;  %v7215_v5 = vld [vmem:[#allocation17 + $0x304] ss:$16 sps:$4 sm:$0xff]   ;;  %v7218_v6 = vld [vmem:[#allocation17 + $0x30c] ss:$16 sps:$4 sm:$0xff]  }
 0x871   : > { %4879 = vmatprep.subr.bf16.mxu0 %v7155_v8  ;;  %5043 = vmatprep.subr.bf16.mxu1 %v7158_v56  ;;  %v7213_v8 = vld [vmem:[#allocation17 + $0x300] ss:$16 sps:$4 sm:$0xff]   ;;  %v7216_v56 = vld [vmem:[#allocation17 + $0x308] ss:$16 sps:$4 sm:$0xff]  }
 0x874   : > { %4880 = vmatpush1.bf16.msra.mxu0 %v7153_v9  ;;  %5044 = vmatpush1.bf16.msra.mxu1 %v7156_v57  ;;  %v7221_v9 = vld [vmem:[#allocation17 + $0x324] ss:$16 sps:$4 sm:$0xff]   ;;  %v7224_v57 = vld [vmem:[#allocation17 + $0x32c] ss:$16 sps:$4 sm:$0xff]  }
 0x875   : > { %4881 = vmatprep.subr.bf16.mxu0 %v7161_v10  ;;  %5045 = vmatprep.subr.bf16.mxu1 %v7164_v11  ;;  %v7219_v10 = vld [vmem:[#allocation17 + $0x320] ss:$16 sps:$4 sm:$0xff]   ;;  %v7222_v11 = vld [vmem:[#allocation17 + $0x328] ss:$16 sps:$4 sm:$0xff]  }
 0x878   : > { %4882 = vmatpush1.bf16.msra.mxu0 %v7159_v53  ;;  %5046 = vmatpush1.bf16.msra.mxu1 %v7162_v12  ;;  %v7227_v53 = vld [vmem:[#allocation17 + $0x344] ss:$16 sps:$4 sm:$0xff]   ;;  %v7230_v12 = vld [vmem:[#allocation17 + $0x34c] ss:$16 sps:$4 sm:$0xff]  }
 0x879   : > { %4892 = vmatprep.subr.bf16.mxu0 %v7167_v13  ;;  %5056 = vmatprep.subr.bf16.mxu1 %v7170_v14  ;;  %v7225_v13 = vld [vmem:[#allocation17 + $0x340] ss:$16 sps:$4 sm:$0xff]   ;;  %v7228_v14 = vld [vmem:[#allocation17 + $0x348] ss:$16 sps:$4 sm:$0xff]  }
 0x906   : > { %v3140_v15 = vpop.f32.mrb[88].mxu0  ;;  %v8790_v7 = vpop.f32.mrb[80].mxu1 }
 0x907   : > { %v3142_v17 = vpop.f32.mrb[89].mxu0  ;;  %v3190_v62 = vpop.f32.mrb[81].mxu1  ;;  %v3147_v26 = vpack.c.bf16 %v3140_v15, %v3140_v15  ;;  %v7233_v15 = vld [vmem:[#allocation17 + $0x364] ss:$16 sps:$4 sm:$0xff]  }
 0x908   : > { %v3148_v21 = vpack.c.bf16 %v3142_v17, %v3142_v17  ;;  %v3144_v18 = vpop.f32.mrb[90].mxu0  ;;  %v3192_v24 = vpop.f32.mrb[82].mxu1  ;;  %v3196_v31 = vpack.c.bf16 %v3190_v62, %v3190_v62  ;;  %v7236_v17 = vld [vmem:[#allocation17 + $0x36c] ss:$16 sps:$4 sm:$0xff]   ;;  %v7231_v62 = vld [vmem:[#allocation17 + $0x360] ss:$16 sps:$4 sm:$0xff]  }
 0x909   : > { %v3145_v28 = vpop.f32.mrb[91].mxu0  ;;  %v3193_v32 = vpop.f32.mrb[83].mxu1  ;;  %v7239_v18 = vld [vmem:[#allocation17 + $0x384] ss:$16 sps:$4 sm:$0xff]   ;;  %v7240_v24 = vld [vmem:[#allocation17 + $0x388] ss:$16 sps:$4 sm:$0xff]  }
 0x90a   : > { %4883 = vmatprep.mubr.bf16.mxu0 %v3148_v21  ;;  %5047 = vmatprep.mubr.bf16.mxu1 %v3148_v21  ;;  %v7234_v21 = vld [vmem:[#allocation17 + $0x368] ss:$16 sps:$4 sm:$0xff]   ;;  %v7248_v28 = vld [vmem:[#allocation17 + $0x3ac] ss:$16 sps:$4 sm:$0xff]   ;;  %v7251_v32 = vld [vmem:[#allocation17 + $0x3c4] ss:$16 sps:$4 sm:$0xff]  }
 0x90b   : > { %4884 = vmatmul.mubr.bf16.vlgmr.msra.gmra.mrb[96].mxu0 %v3147_v26  ;;  %5048 = vmatmul.mubr.bf16.vlgmr.msra.gmra.mrb[88].mxu1 %v3147_v26  ;;  %v7245_v26 = vld [vmem:[#allocation17 + $0x3a4] ss:$16 sps:$4 sm:$0xff]  }
 0x90c   : > { %4893 = vmatpush1.bf16.msra.mxu0 %v7165_v19  ;;  %5057 = vmatpush1.bf16.msra.mxu1 %v7168_v20  ;;  %v7242_v19 = vld [vmem:[#allocation17 + $0x38c] ss:$16 sps:$4 sm:$0xff]   ;;  %v7237_v20 = vld [vmem:[#allocation17 + $0x380] ss:$16 sps:$4 sm:$0xff]  }
 0x90d   : > { %4894 = vmatprep.subr.bf16.mxu0 %v7173_v29  ;;  %5058 = vmatprep.subr.bf16.mxu1 %v7176_v30  ;;  %v7243_v29 = vld [vmem:[#allocation17 + $0x3a0] ss:$16 sps:$4 sm:$0xff]   ;;  %v7246_v30 = vld [vmem:[#allocation17 + $0x3a8] ss:$16 sps:$4 sm:$0xff]  }
 0x90e   : > { %4924 = vmatprep.mubr.bf16.mxu0 %v3196_v31  ;;  %5088 = vmatprep.mubr.bf16.mxu1 %v3196_v31  ;;  %v8792_v39 = vpop.f32.mrb[92].mxu0  ;;  %v8796_v63 = vpop.f32.mrb[84].mxu1  ;;  %v7254_v31 = vld [vmem:[#allocation17 + $0x3cc] ss:$16 sps:$4 sm:$0xff]  }
 0x90f   : > { %v8794_v45 = vpop.f32.mrb[93].mxu0  ;;  %v8798_v1 = vpop.f32.mrb[85].mxu1 }
 0x910   : > { %4895 = vmatpush1.bf16.msra.mxu0 %v7171_v33  ;;  %5059 = vmatpush1.bf16.msra.mxu1 %v7174_v35  ;;  %v3240_v47 = vpop.f32.mrb[94].mxu0  ;;  %v3288_v0 = vpop.f32.mrb[86].mxu1  ;;  %v7249_v33 = vld [vmem:[#allocation17 + $0x3c0] ss:$16 sps:$4 sm:$0xff]   ;;  %v7252_v35 = vld [vmem:[#allocation17 + $0x3c8] ss:$16 sps:$4 sm:$0xff]  }
 0x911   : > { %4896 = vmatprep.subr.bf16.mxu0 %v7179_v37  ;;  %5060 = vmatprep.subr.bf16.mxu1 %v7182_v38  ;;  %v3241_v52 = vpop.f32.mrb[95].mxu0  ;;  %v3289_v40 = vpop.f32.mrb[87].mxu1  ;;  %v7257_v37 = vld [vmem:[#allocation17 + $0x3e4] ss:$16 sps:$4 sm:$0xff]   ;;  %v7260_v38 = vld [vmem:[#allocation17 + $0x3ec] ss:$16 sps:$4 sm:$0xff]  }
 0x912   : > { %v7263_v47 = vld [vmem:[#allocation17 + $0x404] ss:$16 sps:$4 sm:$0xff]   ;;  %v7261_v52 = vld [vmem:[#allocation17 + $0x400] ss:$16 sps:$4 sm:$0xff]   ;;  %v7296_v40 = vld [vmem:[#allocation17 + $0x4ac] ss:$16 sps:$4 sm:$0xff]  }
 0x913   : > { %v7285_v0 = vld [vmem:[#allocation17 + $0x480] ss:$16 sps:$4 sm:$0xff]  }
 0x914   : > { %4897 = vmatpush1.bf16.msra.mxu0 %v7177_v46  ;;  %5061 = vmatpush1.bf16.msra.mxu1 %v7180_v42  ;;  %v7255_v46 = vld [vmem:[#allocation17 + $0x3e0] ss:$16 sps:$4 sm:$0xff]   ;;  %v7258_v42 = vld [vmem:[#allocation17 + $0x3e8] ss:$16 sps:$4 sm:$0xff]  }
 0x915   : > { %4898 = vmatprep.subr.bf16.mxu0 %v7185_v50  ;;  %5062 = vmatprep.subr.bf16.mxu1 %v7188_v51  ;;  %v7266_v50 = vld [vmem:[#allocation17 + $0x40c] ss:$16 sps:$4 sm:$0xff]   ;;  %v3195_v51 = vpack.c.bf16 %v8790_v7, %v8790_v7  ;;  %v7275_v7 = vld [vmem:[#allocation17 + $0x444] ss:$16 sps:$4 sm:$0xff]  }
 0x918   : > { %4899 = vmatpush1.bf16.msra.mxu0 %v7183_v36  ;;  %5063 = vmatpush1.bf16.msra.mxu1 %v7186_v16  ;;  %v7264_v36 = vld [vmem:[#allocation17 + $0x408] ss:$16 sps:$4 sm:$0xff]   ;;  %v7269_v16 = vld [vmem:[#allocation17 + $0x424] ss:$16 sps:$4 sm:$0xff]  }
 0x919   : > { %4900 = vmatprep.subr.bf16.mxu0 %v7191_v54  ;;  %5064 = vmatprep.subr.bf16.mxu1 %v7194_v58  ;;  %v7272_v54 = vld [vmem:[#allocation17 + $0x42c] ss:$16 sps:$4 sm:$0xff]   ;;  %v3244_v58 = vpack.c.bf16 %v8794_v45, %v8794_v45 }
 0x91a   : > { %v7284_v45 = vld [vmem:[#allocation17 + $0x46c] ss:$16 sps:$4 sm:$0xff]  }
 0x91c   : > { %4901 = vmatpush1.bf16.msra.mxu0 %v7189_v59  ;;  %5065 = vmatpush1.bf16.msra.mxu1 %v7192_v60  ;;  %v7267_v59 = vld [vmem:[#allocation17 + $0x420] ss:$16 sps:$4 sm:$0xff]   ;;  %v7270_v60 = vld [vmem:[#allocation17 + $0x428] ss:$16 sps:$4 sm:$0xff]  }
 0x91d   : > { %4902 = vmatprep.subr.bf16.mxu0 %v7197_v41  ;;  %5066 = vmatprep.subr.bf16.mxu1 %v7200_v44  ;;  %v7278_v41 = vld [vmem:[#allocation17 + $0x44c] ss:$16 sps:$4 sm:$0xff]   ;;  %v7273_v44 = vld [vmem:[#allocation17 + $0x440] ss:$16 sps:$4 sm:$0xff]  }
 0x920   : > { %4903 = vmatpush1.bf16.msra.mxu0 %v7195_v61  ;;  %5067 = vmatpush1.bf16.msra.mxu1 %v7198_v27  ;;  %v7276_v61 = vld [vmem:[#allocation17 + $0x448] ss:$16 sps:$4 sm:$0xff]   ;;  %v7281_v27 = vld [vmem:[#allocation17 + $0x464] ss:$16 sps:$4 sm:$0xff]  }
 0x921   : > { %4904 = vmatprep.subr.bf16.mxu0 %v7203_v43  ;;  %5068 = vmatprep.subr.bf16.mxu1 %v7206_v55  ;;  %v7279_v43 = vld [vmem:[#allocation17 + $0x460] ss:$16 sps:$4 sm:$0xff]   ;;  %v7282_v55 = vld [vmem:[#allocation17 + $0x468] ss:$16 sps:$4 sm:$0xff]  }
 0x924   : > { %4905 = vmatpush1.bf16.msra.mxu0 %v7201_v2  ;;  %5069 = vmatpush1.bf16.msra.mxu1 %v7204_v34  ;;  %v7287_v2 = vld [vmem:[#allocation17 + $0x484] ss:$16 sps:$4 sm:$0xff]   ;;  %v7290_v34 = vld [vmem:[#allocation17 + $0x48c] ss:$16 sps:$4 sm:$0xff]  }
 0x925   : > { %4906 = vmatprep.subr.bf16.mxu0 %v7209_v3  ;;  %5070 = vmatprep.subr.bf16.mxu1 %v7212_v4  ;;  %v7288_v3 = vld [vmem:[#allocation17 + $0x488] ss:$16 sps:$4 sm:$0xff]   ;;  %v7293_v4 = vld [vmem:[#allocation17 + $0x4a4] ss:$16 sps:$4 sm:$0xff]  }
 0x928   : > { %4907 = vmatpush1.bf16.msra.mxu0 %v7207_v48  ;;  %5071 = vmatpush1.bf16.msra.mxu1 %v7210_v49  ;;  %v7291_v48 = vld [vmem:[#allocation17 + $0x4a0] ss:$16 sps:$4 sm:$0xff]   ;;  %v7294_v49 = vld [vmem:[#allocation17 + $0x4a8] ss:$16 sps:$4 sm:$0xff]  }
 0x929   : > { %4908 = vmatprep.subr.bf16.mxu0 %v7215_v5  ;;  %5072 = vmatprep.subr.bf16.mxu1 %v7218_v6  ;;  %v7299_v5 = vld [vmem:[#allocation17 + $0x4c4] ss:$16 sps:$4 sm:$0xff]   ;;  %v7302_v6 = vld [vmem:[#allocation17 + $0x4cc] ss:$16 sps:$4 sm:$0xff]  }
 0x92c   : > { %4909 = vmatpush1.bf16.msra.mxu0 %v7213_v8  ;;  %5073 = vmatpush1.bf16.msra.mxu1 %v7216_v56  ;;  %v7297_v8 = vld [vmem:[#allocation17 + $0x4c0] ss:$16 sps:$4 sm:$0xff]   ;;  %v7300_v56 = vld [vmem:[#allocation17 + $0x4c8] ss:$16 sps:$4 sm:$0xff]  }
 0x92d   : > { %4910 = vmatprep.subr.bf16.mxu0 %v7221_v9  ;;  %5074 = vmatprep.subr.bf16.mxu1 %v7224_v57  ;;  %v7305_v9 = vld [vmem:[#allocation17 + $0x4e4] ss:$16 sps:$4 sm:$0xff]   ;;  %v7308_v57 = vld [vmem:[#allocation17 + $0x4ec] ss:$16 sps:$4 sm:$0xff]  }
 0x930   : > { %4911 = vmatpush1.bf16.msra.mxu0 %v7219_v10  ;;  %5075 = vmatpush1.bf16.msra.mxu1 %v7222_v11  ;;  %v7303_v10 = vld [vmem:[#allocation17 + $0x4e0] ss:$16 sps:$4 sm:$0xff]   ;;  %v7306_v11 = vld [vmem:[#allocation17 + $0x4e8] ss:$16 sps:$4 sm:$0xff]  }
 0x931   : > { %4912 = vmatprep.subr.bf16.mxu0 %v7227_v53  ;;  %5076 = vmatprep.subr.bf16.mxu1 %v7230_v12  ;;  %v7311_v53 = vld [vmem:[#allocation17 + $0x504] ss:$16 sps:$4 sm:$0xff]   ;;  %v7314_v12 = vld [vmem:[#allocation17 + $0x50c] ss:$16 sps:$4 sm:$0xff]  }
 0x934   : > { %4913 = vmatpush1.bf16.msra.mxu0 %v7225_v13  ;;  %5077 = vmatpush1.bf16.msra.mxu1 %v7228_v14  ;;  %v7309_v13 = vld [vmem:[#allocation17 + $0x500] ss:$16 sps:$4 sm:$0xff]   ;;  %v7312_v14 = vld [vmem:[#allocation17 + $0x508] ss:$16 sps:$4 sm:$0xff]  }
 0x935   : > { %4914 = vmatprep.subr.bf16.mxu0 %v7233_v15  ;;  %5078 = vmatprep.subr.bf16.mxu1 %v7236_v17  ;;  %v7317_v15 = vld [vmem:[#allocation17 + $0x524] ss:$16 sps:$4 sm:$0xff]   ;;  %v7320_v17 = vld [vmem:[#allocation17 + $0x52c] ss:$16 sps:$4 sm:$0xff]  }
 0x938   : > { %4915 = vmatpush1.bf16.msra.mxu0 %v7231_v62  ;;  %5079 = vmatpush1.bf16.msra.mxu1 %v7234_v21  ;;  %v7315_v62 = vld [vmem:[#allocation17 + $0x520] ss:$16 sps:$4 sm:$0xff]   ;;  %v7318_v21 = vld [vmem:[#allocation17 + $0x528] ss:$16 sps:$4 sm:$0xff]  }
 0x939   : > { %4916 = vmatprep.subr.bf16.mxu0 %v7239_v18  ;;  %5080 = vmatprep.subr.bf16.mxu1 %v7242_v19  ;;  %v7323_v18 = vld [vmem:[#allocation17 + $0x544] ss:$16 sps:$4 sm:$0xff]   ;;  %v7326_v19 = vld [vmem:[#allocation17 + $0x54c] ss:$16 sps:$4 sm:$0xff]  }
 0x93c   : > { %4917 = vmatpush1.bf16.msra.mxu0 %v7237_v20  ;;  %5081 = vmatpush1.bf16.msra.mxu1 %v7240_v24  ;;  %v7321_v20 = vld [vmem:[#allocation17 + $0x540] ss:$16 sps:$4 sm:$0xff]   ;;  %v7324_v24 = vld [vmem:[#allocation17 + $0x548] ss:$16 sps:$4 sm:$0xff]  }
 0x93d   : > { %4918 = vmatprep.subr.bf16.mxu0 %v7245_v26  ;;  %5082 = vmatprep.subr.bf16.mxu1 %v7248_v28  ;;  %v7329_v26 = vld [vmem:[#allocation17 + $0x564] ss:$16 sps:$4 sm:$0xff]   ;;  %v7332_v28 = vld [vmem:[#allocation17 + $0x56c] ss:$16 sps:$4 sm:$0xff]  }
 0x940   : > { %4919 = vmatpush1.bf16.msra.mxu0 %v7243_v29  ;;  %5083 = vmatpush1.bf16.msra.mxu1 %v7246_v30  ;;  %v7327_v29 = vld [vmem:[#allocation17 + $0x560] ss:$16 sps:$4 sm:$0xff]   ;;  %v7330_v30 = vld [vmem:[#allocation17 + $0x568] ss:$16 sps:$4 sm:$0xff]  }
 0x941   : > { %4920 = vmatprep.subr.bf16.mxu0 %v7251_v32  ;;  %5084 = vmatprep.subr.bf16.mxu1 %v7254_v31  ;;  %v7335_v32 = vld [vmem:[#allocation17 + $0x584] ss:$16 sps:$4 sm:$0xff]   ;;  %v7338_v31 = vld [vmem:[#allocation17 + $0x58c] ss:$16 sps:$4 sm:$0xff]  }
 0x944   : > { %4921 = vmatpush1.bf16.msra.mxu0 %v7249_v33  ;;  %5085 = vmatpush1.bf16.msra.mxu1 %v7252_v35  ;;  %v7333_v33 = vld [vmem:[#allocation17 + $0x580] ss:$16 sps:$4 sm:$0xff]   ;;  %v7336_v35 = vld [vmem:[#allocation17 + $0x588] ss:$16 sps:$4 sm:$0xff]  }
 0x945   : > { %4922 = vmatprep.subr.bf16.mxu0 %v7257_v37  ;;  %5086 = vmatprep.subr.bf16.mxu1 %v7260_v38  ;;  %v7341_v37 = vld [vmem:[#allocation17 + $0x5a4] ss:$16 sps:$4 sm:$0xff]   ;;  %v7344_v38 = vld [vmem:[#allocation17 + $0x5ac] ss:$16 sps:$4 sm:$0xff]  }
 0x948   : > { %4923 = vmatpush1.bf16.msra.mxu0 %v7255_v46  ;;  %5087 = vmatpush1.bf16.msra.mxu1 %v7258_v42  ;;  %v7339_v46 = vld [vmem:[#allocation17 + $0x5a0] ss:$16 sps:$4 sm:$0xff]   ;;  %v7342_v42 = vld [vmem:[#allocation17 + $0x5a8] ss:$16 sps:$4 sm:$0xff]  }
 0x949   : > { %4933 = vmatprep.subr.bf16.mxu0 %v7263_v47  ;;  %5097 = vmatprep.subr.bf16.mxu1 %v7266_v50  ;;  %v7347_v47 = vld [vmem:[#allocation17 + $0x5c4] ss:$16 sps:$4 sm:$0xff]   ;;  %v7350_v50 = vld [vmem:[#allocation17 + $0x5cc] ss:$16 sps:$4 sm:$0xff]  }
 0x94b   : > { %4925 = vmatmul.mubr.bf16.vlgmr.msra.gmra.mrb[96].mxu0 %v3195_v51  ;;  %5089 = vmatmul.mubr.bf16.vlgmr.msra.gmra.mrb[88].mxu1 %v3195_v51  ;;  %v7345_v51 = vld [vmem:[#allocation17 + $0x5c0] ss:$16 sps:$4 sm:$0xff]  }
 0x94c   : > { %4934 = vmatpush1.bf16.msra.mxu0 %v7261_v52  ;;  %5098 = vmatpush1.bf16.msra.mxu1 %v7264_v36  ;;  %v7348_v52 = vld [vmem:[#allocation17 + $0x5c8] ss:$16 sps:$4 sm:$0xff]   ;;  %v7353_v36 = vld [vmem:[#allocation17 + $0x5e4] ss:$16 sps:$4 sm:$0xff]  }
 0x94d   : > { %4935 = vmatprep.subr.bf16.mxu0 %v7269_v16  ;;  %5099 = vmatprep.subr.bf16.mxu1 %v7272_v54  ;;  %v7356_v16 = vld [vmem:[#allocation17 + $0x5ec] ss:$16 sps:$4 sm:$0xff]   ;;  %v7351_v54 = vld [vmem:[#allocation17 + $0x5e0] ss:$16 sps:$4 sm:$0xff]  }
 0x94e   : > { %4965 = vmatprep.mubr.bf16.mxu0 %v3244_v58  ;;  %5129 = vmatprep.mubr.bf16.mxu1 %v3244_v58  ;;  %v7354_v58 = vld [vmem:[#allocation17 + $0x5e8] ss:$16 sps:$4 sm:$0xff]  }
 0x950   : > { %4936 = vmatpush1.bf16.msra.mxu0 %v7267_v59  ;;  %5100 = vmatpush1.bf16.msra.mxu1 %v7270_v60  ;;  %v7359_v59 = vld [vmem:[#allocation17 + $0x604] ss:$16 sps:$4 sm:$0xff]   ;;  %v7362_v60 = vld [vmem:[#allocation17 + $0x60c] ss:$16 sps:$4 sm:$0xff]  }
 0x951   : > { %4937 = vmatprep.subr.bf16.mxu0 %v7275_v7  ;;  %5101 = vmatprep.subr.bf16.mxu1 %v7278_v41  ;;  %v3243_v7 = vpack.c.bf16 %v8792_v39, %v8792_v39  ;;  %v7357_v41 = vld [vmem:[#allocation17 + $0x600] ss:$16 sps:$4 sm:$0xff]   ;;  %v7371_v39 = vld [vmem:[#allocation17 + $0x644] ss:$16 sps:$4 sm:$0xff]  }
 0x954   : > { %4938 = vmatpush1.bf16.msra.mxu0 %v7273_v44  ;;  %5102 = vmatpush1.bf16.msra.mxu1 %v7276_v61  ;;  %v7360_v44 = vld [vmem:[#allocation17 + $0x608] ss:$16 sps:$4 sm:$0xff]   ;;  %v7365_v61 = vld [vmem:[#allocation17 + $0x624] ss:$16 sps:$4 sm:$0xff]  }
 0x955   : > { %4939 = vmatprep.subr.bf16.mxu0 %v7281_v27  ;;  %5103 = vmatprep.subr.bf16.mxu1 %v7284_v45  ;;  %v7368_v27 = vld [vmem:[#allocation17 + $0x62c] ss:$16 sps:$4 sm:$0xff]   ;;  %v3292_v45 = vpack.c.bf16 %v8798_v1, %v8798_v1 }
 0x956   : > { %v7380_v1 = vld [vmem:[#allocation17 + $0x66c] ss:$16 sps:$4 sm:$0xff]  }
 0x958   : > { %4940 = vmatpush1.bf16.msra.mxu0 %v7279_v43  ;;  %5104 = vmatpush1.bf16.msra.mxu1 %v7282_v55  ;;  %v7363_v43 = vld [vmem:[#allocation17 + $0x620] ss:$16 sps:$4 sm:$0xff]   ;;  %v7366_v55 = vld [vmem:[#allocation17 + $0x628] ss:$16 sps:$4 sm:$0xff]  }
 0x959   : > { %4941 = vmatprep.subr.bf16.mxu0 %v7287_v2  ;;  %5105 = vmatprep.subr.bf16.mxu1 %v7290_v34  ;;  %v7374_v2 = vld [vmem:[#allocation17 + $0x64c] ss:$16 sps:$4 sm:$0xff]   ;;  %v7369_v34 = vld [vmem:[#allocation17 + $0x640] ss:$16 sps:$4 sm:$0xff]  }
 0x95c   : > { %4942 = vmatpush1.bf16.msra.mxu0 %v7285_v0  ;;  %5106 = vmatpush1.bf16.msra.mxu1 %v7288_v3  ;;  %v7372_v0 = vld [vmem:[#allocation17 + $0x648] ss:$16 sps:$4 sm:$0xff]   ;;  %v7377_v3 = vld [vmem:[#allocation17 + $0x664] ss:$16 sps:$4 sm:$0xff]  }
 0x95d   : > { %4943 = vmatprep.subr.bf16.mxu0 %v7293_v4  ;;  %5107 = vmatprep.subr.bf16.mxu1 %v7296_v40  ;;  %v7375_v4 = vld [vmem:[#allocation17 + $0x660] ss:$16 sps:$4 sm:$0xff]   ;;  %v7378_v40 = vld [vmem:[#allocation17 + $0x668] ss:$16 sps:$4 sm:$0xff]  }
 0x960   : > { %4944 = vmatpush1.bf16.msra.mxu0 %v7291_v48  ;;  %5108 = vmatpush1.bf16.msra.mxu1 %v7294_v49  ;;  %v7383_v48 = vld [vmem:[#allocation17 + $0x684] ss:$16 sps:$4 sm:$0xff]   ;;  %v7386_v49 = vld [vmem:[#allocation17 + $0x68c] ss:$16 sps:$4 sm:$0xff]  }
 0x961   : > { %4945 = vmatprep.subr.bf16.mxu0 %v7299_v5  ;;  %5109 = vmatprep.subr.bf16.mxu1 %v7302_v6  ;;  %v7381_v5 = vld [vmem:[#allocation17 + $0x680] ss:$16 sps:$4 sm:$0xff]   ;;  %v7384_v6 = vld [vmem:[#allocation17 + $0x688] ss:$16 sps:$4 sm:$0xff]  }
 0x964   : > { %4946 = vmatpush1.bf16.msra.mxu0 %v7297_v8  ;;  %5110 = vmatpush1.bf16.msra.mxu1 %v7300_v56  ;;  %v7389_v8 = vld [vmem:[#allocation17 + $0x6a4] ss:$16 sps:$4 sm:$0xff]   ;;  %v7392_v56 = vld [vmem:[#allocation17 + $0x6ac] ss:$16 sps:$4 sm:$0xff]  }
 0x965   : > { %4947 = vmatprep.subr.bf16.mxu0 %v7305_v9  ;;  %5111 = vmatprep.subr.bf16.mxu1 %v7308_v57  ;;  %v7387_v9 = vld [vmem:[#allocation17 + $0x6a0] ss:$16 sps:$4 sm:$0xff]   ;;  %v7390_v57 = vld [vmem:[#allocation17 + $0x6a8] ss:$16 sps:$4 sm:$0xff]  }
 0x968   : > { %4948 = vmatpush1.bf16.msra.mxu0 %v7303_v10  ;;  %5112 = vmatpush1.bf16.msra.mxu1 %v7306_v11  ;;  %v7395_v10 = vld [vmem:[#allocation17 + $0x6c4] ss:$16 sps:$4 sm:$0xff]   ;;  %v7398_v11 = vld [vmem:[#allocation17 + $0x6cc] ss:$16 sps:$4 sm:$0xff]  }
 0x969   : > { %4949 = vmatprep.subr.bf16.mxu0 %v7311_v53  ;;  %5113 = vmatprep.subr.bf16.mxu1 %v7314_v12  ;;  %v7393_v53 = vld [vmem:[#allocation17 + $0x6c0] ss:$16 sps:$4 sm:$0xff]   ;;  %v7396_v12 = vld [vmem:[#allocation17 + $0x6c8] ss:$16 sps:$4 sm:$0xff]  }
 0x96c   : > { %4950 = vmatpush1.bf16.msra.mxu0 %v7309_v13  ;;  %5114 = vmatpush1.bf16.msra.mxu1 %v7312_v14  ;;  %v7401_v13 = vld [vmem:[#allocation17 + $0x6e4] ss:$16 sps:$4 sm:$0xff]   ;;  %v7404_v14 = vld [vmem:[#allocation17 + $0x6ec] ss:$16 sps:$4 sm:$0xff]  }
 0x96d   : > { %4951 = vmatprep.subr.bf16.mxu0 %v7317_v15  ;;  %5115 = vmatprep.subr.bf16.mxu1 %v7320_v17  ;;  %v7399_v15 = vld [vmem:[#allocation17 + $0x6e0] ss:$16 sps:$4 sm:$0xff]   ;;  %v7402_v17 = vld [vmem:[#allocation17 + $0x6e8] ss:$16 sps:$4 sm:$0xff]  }
 0x970   : > { %4952 = vmatpush1.bf16.msra.mxu0 %v7315_v62  ;;  %5116 = vmatpush1.bf16.msra.mxu1 %v7318_v21  ;;  %v7407_v62 = vld [vmem:[#allocation17 + $0x704] ss:$16 sps:$4 sm:$0xff]   ;;  %v7410_v21 = vld [vmem:[#allocation17 + $0x70c] ss:$16 sps:$4 sm:$0xff]  }
 0x971   : > { %4953 = vmatprep.subr.bf16.mxu0 %v7323_v18  ;;  %5117 = vmatprep.subr.bf16.mxu1 %v7326_v19  ;;  %v7405_v18 = vld [vmem:[#allocation17 + $0x700] ss:$16 sps:$4 sm:$0xff]   ;;  %v7408_v19 = vld [vmem:[#allocation17 + $0x708] ss:$16 sps:$4 sm:$0xff]  }
 0x974   : > { %4954 = vmatpush1.bf16.msra.mxu0 %v7321_v20  ;;  %5118 = vmatpush1.bf16.msra.mxu1 %v7324_v24  ;;  %v7413_v20 = vld [vmem:[#allocation17 + $0x724] ss:$16 sps:$4 sm:$0xff]   ;;  %v7416_v24 = vld [vmem:[#allocation17 + $0x72c] ss:$16 sps:$4 sm:$0xff]  }
 0x975   : > { %4955 = vmatprep.subr.bf16.mxu0 %v7329_v26  ;;  %5119 = vmatprep.subr.bf16.mxu1 %v7332_v28  ;;  %v7411_v26 = vld [vmem:[#allocation17 + $0x720] ss:$16 sps:$4 sm:$0xff]   ;;  %v7414_v28 = vld [vmem:[#allocation17 + $0x728] ss:$16 sps:$4 sm:$0xff]  }
 0x978   : > { %4956 = vmatpush1.bf16.msra.mxu0 %v7327_v29  ;;  %5120 = vmatpush1.bf16.msra.mxu1 %v7330_v30  ;;  %v7419_v29 = vld [vmem:[#allocation17 + $0x744] ss:$16 sps:$4 sm:$0xff]   ;;  %v7422_v30 = vld [vmem:[#allocation17 + $0x74c] ss:$16 sps:$4 sm:$0xff]  }
 0x979   : > { %4957 = vmatprep.subr.bf16.mxu0 %v7335_v32  ;;  %5121 = vmatprep.subr.bf16.mxu1 %v7338_v31  ;;  %v7417_v32 = vld [vmem:[#allocation17 + $0x740] ss:$16 sps:$4 sm:$0xff]   ;;  %v7420_v31 = vld [vmem:[#allocation17 + $0x748] ss:$16 sps:$4 sm:$0xff]  }
 0x97c   : > { %4958 = vmatpush1.bf16.msra.mxu0 %v7333_v33  ;;  %5122 = vmatpush1.bf16.msra.mxu1 %v7336_v35  ;;  %v7425_v33 = vld [vmem:[#allocation17 + $0x764] ss:$16 sps:$4 sm:$0xff]   ;;  %v7428_v35 = vld [vmem:[#allocation17 + $0x76c] ss:$16 sps:$4 sm:$0xff]  }
 0x97d   : > { %4959 = vmatprep.subr.bf16.mxu0 %v7341_v37  ;;  %5123 = vmatprep.subr.bf16.mxu1 %v7344_v38  ;;  %v7423_v37 = vld [vmem:[#allocation17 + $0x760] ss:$16 sps:$4 sm:$0xff]   ;;  %v7426_v38 = vld [vmem:[#allocation17 + $0x768] ss:$16 sps:$4 sm:$0xff]  }
 0x980   : > { %4960 = vmatpush1.bf16.msra.mxu0 %v7339_v46  ;;  %5124 = vmatpush1.bf16.msra.mxu1 %v7342_v42  ;;  %v7431_v46 = vld [vmem:[#allocation17 + $0x784] ss:$16 sps:$4 sm:$0xff]   ;;  %v7434_v42 = vld [vmem:[#allocation17 + $0x78c] ss:$16 sps:$4 sm:$0xff]  }
 0x981   : > { %4961 = vmatprep.subr.bf16.mxu0 %v7347_v47  ;;  %5125 = vmatprep.subr.bf16.mxu1 %v7350_v50  ;;  %v7429_v47 = vld [vmem:[#allocation17 + $0x780] ss:$16 sps:$4 sm:$0xff]   ;;  %v7432_v50 = vld [vmem:[#allocation17 + $0x788] ss:$16 sps:$4 sm:$0xff]  }
 0x984   : > { %4962 = vmatpush1.bf16.msra.mxu0 %v7345_v51  ;;  %5126 = vmatpush1.bf16.msra.mxu1 %v7348_v52  ;;  %v7437_v51 = vld [vmem:[#allocation17 + $0x7a4] ss:$16 sps:$4 sm:$0xff]   ;;  %v7440_v52 = vld [vmem:[#allocation17 + $0x7ac] ss:$16 sps:$4 sm:$0xff]  }
 0x985   : > { %4963 = vmatprep.subr.bf16.mxu0 %v7353_v36  ;;  %5127 = vmatprep.subr.bf16.mxu1 %v7356_v16  ;;  %v7435_v36 = vld [vmem:[#allocation17 + $0x7a0] ss:$16 sps:$4 sm:$0xff]   ;;  %v7438_v16 = vld [vmem:[#allocation17 + $0x7a8] ss:$16 sps:$4 sm:$0xff]  }
 0x988   : > { %4964 = vmatpush1.bf16.msra.mxu0 %v7351_v54  ;;  %5128 = vmatpush1.bf16.msra.mxu1 %v7354_v58  ;;  %v7443_v54 = vld [vmem:[#allocation17 + $0x7c4] ss:$16 sps:$4 sm:$0xff]   ;;  %v7446_v58 = vld [vmem:[#allocation17 + $0x7cc] ss:$16 sps:$4 sm:$0xff]  }
 0x989   : > { %4974 = vmatprep.subr.bf16.mxu0 %v7359_v59  ;;  %5138 = vmatprep.subr.bf16.mxu1 %v7362_v60  ;;  %v7441_v59 = vld [vmem:[#allocation17 + $0x7c0] ss:$16 sps:$4 sm:$0xff]   ;;  %v7444_v60 = vld [vmem:[#allocation17 + $0x7c8] ss:$16 sps:$4 sm:$0xff]  }
 0x98b   : > { %4966 = vmatmul.mubr.bf16.vlgmr.msra.gmra.mrb[96].mxu0 %v3243_v7  ;;  %5130 = vmatmul.mubr.bf16.vlgmr.msra.gmra.mrb[88].mxu1 %v3243_v7  ;;  %v7449_v7 = vld [vmem:[#allocation17 + $0x7e4] ss:$16 sps:$4 sm:$0xff]  }
 0x98c   : > { %4975 = vmatpush1.bf16.msra.mxu0 %v7357_v41  ;;  %5139 = vmatpush1.bf16.msra.mxu1 %v7360_v44  ;;  %v7452_v41 = vld [vmem:[#allocation17 + $0x7ec] ss:$16 sps:$4 sm:$0xff]   ;;  %v7447_v44 = vld [vmem:[#allocation17 + $0x7e0] ss:$16 sps:$4 sm:$0xff]  }
 0x98d   : > { %4976 = vmatprep.subr.bf16.mxu0 %v7365_v61  ;;  %5140 = vmatprep.subr.bf16.mxu1 %v7368_v27  ;;  %v7450_v61 = vld [vmem:[#allocation17 + $0x7e8] ss:$16 sps:$4 sm:$0xff]  }
 0x98e   : > { %5006 = vmatprep.mubr.bf16.mxu0 %v3292_v45  ;;  %5170 = vmatprep.mubr.bf16.mxu1 %v3292_v45  ;;  %v7453_v27 = vld [vmem:[%s9052_s23 + $0x40] sm:$0xff]   ;;  %s5553_s23 = sshll.u32 %s760_s27, 4  ;;  %s8923_s23 = int_to_ptr.vmem [resolvable:$true] %s5553_s23 }
 0x98f   : > { %v7454_v45 = vld [vmem:[%s9053_s0 + $0xc0] sm:$0xff]   ;;  %s7841_s24 = scalar_lea.vmem %s8923_s23, 64  ;;  %p7848_p3 = scmp.lt.s32.totalorder %s8923_s23, %s7846_s29 }
 0x990   : > { %4977 = vmatpush1.bf16.msra.mxu0 %v7363_v43  ;;  %5141 = vmatpush1.bf16.msra.mxu1 %v7366_v55  ;;  %v7455_v43 = vld [vmem:[%s9053_s0] sm:$0xff]   ;;  %p7842_p5 = scmp.ne.s32.totalorder %s8923_s23, %s7841_s24  ;;  %p7849_p4 = scmp.lt.s32.totalorder %s7847_s26, %s7841_s24 }
 0x991   : > { %4978 = vmatprep.subr.bf16.mxu0 %v7371_v39  ;;  %5142 = vmatprep.subr.bf16.mxu1 %v7374_v2  ;;  %v7456_v55 = vld [vmem:[%s9053_s0 + $0x80] sm:$0xff]   ;;  %v3291_v39 = vpack.c.bf16 %v8796_v63, %v8796_v63  ;;  %v7457_v2 = vld [vmem:[%s9053_s0 + $0x48] sm:$0xff]  }
 0x992   : > { %v7460_v63 = vld [vmem:[%s9053_s0 + $0x88] sm:$0xff]   ;;  %p7843_p10 = pnand %p7842_p5, %p9059_p0  ;;  %p7850_p12 = por %p7849_p4, %p7848_p3 }
 0x994   : > { %4979 = vmatpush1.bf16.msra.mxu0 %v7369_v34  ;;  %5143 = vmatpush1.bf16.msra.mxu1 %v7372_v0  ;;  %v7458_v34 = vld [vmem:[%s9053_s0 + $0xc8] sm:$0xff]   ;;  %p7844_p2 = pneg %p7843_p10 }
 0x995   : > { %4980 = vmatprep.subr.bf16.mxu0 %v7377_v3  ;;  %5144 = vmatprep.subr.bf16.mxu1 %v7380_v1  ;;  %v7459_v0 = vld [vmem:[%s9053_s0 + $0x8] sm:$0xff]   ;;  %v7461_v3 = vld [vmem:[%s9053_s0 + $0x50] sm:$0xff]  }
 0x996   : > { %v7462_v1 = vld [vmem:[%s9053_s0 + $0xd0] sm:$0xff]   ;;  %p7851_p7 = pnand %p7850_p12, %p7844_p2 }
 0x998   : > { %4981 = vmatpush1.bf16.msra.mxu0 %v7375_v4  ;;  %5145 = vmatpush1.bf16.msra.mxu1 %v7378_v40  ;;  %v7463_v4 = vld [vmem:[%s9053_s0 + $0x10] sm:$0xff]  }
 0x999   : > { %4982 = vmatprep.subr.bf16.mxu0 %v7383_v48  ;;  %5146 = vmatprep.subr.bf16.mxu1 %v7386_v49  ;;  %v7464_v40 = vld [vmem:[%s9053_s0 + $0x90] sm:$0xff]   ;;  %v7465_v48 = vld [vmem:[%s9053_s0 + $0x58] sm:$0xff]  }
 0x99a   : > { %v7466_v49 = vld [vmem:[%s9053_s0 + $0xd8] sm:$0xff]  }
 0x99c   : > { %4983 = vmatpush1.bf16.msra.mxu0 %v7381_v5  ;;  %5147 = vmatpush1.bf16.msra.mxu1 %v7384_v6  ;;  %v7467_v5 = vld [vmem:[%s9053_s0 + $0x18] sm:$0xff]  }
 0x99d   : > { %4984 = vmatprep.subr.bf16.mxu0 %v7389_v8  ;;  %5148 = vmatprep.subr.bf16.mxu1 %v7392_v56  ;;  %v7468_v6 = vld [vmem:[%s9053_s0 + $0x98] sm:$0xff]   ;;  %v7469_v8 = vld [vmem:[%s9053_s0 + $0x60] sm:$0xff]  }
 0x99e   : > { %v7470_v56 = vld [vmem:[%s9053_s0 + $0xe0] sm:$0xff]  }
 0x9a0   : > { %4985 = vmatpush1.bf16.msra.mxu0 %v7387_v9  ;;  %5149 = vmatpush1.bf16.msra.mxu1 %v7390_v57  ;;  %v7471_v9 = vld [vmem:[%s9053_s0 + $0x20] sm:$0xff]  }
 0x9a1   : > { %4986 = vmatprep.subr.bf16.mxu0 %v7395_v10  ;;  %5150 = vmatprep.subr.bf16.mxu1 %v7398_v11  ;;  %v7472_v57 = vld [vmem:[%s9053_s0 + $0xa0] sm:$0xff]   ;;  %v7473_v10 = vld [vmem:[%s9053_s0 + $0x68] sm:$0xff]  }
 0x9a2   : > { %v7474_v11 = vld [vmem:[%s9053_s0 + $0xe8] sm:$0xff]  }
 0x9a4   : > { %4987 = vmatpush1.bf16.msra.mxu0 %v7393_v53  ;;  %5151 = vmatpush1.bf16.msra.mxu1 %v7396_v12  ;;  %v7475_v53 = vld [vmem:[%s9053_s0 + $0x28] sm:$0xff]  }
 0x9a5   : > { %4988 = vmatprep.subr.bf16.mxu0 %v7401_v13  ;;  %5152 = vmatprep.subr.bf16.mxu1 %v7404_v14  ;;  %v7476_v12 = vld [vmem:[%s9053_s0 + $0xa8] sm:$0xff]   ;;  %v7477_v13 = vld [vmem:[%s9053_s0 + $0x70] sm:$0xff]  }
 0x9a6   : > { %v7478_v14 = vld [vmem:[%s9053_s0 + $0xf0] sm:$0xff]  }
 0x9a8   : > { %4989 = vmatpush1.bf16.msra.mxu0 %v7399_v15  ;;  %5153 = vmatpush1.bf16.msra.mxu1 %v7402_v17  ;;  %v7479_v15 = vld [vmem:[%s9053_s0 + $0x30] sm:$0xff]  }
 0x9a9   : > { %4990 = vmatprep.subr.bf16.mxu0 %v7407_v62  ;;  %5154 = vmatprep.subr.bf16.mxu1 %v7410_v21  ;;  %v7480_v17 = vld [vmem:[%s9053_s0 + $0xb0] sm:$0xff]   ;;  %v7481_v62 = vld [vmem:[%s9053_s0 + $0x78] sm:$0xff]  }
 0x9aa   : > { %v7482_v21 = vld [vmem:[%s9053_s0 + $0xf8] sm:$0xff]  }
 0x9ac   : > { %4991 = vmatpush1.bf16.msra.mxu0 %v7405_v18  ;;  %5155 = vmatpush1.bf16.msra.mxu1 %v7408_v19  ;;  %v7483_v18 = vld [vmem:[%s9053_s0 + $0x38] sm:$0xff]  }
 0x9ad   : > { %4992 = vmatprep.subr.bf16.mxu0 %v7413_v20  ;;  %5156 = vmatprep.subr.bf16.mxu1 %v7416_v24  ;;  %v7484_v19 = vld [vmem:[%s9053_s0 + $0xb8] sm:$0xff]   ;;  %v3561_v20 = vsub.s32 2, %v8754_v22  ;;  %v3549_v24 = vld [vmem:[%s9054_s4] sm:$0xf]  ;;  %s5540_s4 = scalar_lea.sflag [#allocation4], %s758_s18 }
 0x9b0   : > { %4993 = vmatpush1.bf16.msra.mxu0 %v7411_v26  ;;  %5157 = vmatpush1.bf16.msra.mxu1 %v7414_v28  ;;  %v3565_v26 = vsub.s32 3, %v8754_v22  ;;  %v3554_v28 = vrot.slane %v3549_v24, %v8757_v23 }
 0x9b1   : > { %4994 = vmatprep.subr.bf16.mxu0 %v7419_v29  ;;  %5158 = vmatprep.subr.bf16.mxu1 %v7422_v30  ;;  %v3562_v29 = vrot.slane %v3549_v24, %v3561_v20  ;;  %v3558_v30 = vrot.slane %v3549_v24, %v8763_v25 }
 0x9b4   : > { %4995 = vmatpush1.bf16.msra.mxu0 %v7417_v32  ;;  %5159 = vmatpush1.bf16.msra.mxu1 %v7420_v31  ;;  %v3566_v32 = vrot.slane %v3549_v24, %v3565_v26 }
 0x9b5   : > { %4996 = vmatprep.subr.bf16.mxu0 %v7425_v33  ;;  %5160 = vmatprep.subr.bf16.mxu1 %v7428_v35 }
 0x9b8   : > { %4997 = vmatpush1.bf16.msra.mxu0 %v7423_v37  ;;  %5161 = vmatpush1.bf16.msra.mxu1 %v7426_v38 }
 0x9b9   : > { %4998 = vmatprep.subr.bf16.mxu0 %v7431_v46  ;;  %5162 = vmatprep.subr.bf16.mxu1 %v7434_v42 }
 0x9bc   : > { %4999 = vmatpush1.bf16.msra.mxu0 %v7429_v47  ;;  %5163 = vmatpush1.bf16.msra.mxu1 %v7432_v50 }
 0x9bd   : > { %5000 = vmatprep.subr.bf16.mxu0 %v7437_v51  ;;  %5164 = vmatprep.subr.bf16.mxu1 %v7440_v52 }
 0x9c0   : > { %5001 = vmatpush1.bf16.msra.mxu0 %v7435_v36  ;;  %5165 = vmatpush1.bf16.msra.mxu1 %v7438_v16 }
 0x9c1   : > { %5002 = vmatprep.subr.bf16.mxu0 %v7443_v54  ;;  %5166 = vmatprep.subr.bf16.mxu1 %v7446_v58 }
 0x9c4   : > { %5003 = vmatpush1.bf16.msra.mxu0 %v7441_v59  ;;  %5167 = vmatpush1.bf16.msra.mxu1 %v7444_v60 }
 0x9c5   : > { %5004 = vmatprep.subr.bf16.mxu0 %v7449_v7  ;;  %5168 = vmatprep.subr.bf16.mxu1 %v7452_v41 }
 0x9c8   : > { %5005 = vmatpush1.bf16.msra.mxu0 %v7447_v44  ;;  %5169 = vmatpush1.bf16.msra.mxu1 %v7450_v61 }
 0x9c9   : > { %6360 = vmatprep.subr.bf16.mxu0 %v7453_v27  ;;  %6382 = vmatprep.subr.bf16.mxu1 %v7454_v45 }
 0x9cb   : > { %5007 = vmatmul.mubr.bf16.vlgmr.msra.gmra.mrb[96].mxu0 %v3291_v39  ;;  %5171 = vmatmul.mubr.bf16.vlgmr.msra.gmra.mrb[88].mxu1 %v3291_v39 }
 0x9cc   : > { %6361 = vmatpush3.bf16.msra.mxu0 %v7455_v43  ;;  %6383 = vmatpush3.bf16.msra.mxu1 %v7456_v55  ;;  %v6225_v43 = vld [vmem:[%s9056_s1] ss:$0 sm:$0xff] }
 0x9cd   : > { %6362 = vmatprep.subr.bf16.mxu0 %v7457_v2  ;;  %6384 = vmatprep.subr.bf16.mxu1 %v7458_v34 }
 0x9d0   : > { %6363 = vmatpush3.bf16.msra.mxu0 %v7459_v0  ;;  %6385 = vmatpush3.bf16.msra.mxu1 %v7460_v63 }
 0x9d1   : > { %6364 = vmatprep.subr.bf16.mxu0 %v7461_v3  ;;  %6386 = vmatprep.subr.bf16.mxu1 %v7462_v1 }
 0x9d4   : > { %6365 = vmatpush3.bf16.msra.mxu0 %v7463_v4  ;;  %6387 = vmatpush3.bf16.msra.mxu1 %v7464_v40 }
 0x9d5   : > { %6366 = vmatprep.subr.bf16.mxu0 %v7465_v48  ;;  %6388 = vmatprep.subr.bf16.mxu1 %v7466_v49 }
 0x9d8   : > { %6367 = vmatpush3.bf16.msra.mxu0 %v7467_v5  ;;  %6389 = vmatpush3.bf16.msra.mxu1 %v7468_v6 }
 0x9d9   : > { %6368 = vmatprep.subr.bf16.mxu0 %v7469_v8  ;;  %6390 = vmatprep.subr.bf16.mxu1 %v7470_v56 }
 0x9dc   : > { %6369 = vmatpush3.bf16.msra.mxu0 %v7471_v9  ;;  %6391 = vmatpush3.bf16.msra.mxu1 %v7472_v57 }
 0x9dd   : > { %6370 = vmatprep.subr.bf16.mxu0 %v7473_v10  ;;  %6392 = vmatprep.subr.bf16.mxu1 %v7474_v11 }
 0x9e0   : > { %6371 = vmatpush3.bf16.msra.mxu0 %v7475_v53  ;;  %6393 = vmatpush3.bf16.msra.mxu1 %v7476_v12 }
 0x9e1   : > { %6372 = vmatprep.subr.bf16.mxu0 %v7477_v13  ;;  %6394 = vmatprep.subr.bf16.mxu1 %v7478_v14 }
 0x9e4   : > { %6373 = vmatpush3.bf16.msra.mxu0 %v7479_v15  ;;  %6395 = vmatpush3.bf16.msra.mxu1 %v7480_v17 }
 0x9e5   : > { %6374 = vmatprep.subr.bf16.mxu0 %v7481_v62  ;;  %6396 = vmatprep.subr.bf16.mxu1 %v7482_v21 }
 0x9e8   : > { %6375 = vmatpush3.bf16.msra.mxu0 %v7483_v18  ;;  %6397 = vmatpush3.bf16.msra.mxu1 %v7484_v19 }
 0xa9e   : > { %v5008_v31 = vpop.f32.mrb[96].mxu0  ;;  %v5172_v33 = vpop.f32.mrb[88].mxu1 }
 0xa9f   : > { %v6680_v35 = vadd.f32 %v5008_v31, %v3554_v28  ;;  %v6682_v37 = vadd.f32 %v5172_v33, %v3562_v29  ;;  %v5010_v38 = vpop.f32.mrb[97].mxu0  ;;  %v5174_v46 = vpop.f32.mrb[89].mxu1 }
 0xaa0   : > { %v6681_v42 = vadd.f32 %v5010_v38, %v3558_v30  ;;  %v6683_v47 = vadd.f32 %v5174_v46, %v3566_v32  ;;  %v5012_v50 = vpop.f32.mrb[98].mxu0  ;;  %v5176_v51 = vpop.f32.mrb[90].mxu1 }
 0xaa1   : > { %vm5179_vm8 = vcmp.gt.f32.partialorder %v6680_v35, 0.0  ;;  %v5183_v52 = vmul.f32 0.1, %v6680_v35  ;;  %vm5181_vm9 = vcmp.gt.f32.partialorder %v6682_v37, 0.0  ;;  %v5185_v22 = vmul.f32 0.1, %v6682_v37 }
 0xaa2   : > { %vm5180_vm10 = vcmp.gt.f32.partialorder %v6681_v42, 0.0  ;;  %v5184_v23 = vmul.f32 0.1, %v6681_v42  ;;  %vm5182_vm11 = vcmp.gt.f32.partialorder %v6683_v47, 0.0  ;;  %v5186_v25 = vmul.f32 0.1, %v6683_v47 }
 0xaa3   : > { %v5187_v36 = vsel %vm5179_vm8, %v6680_v35, %v5183_v52  ;;  %v5189_v16 = vsel %vm5181_vm9, %v6682_v37, %v5185_v22  ;;  %v5013_v54 = vpop.f32.mrb[99].mxu0  ;;  %v5177_v58 = vpop.f32.mrb[91].mxu1 }
 0xaa4   : > { %v5188_v59 = vsel %vm5180_vm10, %v6681_v42, %v5184_v23  ;;  %v5190_v60 = vsel %vm5182_vm11, %v6683_v47, %v5186_v25  ;;  %v5191_v44 = vpack.c.bf16 %v5187_v36, %v5187_v36  ;;  %v5193_v61 = vpack.c.bf16 %v5189_v16, %v5189_v16 }
 0xaa5   : > { %v5192_v7 = vpack.c.bf16 %v5188_v59, %v5188_v59  ;;  %v5194_v41 = vpack.c.bf16 %v5190_v60, %v5190_v60 }
 0xaa7   : > { %5490 = vmatprep.mubr.bf16.mxu0 %v5192_v7  ;;  %5530 = vmatprep.mubr.bf16.mxu1 %v5194_v41 }
 0xaa8   : > { %5491 = vmatmul.mubr.bf16.vlgmr.msra.gmra.mrb[100].mxu0 %v5191_v44  ;;  %5531 = vmatmul.mubr.bf16.vlgmr.msra.gmra.mrb[92].mxu1 %v5193_v61 }
 0xb7b   : > { %v6376_v27 = vpop.f32.mrb[100].mxu0  ;;  %v6398_v45 = vpop.f32.mrb[92].mxu1 }
 0xb7c   : > { %v6377_v55 = vpop.f32.mrb[101].mxu0  ;;  %v6399_v39 = vpop.f32.mrb[93].mxu1 }
 0xb7d   : > { %v6378_v2 = vadd.f32 %v6377_v55, %v6376_v27  ;;  %v6400_v34 = vadd.f32 %v6399_v39, %v6398_v45  ;;  %v6379_v0 = vpop.f32.mrb[102].mxu0  ;;  %v6401_v63 = vpop.f32.mrb[94].mxu1 }
 0xb7e   : > { %v6380_v3 = vpop.f32.mrb[103].mxu0  ;;  %v6402_v1 = vpop.f32.mrb[95].mxu1 }
 0xb7f   : > { %v5493_v4 = vadd.f32 %v6378_v2, %v6225_v43 }
 0xb81   : > { %v5533_v40 = vadd.f32 %v6400_v34, %v5493_v4 }
 0xb83   : > { %5538 = vst [vmem:[%s760_s27] sm:$0xf] %v5533_v40 }
 0xb84   : > { %7854 = shalt.err (!%p7851_p7)
}
 0xb85   : > { %s7855_s18 = scalar_lea.hbm %s8921_s25, 64  ;;  %s7859_s10 = scalar_lea.hbm %s9058_s30, 128 }
 0xb86   : > { %p7856_p8 = scmp.ne.s32.totalorder %s8921_s25, %s7855_s18  ;;  %p7860_p1 = scmp.lt.u32.totalorder %s8921_s25, %s9058_s30 }
 0xb87   : > { %p7861_p6 = scmp.lt.u32.totalorder %s7859_s10, %s7855_s18  ;;  %p7863_p5 = scmp.lt.u32.totalorder %s7855_s18, %s8921_s25 }
 0xb88   : > { %p7857_p11 = pnand %p7856_p8, %p9059_p0 }
 0xb89   : > { %p7862_p9 = por %p7861_p6, %p7860_p1 }
 0xb8a   : > { %p7858_p13 = pneg %p7857_p11 }
 0xb8b   : > { %p7864_p10 = por %p7863_p5, %p7862_p9 }
 0xb8d   : > { %p7865_p2 = pnand %p7864_p10, %p7858_p13 }
 0xb8f   : > { %7868 = shalt.err (!%p7865_p2)
}
 0xb90   : > { %6765 = dma.vmem_to_hbm [thread:$0]  (%p9059_p0), %s8923_s23, 64, %s8921_s25, %s5540_s4  }
 0xb91 PF: > { %s9060_s19 = sld [smem:[#allocation30_spill]]  ;;  %s9061_s24 = sld [smem:[#allocation27_spill]] }
 0xb92   : > { %s9062_s2 = sld [smem:[#allocation34_spill]] }
 0xb97   : > { %p6822_p3 = scmp.ge.s32.totalorder %s9060_s19, 2  ;;  %s5565_s29 = sand.u32 1, %s9061_s24  }
 0xb98   : > { %p9063_p4 = scmp.ne.s32.totalorder %s9062_s2, 0  ;;  %s5566_s26 = scalar_lea.sflag [#allocation4], %s5565_s29 }
 0xb9a   : > { %p6799_p12 = pnand %p6822_p3, %p9063_p4 }
 0xb9c   : > { %7910 = dma.done.wait (!%p6799_p12), %s5566_s26, 64  }
 0xb9d   : > { %7912 = vsyncadd (!%p6799_p12), %s5566_s26, 4294967232  ;;  %s9064_s24 = sld [smem:[#allocation31_spill]]  ;;  %s9065_s1 = sld [smem:[#allocation28_spill]] }
 0xb9e   : > { %s9066_s22 = sld [smem:[#allocation29_spill]]  ;;  %s9067_s23 = sld [smem:[#allocation32_spill]] }
 0xba3   : > { %p36_p7 = scmp.ge.s32.totalorder %s9064_s24, 4  }
 0xba5   :  { %38 = sbr.rel (!%p36_p7) target bundleno = 21 (0x15), region = 191 }
 0xbac   :  { %5571 = vsyncpa [#allocation3], 1 }
 0xbad   :  { %5573 = vsyncpa [#allocation3 + $0x1], 1 }
 0xbae   :  { %5574 = vsyncpa [#allocation6], 1 }
 0xbaf   :  { %5575 = vsyncpa [#allocation9], 1 }
 0xbb0   :  { %5576 = vsyncpa [#allocation12], 1 }
 0xbb1   :  { %5577 = vsyncpa [#allocation15], 1 }
 0xbb2   :  { %5578 = vsyncpa [#allocation18], 1 }
 0xbb3   :  { %5579 = vsyncpa [#allocation4], 1 }
 0xbb4   :  { %5581 = vsyncpa [#allocation4 + $0x1], 1 }

</bundles_post_ra>
